<compile_context>
chip_gen: v7x
topology: tpu7x:2x2x1
jax: 0.10.0
libtpu: 0.0.40
codegen_flags: <defaults>
</compile_context>

<pallas_src>
import math

import jax
import jax.numpy as jnp
from jax.experimental import pallas as pl
from jax.experimental.pallas import tpu as pltpu

_BN_EPS = 1e-5


# ------------------------------- kernel body -------------------------------- #

def _deconv(x, m_ref, s_ref, zhat_ref):
    """stride-1 / pad-0 ConvTranspose2d in the packed 2D layout.

    x        : (N*H, in_cols)        rows = (n, i), cols = (j, ci) [+ zero pad]
    m_ref    : (in_cols, K*wc_pad)   lane-concatenated per-tap band matrices
    s_ref    : (N*Ho, K*N*H)         lane-concatenated 0/1 row-shift matrices
    zhat_ref : (K*N*H, wc_pad)       VMEM scratch for the vertically stacked Z
    returns  : (N*Ho, wc_pad)
    """
    nh = x.shape[0]
    wc = zhat_ref.shape[1]
    k = m_ref.shape[1] // wc
    # One wide matmul for all K taps (fills the MXU far better than K small ones).
    z = jnp.dot(x, m_ref[...], preferred_element_type=jnp.float32)
    # Lane-aligned copies: column block p of Z -> sublane offset p*N*H of Zhat.
    for p in range(k):
        zhat_ref[p * nh:(p + 1) * nh, :] = z[:, p * wc:(p + 1) * wc]
    # One matmul does the row-shift placement AND the sum over taps.
    return jnp.dot(s_ref[...], zhat_ref[...], preferred_element_type=jnp.float32)


def _relu_bn(y, p_ref, g_ref, b_ref):
    """F.relu followed by training-mode BatchNorm2d (batch statistics).

    p_ref : (wc, wc)  precomputed (T @ T.T) / count  (channel-mean broadcast)
    g_ref : (1, wc)   gamma broadcast to the (jo, co) column layout
    b_ref : (1, wc)   beta  broadcast to the (jo, co) column layout
    """
    y = jnp.maximum(y, 0.0)                               # F.relu (before BN)
    s1 = jnp.sum(y, axis=0, keepdims=True)                # (1, wc)
    s2 = jnp.sum(y * y, axis=0, keepdims=True)            # (1, wc)
    # Two *independent* matmuls: per-channel mean / mean-square broadcast back
    # into the packed column layout (the 1/count is baked into P).
    mean = jnp.dot(s1, p_ref[...], preferred_element_type=jnp.float32)
    mean_sq = jnp.dot(s2, p_ref[...], preferred_element_type=jnp.float32)
    # One-pass (biased) variance, as PyTorch uses for training-mode normalization.
    var = mean_sq - mean * mean
    inv = jax.lax.rsqrt(var + _BN_EPS)
    scale = g_ref[...] * inv
    shift = b_ref[...] - mean * scale
    return y * scale + shift


def _decoder_kernel(x_ref,
                    m1, s1, p1, g1, b1,
                    m2, s2, p2, g2, b2,
                    m3, s3, p3, g3, b3,
                    m4_hbm, s4, p4, g4, b4,
                    m5_hbm, s5,
                    o_ref,
                    z1, z2, z3, z4, z5,
                    m4_buf, m5_buf, dma_sem):
    # Prefetch the two largest constants from HBM so the DMA overlaps the
    # compute of the earlier layers.
    cp4 = pltpu.make_async_copy(m4_hbm, m4_buf, dma_sem.at[0])
    cp5 = pltpu.make_async_copy(m5_hbm, m5_buf, dma_sem.at[1])
    cp4.start()
    cp5.start()

    # NOTE: jnp.dot uses default matmul precision; pass precision=HIGHEST if
    # bit-level parity with PyTorch f32 ConvTranspose2d is ever required.
    x = x_ref[...]                                        # (N, latent) == (N*1, 1*Cin)
    x = _relu_bn(_deconv(x, m1, s1, z1), p1, g1, b1)      # (N*2,  128)
    x = _relu_bn(_deconv(x, m2, s2, z2), p2, g2, b2)      # (N*4,  128)
    x = _relu_bn(_deconv(x, m3, s3, z3), p3, g3, b3)      # (N*8,  128)
    cp4.wait()
    x = _relu_bn(_deconv(x, m4_buf, s4, z4), p4, g4, b4)  # (N*16, 128)
    cp5.wait()
    # (N*28, 128); only columns [0, 28) are real, the rest is zero padding.
    o_ref[...] = jax.nn.sigmoid(_deconv(x, m5_buf, s5, z5))


# ------------------------------ forward wrapper ----------------------------- #

def _decoder_forward(x_nchw, ops, meta):
    """x_nchw: (N, latent_dim, 1, 1) -> (N, 1, hw, hw)."""
    hw, out_cols, z_shapes = meta
    n = x_nchw.shape[0]
    x2d = x_nchw.reshape(n, -1)                           # (N*H, W*Cin) with H=W=1

    m4, m5 = ops[15], ops[20]                             # largest constants
    n_args = 1 + len(ops)
    in_specs = [pl.BlockSpec(memory_space=pltpu.MemorySpace.VMEM)] * n_args
    in_specs[1 + 15] = pl.BlockSpec(memory_space=pl.ANY)  # M4 stays in HBM
    in_specs[1 + 20] = pl.BlockSpec(memory_space=pl.ANY)  # M5 stays in HBM

    scratch_shapes = (
        [pltpu.VMEM(zs, jnp.float32) for zs in z_shapes]            # Zhat buffers
        + [pltpu.VMEM(m4.shape, jnp.float32),                        # M4 landing buf
           pltpu.VMEM(m5.shape, jnp.float32),                        # M5 landing buf
           pltpu.SemaphoreType.DMA((2,))])

    # Rough advisory cost estimate so XLA schedules around the call.
    flops, rows = 0, n
    for li in range(5):
        m = ops[5 * li] if li < 4 else ops[20]
        s = ops[5 * li + 1] if li < 4 else ops[21]
        zc = z_shapes[li][1]
        flops += 2 * rows * m.shape[0] * m.shape[1]       # X @ M_cat
        flops += 2 * s.shape[0] * s.shape[1] * zc         # S_cat @ Zhat
        if li < 4:
            flops += 4 * zc * zc                          # BN stat matmuls
        rows = s.shape[0]
    bytes_accessed = 4 * (sum(math.prod(op.shape) for op in ops)
                          + math.prod(x2d.shape) + n * hw * out_cols)
    cost = pl.CostEstimate(flops=int(flops),
                           transcendentals=int(n * hw * out_cols + 8 * 128),
                           bytes_accessed=int(bytes_accessed))

    out2d = pl.pallas_call(
        _decoder_kernel,
        out_shape=jax.ShapeDtypeStruct((n * hw, out_cols), jnp.float32),
        in_specs=in_specs,
        out_specs=pl.BlockSpec(memory_space=pltpu.MemorySpace.VMEM),
        scratch_shapes=scratch_shapes,
        compiler_params=pltpu.CompilerParams(vmem_limit_bytes=32 * 1024 * 1024),
        cost_estimate=cost,
    )(x2d, *ops)

    # Lane-dense kernel output (N*Ho, 128): the real columns are jo in [0, hw).
    return out2d[:, :hw].reshape(n, 1, hw, hw)


decoder_forward = jax.jit(_decoder_forward, static_argnums=2)


# --------------------- one-time constant-operand packing -------------------- #

def _pack_deconv(w_t, h_in, n, in_cols):
    """Pack a ConvTranspose2d weight (Cin, Cout, K, K), stride=1, pad=0.

    Returns:
      m_cat  : (in_cols, K*wc_pad)   lane-concatenated band matrices (rows zero
               padded from W*Cin to in_cols; per-tap column blocks padded from
               Wo*Cout up to a multiple of 128 so in-kernel slices stay aligned)
      s_cat  : (N*Ho, K*N*H)         lane-concatenated 0/1 row-shift matrices
      wc_pad : per-tap (= layer output) column-block width
    """
    cin, cout, k, _ = w_t.shape
    w_in = h_in
    h_out = w_out = h_in + k - 1
    wc = w_out * cout
    wc_pad = ((wc + 127) // 128) * 128

    # M_p[(j,ci), (jo,co)] = W[ci, co, p, jo-j] if 0 <= jo-j < K else 0
    j = jnp.arange(w_in)
    jo = jnp.arange(w_out)
    q = jo[None, :] - j[:, None]                               # (W, Wo)
    valid = ((q >= 0) & (q < k)).astype(jnp.float32)
    qc = jnp.clip(q, 0, k - 1)
    wsel = w_t[:, :, :, qc] * valid[None, None, None, :, :]    # (Cin, Cout, K, W, Wo)
    m = jnp.transpose(wsel, (2, 3, 0, 4, 1)).reshape(k, w_in * cin, wc)
    m = jnp.pad(m, ((0, 0), (0, in_cols - w_in * cin), (0, wc_pad - wc)))
    m_cat = jnp.transpose(m, (1, 0, 2)).reshape(in_cols, k * wc_pad)

    # S_p[(n, i+p), (n, i)] = 1   (row-shift / placement)
    s = jnp.zeros((k, n * h_out, n * h_in), jnp.float32)
    col = (jnp.arange(n)[:, None] * h_in + jnp.arange(h_in)[None, :]).reshape(-1)
    row0 = (jnp.arange(n)[:, None] * h_out + jnp.arange(h_in)[None, :]).reshape(-1)
    for p in range(k):
        s = s.at[p, row0 + p, col].set(1.0)
    s_cat = jnp.transpose(s, (1, 0, 2)).reshape(n * h_out, k * n * h_in)
    return m_cat.astype(jnp.float32), s_cat.astype(jnp.float32), wc_pad


def prepare_decoder_inputs(params, batch):
    """One-time packing of all constant kernel operands.

    Returns (ops, meta):
      ops  : flat tuple of arrays in kernel-argument order
      meta : static (hw, out_cols, ((zhat_rows, zhat_cols) per layer, ...))
    """
    n = batch
    ops, z_shapes = [], []
    h = 1                                                  # latent spatial size
    in_cols = params["blocks"][0][0].shape[0]              # latent_dim (1*1*Cin)
    for (w, g, b) in params["blocks"]:
        cout, k = w.shape[1], w.shape[2]
        m_cat, s_cat, wc_pad = _pack_deconv(w, h, n, in_cols)
        h = h + k - 1
        wo = h
        count = n * h * wo                                 # N*Ho*Wo
        pad = wc_pad - wo * cout
        t = jnp.tile(jnp.eye(cout, dtype=jnp.float32), (wo, 1))      # (Wo*Cout, Cout)
        p_mat = jnp.pad(t @ t.T, ((0, pad), (0, pad))) / count
        g_c = jnp.pad(jnp.tile(g, wo), (0, pad)).reshape(1, wc_pad)
        b_c = jnp.pad(jnp.tile(b, wo), (0, pad)).reshape(1, wc_pad)
        ops += [m_cat, s_cat, p_mat, g_c, b_c]
        z_shapes.append((int(s_cat.shape[1]), int(wc_pad)))
        in_cols = wc_pad
    m5, s5, wc5 = _pack_deconv(params["w5"], h, n, in_cols)
    ops += [m5, s5]
    z_shapes.append((int(s5.shape[1]), int(wc5)))
    hw = h + params["w5"].shape[2] - 1
    meta = (int(hw), int(wc5), tuple(z_shapes))
    return tuple(ops), meta


# --------------------------- parameter construction ------------------------- #

def make_decoder_params(key, layer_multiplier=8, latent_dim=16):
    lm = layer_multiplier
    # (Cin, Cout, K) per ConvTranspose2d, exactly as in the PyTorch __init__
    conv_cfg = [
        (latent_dim, lm * 8, 2),
        (lm * 8,     lm * 4, 3),
        (lm * 4,     lm * 2, 5),
        (lm * 2,     lm,     9),
        (lm,         1,      13),
    ]
    keys = jax.random.split(key, 3 * len(conv_cfg))
    blocks = []
    for i, (cin, cout, k) in enumerate(conv_cfg[:-1]):
        kw, kg, kb = keys[3 * i], keys[3 * i + 1], keys[3 * i + 2]
        w = 0.1 * jax.random.normal(kw, (cin, cout, k, k), jnp.float32)
        g = 1.0 + 0.1 * jax.random.normal(kg, (cout,), jnp.float32)
        b = 0.1 * jax.random.normal(kb, (cout,), jnp.float32)
        blocks.append((w, g, b))
    cin, cout, k = conv_cfg[-1]
    w5 = 0.1 * jax.random.normal(keys[-1], (cin, cout, k, k), jnp.float32)
    # TODO(synk): BN running_mean/running_var updates (momentum=0.8) are a
    # training-time side effect, not part of the forward output; training-mode
    # forward (batch statistics) is reproduced here.
    return {"blocks": blocks, "w5": w5}


# -------------------- pure-JAX definition-level reference ------------------- #

def _reference_decoder(x_nchw, params):
    def deconv(x, w):                                      # w: (Cin, Cout, K, K)
        n_, cin, hh, ww = x.shape
        cout, k = w.shape[1], w.shape[2]
        out = jnp.zeros((n_, cout, hh + k - 1, ww + k - 1), jnp.float32)
        for p in range(k):
            for q in range(k):
                upd = jnp.einsum("nchw,cd->ndhw", x, w[:, :, p, q])
                out = out.at[:, :, p:p + hh, q:q + ww].add(upd)
        return out

    def bn(y, g, b):                                       # training-mode batch stats
        mu = jnp.mean(y, axis=(0, 2, 3), keepdims=True)
        var = jnp.mean((y - mu) ** 2, axis=(0, 2, 3), keepdims=True)
        return ((y - mu) * jax.lax.rsqrt(var + _BN_EPS)
                * g.reshape(1, -1, 1, 1) + b.reshape(1, -1, 1, 1))

    x = x_nchw
    for (w, g, b) in params["blocks"]:
        x = bn(jnp.maximum(deconv(x, w), 0.0), g, b)
    return jax.nn.sigmoid(deconv(x, params["w5"]))


# ----------------------------------- main ----------------------------------- #

if __name__ == "__main__":
    layer_multiplier, latent_dim, batch = 8, 16, 2

    key = jax.random.PRNGKey(0)
    kx, kp = jax.random.split(key)
    params = make_decoder_params(kp, layer_multiplier, latent_dim)
    ops, meta = prepare_decoder_inputs(params, batch)      # constants, built once

    # Latent input, same convention the PyTorch decoder expects: (N, latent, 1, 1)
    x = jax.random.normal(kx, (batch, latent_dim, 1, 1), jnp.float32)

    out = decoder_forward(x, ops, meta)
    out = jax.block_until_ready(out)

    assert out.shape == (batch, 1, 28, 28), out.shape
    assert bool(jnp.all(jnp.isfinite(out)))
    assert bool(jnp.all((out >= 0.0) & (out <= 1.0)))      # sigmoid range

    # Loose-tolerance check against the definition-level pure-JAX reference
    # (loose because the kernel uses default MXU matmul precision).
    ref = jax.jit(_reference_decoder)(x, params)
    err = float(jnp.max(jnp.abs(out - ref)))
    assert err < 0.15, f"max abs err vs reference = {err}"

    print("KERNEL_OK")
</pallas_src>

<mosaic_0001>
module attributes {stable_mosaic.version = 11 : i64} {
  func.func @_decoder_kernel(%arg0: memref<2x16xf32, #tpu.memory_space<vmem>>, %arg1: memref<16x256xf32, #tpu.memory_space<vmem>>, %arg2: memref<4x4xf32, #tpu.memory_space<vmem>>, %arg3: memref<128x128xf32, #tpu.memory_space<vmem>>, %arg4: memref<1x128xf32, #tpu.memory_space<vmem>>, %arg5: memref<1x128xf32, #tpu.memory_space<vmem>>, %arg6: memref<128x384xf32, #tpu.memory_space<vmem>>, %arg7: memref<8x12xf32, #tpu.memory_space<vmem>>, %arg8: memref<128x128xf32, #tpu.memory_space<vmem>>, %arg9: memref<1x128xf32, #tpu.memory_space<vmem>>, %arg10: memref<1x128xf32, #tpu.memory_space<vmem>>, %arg11: memref<128x640xf32, #tpu.memory_space<vmem>>, %arg12: memref<16x40xf32, #tpu.memory_space<vmem>>, %arg13: memref<128x128xf32, #tpu.memory_space<vmem>>, %arg14: memref<1x128xf32, #tpu.memory_space<vmem>>, %arg15: memref<1x128xf32, #tpu.memory_space<vmem>>, %arg16: memref<128x1152xf32, #tpu.memory_space<any>>, %arg17: memref<32x144xf32, #tpu.memory_space<vmem>>, %arg18: memref<128x128xf32, #tpu.memory_space<vmem>>, %arg19: memref<1x128xf32, #tpu.memory_space<vmem>>, %arg20: memref<1x128xf32, #tpu.memory_space<vmem>>, %arg21: memref<128x1664xf32, #tpu.memory_space<any>>, %arg22: memref<56x416xf32, #tpu.memory_space<vmem>>, %arg23: memref<56x128xf32, #tpu.memory_space<vmem>>, %arg24: memref<4x128xf32, #tpu.memory_space<vmem>>, %arg25: memref<12x128xf32, #tpu.memory_space<vmem>>, %arg26: memref<40x128xf32, #tpu.memory_space<vmem>>, %arg27: memref<144x128xf32, #tpu.memory_space<vmem>>, %arg28: memref<416x128xf32, #tpu.memory_space<vmem>>, %arg29: memref<128x1152xf32, #tpu.memory_space<vmem>>, %arg30: memref<128x1664xf32, #tpu.memory_space<vmem>>, %arg31: memref<2x!tpu.dma_semaphore, #tpu.memory_space<semaphore_mem>>) attributes {dimension_semantics = [], scalar_prefetch = 0 : i64, scratch_operands = 8 : i64, tpu.core_type = #tpu.core_type<tc>} {
    %c0_i32 = arith.constant 0 : i32
    %0 = tpu.memref_slice %arg31[%c0_i32] : memref<2x!tpu.dma_semaphore, #tpu.memory_space<semaphore_mem>> -> memref<1x!tpu.dma_semaphore, #tpu.memory_space<semaphore_mem>>
    %1 = tpu.memref_squeeze %0 : memref<1x!tpu.dma_semaphore, #tpu.memory_space<semaphore_mem>> -> memref<!tpu.dma_semaphore, #tpu.memory_space<semaphore_mem>>
    tpu.enqueue_dma source(%arg16 : memref<128x1152xf32, #tpu.memory_space<any>>) target(%arg29 : memref<128x1152xf32, #tpu.memory_space<vmem>>) target_semaphore(%1 : memref<!tpu.dma_semaphore, #tpu.memory_space<semaphore_mem>>)
    %c1_i32 = arith.constant 1 : i32
    %2 = tpu.memref_slice %arg31[%c1_i32] : memref<2x!tpu.dma_semaphore, #tpu.memory_space<semaphore_mem>> -> memref<1x!tpu.dma_semaphore, #tpu.memory_space<semaphore_mem>>
    %3 = tpu.memref_squeeze %2 : memref<1x!tpu.dma_semaphore, #tpu.memory_space<semaphore_mem>> -> memref<!tpu.dma_semaphore, #tpu.memory_space<semaphore_mem>>
    tpu.enqueue_dma source(%arg21 : memref<128x1664xf32, #tpu.memory_space<any>>) target(%arg30 : memref<128x1664xf32, #tpu.memory_space<vmem>>) target_semaphore(%3 : memref<!tpu.dma_semaphore, #tpu.memory_space<semaphore_mem>>)
    %c0 = arith.constant 0 : index
    %c0_0 = arith.constant 0 : index
    %4 = vector.load %arg0[%c0, %c0_0] : memref<2x16xf32, #tpu.memory_space<vmem>>, vector<2x16xf32>
    %c0_1 = arith.constant 0 : index
    %c0_2 = arith.constant 0 : index
    %5 = vector.load %arg1[%c0_1, %c0_2] : memref<16x256xf32, #tpu.memory_space<vmem>>, vector<16x256xf32>
    %cst = arith.constant dense<0.000000e+00> : vector<2x256xf32>
    %6 = tpu.matmul %4, %5, %cst {dimension_numbers = #tpu.dot_dimension_numbers<[1], [0], [0], [1], [0, 0, 1, 1], [], []>} : vector<2x16xf32>, vector<16x256xf32>, vector<2x256xf32> -> vector<2x256xf32>
    %7 = vector.extract_strided_slice %6 {offsets = [0, 0], sizes = [2, 128], strides = [1, 1]} : vector<2x256xf32> to vector<2x128xf32>
    %c0_3 = arith.constant 0 : index
    %c0_4 = arith.constant 0 : index
    %8 = vector.load %arg24[%c0_3, %c0_4] : memref<4x128xf32, #tpu.memory_space<vmem>>, vector<2x128xf32>
    tpu.vector_store %arg24[%c0_3, %c0_4], %7 {strides = array<i32>} : memref<4x128xf32, #tpu.memory_space<vmem>>, vector<2x128xf32>,
    %9 = vector.extract_strided_slice %6 {offsets = [0, 128], sizes = [2, 128], strides = [1, 1]} : vector<2x256xf32> to vector<2x128xf32>
    %c2 = arith.constant 2 : index
    %c0_5 = arith.constant 0 : index
    %10 = vector.load %arg24[%c2, %c0_5] : memref<4x128xf32, #tpu.memory_space<vmem>>, vector<2x128xf32>
    tpu.vector_store %arg24[%c2, %c0_5], %9 {strides = array<i32>} : memref<4x128xf32, #tpu.memory_space<vmem>>, vector<2x128xf32>,
    %c0_6 = arith.constant 0 : index
    %c0_7 = arith.constant 0 : index
    %11 = vector.load %arg2[%c0_6, %c0_7] : memref<4x4xf32, #tpu.memory_space<vmem>>, vector<4x4xf32>
    %c0_8 = arith.constant 0 : index
    %c0_9 = arith.constant 0 : index
    %12 = vector.load %arg24[%c0_8, %c0_9] : memref<4x128xf32, #tpu.memory_space<vmem>>, vector<4x128xf32>
    %cst_10 = arith.constant dense<0.000000e+00> : vector<4x128xf32>
    %13 = tpu.matmul %11, %12, %cst_10 {dimension_numbers = #tpu.dot_dimension_numbers<[1], [0], [0], [1], [0, 0, 1, 1], [], []>} : vector<4x4xf32>, vector<4x128xf32>, vector<4x128xf32> -> vector<4x128xf32>
    %cst_11 = arith.constant 0.000000e+00 : f32
    %14 = vector.broadcast %cst_11 : f32 to vector<4x128xf32>
    %15 = arith.maximumf %13, %14 : vector<4x128xf32>
    %cst_12 = arith.constant dense<0.000000e+00> : vector<128xf32>
    %16 = vector.multi_reduction <add>, %15, %cst_12 [0] : vector<4x128xf32> to vector<128xf32>
    %17 = vector.shape_cast %16 : vector<128xf32> to vector<1x128xf32>
    %18 = arith.mulf %15, %15 : vector<4x128xf32>
    %cst_13 = arith.constant dense<0.000000e+00> : vector<128xf32>
    %19 = vector.multi_reduction <add>, %18, %cst_13 [0] : vector<4x128xf32> to vector<128xf32>
    %20 = vector.shape_cast %19 : vector<128xf32> to vector<1x128xf32>
    %c0_14 = arith.constant 0 : index
    %c0_15 = arith.constant 0 : index
    %21 = vector.load %arg3[%c0_14, %c0_15] : memref<128x128xf32, #tpu.memory_space<vmem>>, vector<128x128xf32>
    %cst_16 = arith.constant dense<0.000000e+00> : vector<1x128xf32>
    %22 = tpu.matmul %17, %21, %cst_16 {dimension_numbers = #tpu.dot_dimension_numbers<[1], [0], [0], [1], [0, 0, 1, 1], [], []>} : vector<1x128xf32>, vector<128x128xf32>, vector<1x128xf32> -> vector<1x128xf32>
    %c0_17 = arith.constant 0 : index
    %c0_18 = arith.constant 0 : index
    %23 = vector.load %arg3[%c0_17, %c0_18] : memref<128x128xf32, #tpu.memory_space<vmem>>, vector<128x128xf32>
    %cst_19 = arith.constant dense<0.000000e+00> : vector<1x128xf32>
    %24 = tpu.matmul %20, %23, %cst_19 {dimension_numbers = #tpu.dot_dimension_numbers<[1], [0], [0], [1], [0, 0, 1, 1], [], []>} : vector<1x128xf32>, vector<128x128xf32>, vector<1x128xf32> -> vector<1x128xf32>
    %25 = arith.mulf %22, %22 : vector<1x128xf32>
    %26 = arith.subf %24, %25 : vector<1x128xf32>
    %cst_20 = arith.constant 9.99999974E-6 : f32
    %27 = vector.broadcast %cst_20 : f32 to vector<1x128xf32>
    %28 = arith.addf %26, %27 : vector<1x128xf32>
    %29 = math.rsqrt %28 : vector<1x128xf32>
    %c0_21 = arith.constant 0 : index
    %c0_22 = arith.constant 0 : index
    %30 = vector.load %arg4[%c0_21, %c0_22] : memref<1x128xf32, #tpu.memory_space<vmem>>, vector<1x128xf32>
    %31 = arith.mulf %30, %29 : vector<1x128xf32>
    %c0_23 = arith.constant 0 : index
    %c0_24 = arith.constant 0 : index
    %32 = vector.load %arg5[%c0_23, %c0_24] : memref<1x128xf32, #tpu.memory_space<vmem>>, vector<1x128xf32>
    %33 = arith.mulf %22, %31 : vector<1x128xf32>
    %34 = arith.subf %32, %33 : vector<1x128xf32>
    %35 = vector.broadcast %31 : vector<1x128xf32> to vector<4x128xf32>
    %36 = arith.mulf %15, %35 : vector<4x128xf32>
    %37 = vector.broadcast %34 : vector<1x128xf32> to vector<4x128xf32>
    %38 = arith.addf %36, %37 : vector<4x128xf32>
    %c0_25 = arith.constant 0 : index
    %c0_26 = arith.constant 0 : index
    %39 = vector.load %arg6[%c0_25, %c0_26] : memref<128x384xf32, #tpu.memory_space<vmem>>, vector<128x384xf32>
    %cst_27 = arith.constant dense<0.000000e+00> : vector<4x384xf32>
    %40 = tpu.matmul %38, %39, %cst_27 {dimension_numbers = #tpu.dot_dimension_numbers<[1], [0], [0], [1], [0, 0, 1, 1], [], []>} : vector<4x128xf32>, vector<128x384xf32>, vector<4x384xf32> -> vector<4x384xf32>
    %41 = vector.extract_strided_slice %40 {offsets = [0, 0], sizes = [4, 128], strides = [1, 1]} : vector<4x384xf32> to vector<4x128xf32>
    %c0_28 = arith.constant 0 : index
    %c0_29 = arith.constant 0 : index
    %42 = vector.load %arg25[%c0_28, %c0_29] : memref<12x128xf32, #tpu.memory_space<vmem>>, vector<4x128xf32>
    tpu.vector_store %arg25[%c0_28, %c0_29], %41 {strides = array<i32>} : memref<12x128xf32, #tpu.memory_space<vmem>>, vector<4x128xf32>,
    %43 = vector.extract_strided_slice %40 {offsets = [0, 128], sizes = [4, 128], strides = [1, 1]} : vector<4x384xf32> to vector<4x128xf32>
    %c4 = arith.constant 4 : index
    %c0_30 = arith.constant 0 : index
    %44 = vector.load %arg25[%c4, %c0_30] : memref<12x128xf32, #tpu.memory_space<vmem>>, vector<4x128xf32>
    tpu.vector_store %arg25[%c4, %c0_30], %43 {strides = array<i32>} : memref<12x128xf32, #tpu.memory_space<vmem>>, vector<4x128xf32>,
    %45 = vector.extract_strided_slice %40 {offsets = [0, 256], sizes = [4, 128], strides = [1, 1]} : vector<4x384xf32> to vector<4x128xf32>
    %c8 = arith.constant 8 : index
    %c0_31 = arith.constant 0 : index
    %46 = vector.load %arg25[%c8, %c0_31] : memref<12x128xf32, #tpu.memory_space<vmem>>, vector<4x128xf32>
    tpu.vector_store %arg25[%c8, %c0_31], %45 {strides = array<i32>} : memref<12x128xf32, #tpu.memory_space<vmem>>, vector<4x128xf32>,
    %c0_32 = arith.constant 0 : index
    %c0_33 = arith.constant 0 : index
    %47 = vector.load %arg7[%c0_32, %c0_33] : memref<8x12xf32, #tpu.memory_space<vmem>>, vector<8x12xf32>
    %c0_34 = arith.constant 0 : index
    %c0_35 = arith.constant 0 : index
    %48 = vector.load %arg25[%c0_34, %c0_35] : memref<12x128xf32, #tpu.memory_space<vmem>>, vector<12x128xf32>
    %cst_36 = arith.constant dense<0.000000e+00> : vector<8x128xf32>
    %49 = tpu.matmul %47, %48, %cst_36 {dimension_numbers = #tpu.dot_dimension_numbers<[1], [0], [0], [1], [0, 0, 1, 1], [], []>} : vector<8x12xf32>, vector<12x128xf32>, vector<8x128xf32> -> vector<8x128xf32>
    %cst_37 = arith.constant 0.000000e+00 : f32
    %50 = vector.broadcast %cst_37 : f32 to vector<8x128xf32>
    %51 = arith.maximumf %49, %50 : vector<8x128xf32>
    %cst_38 = arith.constant dense<0.000000e+00> : vector<128xf32>
    %52 = vector.multi_reduction <add>, %51, %cst_38 [0] : vector<8x128xf32> to vector<128xf32>
    %53 = vector.shape_cast %52 : vector<128xf32> to vector<1x128xf32>
    %54 = arith.mulf %51, %51 : vector<8x128xf32>
    %cst_39 = arith.constant dense<0.000000e+00> : vector<128xf32>
    %55 = vector.multi_reduction <add>, %54, %cst_39 [0] : vector<8x128xf32> to vector<128xf32>
    %56 = vector.shape_cast %55 : vector<128xf32> to vector<1x128xf32>
    %c0_40 = arith.constant 0 : index
    %c0_41 = arith.constant 0 : index
    %57 = vector.load %arg8[%c0_40, %c0_41] : memref<128x128xf32, #tpu.memory_space<vmem>>, vector<128x128xf32>
    %cst_42 = arith.constant dense<0.000000e+00> : vector<1x128xf32>
    %58 = tpu.matmul %53, %57, %cst_42 {dimension_numbers = #tpu.dot_dimension_numbers<[1], [0], [0], [1], [0, 0, 1, 1], [], []>} : vector<1x128xf32>, vector<128x128xf32>, vector<1x128xf32> -> vector<1x128xf32>
    %c0_43 = arith.constant 0 : index
    %c0_44 = arith.constant 0 : index
    %59 = vector.load %arg8[%c0_43, %c0_44] : memref<128x128xf32, #tpu.memory_space<vmem>>, vector<128x128xf32>
    %cst_45 = arith.constant dense<0.000000e+00> : vector<1x128xf32>
    %60 = tpu.matmul %56, %59, %cst_45 {dimension_numbers = #tpu.dot_dimension_numbers<[1], [0], [0], [1], [0, 0, 1, 1], [], []>} : vector<1x128xf32>, vector<128x128xf32>, vector<1x128xf32> -> vector<1x128xf32>
    %61 = arith.mulf %58, %58 : vector<1x128xf32>
    %62 = arith.subf %60, %61 : vector<1x128xf32>
    %cst_46 = arith.constant 9.99999974E-6 : f32
    %63 = vector.broadcast %cst_46 : f32 to vector<1x128xf32>
    %64 = arith.addf %62, %63 : vector<1x128xf32>
    %65 = math.rsqrt %64 : vector<1x128xf32>
    %c0_47 = arith.constant 0 : index
    %c0_48 = arith.constant 0 : index
    %66 = vector.load %arg9[%c0_47, %c0_48] : memref<1x128xf32, #tpu.memory_space<vmem>>, vector<1x128xf32>
    %67 = arith.mulf %66, %65 : vector<1x128xf32>
    %c0_49 = arith.constant 0 : index
    %c0_50 = arith.constant 0 : index
    %68 = vector.load %arg10[%c0_49, %c0_50] : memref<1x128xf32, #tpu.memory_space<vmem>>, vector<1x128xf32>
    %69 = arith.mulf %58, %67 : vector<1x128xf32>
    %70 = arith.subf %68, %69 : vector<1x128xf32>
    %71 = vector.broadcast %67 : vector<1x128xf32> to vector<8x128xf32>
    %72 = arith.mulf %51, %71 : vector<8x128xf32>
    %73 = vector.broadcast %70 : vector<1x128xf32> to vector<8x128xf32>
    %74 = arith.addf %72, %73 : vector<8x128xf32>
    %c0_51 = arith.constant 0 : index
    %c0_52 = arith.constant 0 : index
    %75 = vector.load %arg11[%c0_51, %c0_52] : memref<128x640xf32, #tpu.memory_space<vmem>>, vector<128x640xf32>
    %cst_53 = arith.constant dense<0.000000e+00> : vector<8x640xf32>
    %76 = tpu.matmul %74, %75, %cst_53 {dimension_numbers = #tpu.dot_dimension_numbers<[1], [0], [0], [1], [0, 0, 1, 1], [], []>} : vector<8x128xf32>, vector<128x640xf32>, vector<8x640xf32> -> vector<8x640xf32>
    %77 = vector.extract_strided_slice %76 {offsets = [0, 0], sizes = [8, 128], strides = [1, 1]} : vector<8x640xf32> to vector<8x128xf32>
    %c0_54 = arith.constant 0 : index
    %c0_55 = arith.constant 0 : index
    %78 = vector.load %arg26[%c0_54, %c0_55] : memref<40x128xf32, #tpu.memory_space<vmem>>, vector<8x128xf32>
    tpu.vector_store %arg26[%c0_54, %c0_55], %77 {strides = array<i32>} : memref<40x128xf32, #tpu.memory_space<vmem>>, vector<8x128xf32>,
    %79 = vector.extract_strided_slice %76 {offsets = [0, 128], sizes = [8, 128], strides = [1, 1]} : vector<8x640xf32> to vector<8x128xf32>
    %c8_56 = arith.constant 8 : index
    %c0_57 = arith.constant 0 : index
    %80 = vector.load %arg26[%c8_56, %c0_57] : memref<40x128xf32, #tpu.memory_space<vmem>>, vector<8x128xf32>
    tpu.vector_store %arg26[%c8_56, %c0_57], %79 {strides = array<i32>} : memref<40x128xf32, #tpu.memory_space<vmem>>, vector<8x128xf32>,
    %81 = vector.extract_strided_slice %76 {offsets = [0, 256], sizes = [8, 128], strides = [1, 1]} : vector<8x640xf32> to vector<8x128xf32>
    %c16 = arith.constant 16 : index
    %c0_58 = arith.constant 0 : index
    %82 = vector.load %arg26[%c16, %c0_58] : memref<40x128xf32, #tpu.memory_space<vmem>>, vector<8x128xf32>
    tpu.vector_store %arg26[%c16, %c0_58], %81 {strides = array<i32>} : memref<40x128xf32, #tpu.memory_space<vmem>>, vector<8x128xf32>,
    %83 = vector.extract_strided_slice %76 {offsets = [0, 384], sizes = [8, 128], strides = [1, 1]} : vector<8x640xf32> to vector<8x128xf32>
    %c24 = arith.constant 24 : index
    %c0_59 = arith.constant 0 : index
    %84 = vector.load %arg26[%c24, %c0_59] : memref<40x128xf32, #tpu.memory_space<vmem>>, vector<8x128xf32>
    tpu.vector_store %arg26[%c24, %c0_59], %83 {strides = array<i32>} : memref<40x128xf32, #tpu.memory_space<vmem>>, vector<8x128xf32>,
    %85 = vector.extract_strided_slice %76 {offsets = [0, 512], sizes = [8, 128], strides = [1, 1]} : vector<8x640xf32> to vector<8x128xf32>
    %c32 = arith.constant 32 : index
    %c0_60 = arith.constant 0 : index
    %86 = vector.load %arg26[%c32, %c0_60] : memref<40x128xf32, #tpu.memory_space<vmem>>, vector<8x128xf32>
    tpu.vector_store %arg26[%c32, %c0_60], %85 {strides = array<i32>} : memref<40x128xf32, #tpu.memory_space<vmem>>, vector<8x128xf32>,
    %c0_61 = arith.constant 0 : index
    %c0_62 = arith.constant 0 : index
    %87 = vector.load %arg12[%c0_61, %c0_62] : memref<16x40xf32, #tpu.memory_space<vmem>>, vector<16x40xf32>
    %c0_63 = arith.constant 0 : index
    %c0_64 = arith.constant 0 : index
    %88 = vector.load %arg26[%c0_63, %c0_64] : memref<40x128xf32, #tpu.memory_space<vmem>>, vector<40x128xf32>
    %cst_65 = arith.constant dense<0.000000e+00> : vector<16x128xf32>
    %89 = tpu.matmul %87, %88, %cst_65 {dimension_numbers = #tpu.dot_dimension_numbers<[1], [0], [0], [1], [0, 0, 1, 1], [], []>} : vector<16x40xf32>, vector<40x128xf32>, vector<16x128xf32> -> vector<16x128xf32>
    %cst_66 = arith.constant 0.000000e+00 : f32
    %90 = vector.broadcast %cst_66 : f32 to vector<16x128xf32>
    %91 = arith.maximumf %89, %90 : vector<16x128xf32>
    %cst_67 = arith.constant dense<0.000000e+00> : vector<128xf32>
    %92 = vector.multi_reduction <add>, %91, %cst_67 [0] : vector<16x128xf32> to vector<128xf32>
    %93 = vector.shape_cast %92 : vector<128xf32> to vector<1x128xf32>
    %94 = arith.mulf %91, %91 : vector<16x128xf32>
    %cst_68 = arith.constant dense<0.000000e+00> : vector<128xf32>
    %95 = vector.multi_reduction <add>, %94, %cst_68 [0] : vector<16x128xf32> to vector<128xf32>
    %96 = vector.shape_cast %95 : vector<128xf32> to vector<1x128xf32>
    %c0_69 = arith.constant 0 : index
    %c0_70 = arith.constant 0 : index
    %97 = vector.load %arg13[%c0_69, %c0_70] : memref<128x128xf32, #tpu.memory_space<vmem>>, vector<128x128xf32>
    %cst_71 = arith.constant dense<0.000000e+00> : vector<1x128xf32>
    %98 = tpu.matmul %93, %97, %cst_71 {dimension_numbers = #tpu.dot_dimension_numbers<[1], [0], [0], [1], [0, 0, 1, 1], [], []>} : vector<1x128xf32>, vector<128x128xf32>, vector<1x128xf32> -> vector<1x128xf32>
    %c0_72 = arith.constant 0 : index
    %c0_73 = arith.constant 0 : index
    %99 = vector.load %arg13[%c0_72, %c0_73] : memref<128x128xf32, #tpu.memory_space<vmem>>, vector<128x128xf32>
    %cst_74 = arith.constant dense<0.000000e+00> : vector<1x128xf32>
    %100 = tpu.matmul %96, %99, %cst_74 {dimension_numbers = #tpu.dot_dimension_numbers<[1], [0], [0], [1], [0, 0, 1, 1], [], []>} : vector<1x128xf32>, vector<128x128xf32>, vector<1x128xf32> -> vector<1x128xf32>
    %101 = arith.mulf %98, %98 : vector<1x128xf32>
    %102 = arith.subf %100, %101 : vector<1x128xf32>
    %cst_75 = arith.constant 9.99999974E-6 : f32
    %103 = vector.broadcast %cst_75 : f32 to vector<1x128xf32>
    %104 = arith.addf %102, %103 : vector<1x128xf32>
    %105 = math.rsqrt %104 : vector<1x128xf32>
    %c0_76 = arith.constant 0 : index
    %c0_77 = arith.constant 0 : index
    %106 = vector.load %arg14[%c0_76, %c0_77] : memref<1x128xf32, #tpu.memory_space<vmem>>, vector<1x128xf32>
    %107 = arith.mulf %106, %105 : vector<1x128xf32>
    %c0_78 = arith.constant 0 : index
    %c0_79 = arith.constant 0 : index
    %108 = vector.load %arg15[%c0_78, %c0_79] : memref<1x128xf32, #tpu.memory_space<vmem>>, vector<1x128xf32>
    %109 = arith.mulf %98, %107 : vector<1x128xf32>
    %110 = arith.subf %108, %109 : vector<1x128xf32>
    %111 = vector.broadcast %107 : vector<1x128xf32> to vector<16x128xf32>
    %112 = arith.mulf %91, %111 : vector<16x128xf32>
    %113 = vector.broadcast %110 : vector<1x128xf32> to vector<16x128xf32>
    %114 = arith.addf %112, %113 : vector<16x128xf32>
    %c0_i32_80 = arith.constant 0 : i32
    %115 = tpu.memref_slice %arg31[%c0_i32_80] : memref<2x!tpu.dma_semaphore, #tpu.memory_space<semaphore_mem>> -> memref<1x!tpu.dma_semaphore, #tpu.memory_space<semaphore_mem>>
    %116 = tpu.memref_squeeze %115 : memref<1x!tpu.dma_semaphore, #tpu.memory_space<semaphore_mem>> -> memref<!tpu.dma_semaphore, #tpu.memory_space<semaphore_mem>>
    tpu.wait_dma2 semaphore(%116 : memref<!tpu.dma_semaphore, #tpu.memory_space<semaphore_mem>>) src(%arg16 : memref<128x1152xf32, #tpu.memory_space<any>>) dst(%arg29 : memref<128x1152xf32, #tpu.memory_space<vmem>>)
    %c0_81 = arith.constant 0 : index
    %c0_82 = arith.constant 0 : index
    %117 = vector.load %arg29[%c0_81, %c0_82] : memref<128x1152xf32, #tpu.memory_space<vmem>>, vector<128x1152xf32>
    %cst_83 = arith.constant dense<0.000000e+00> : vector<16x1152xf32>
    %118 = tpu.matmul %114, %117, %cst_83 {dimension_numbers = #tpu.dot_dimension_numbers<[1], [0], [0], [1], [0, 0, 1, 1], [], []>} : vector<16x128xf32>, vector<128x1152xf32>, vector<16x1152xf32> -> vector<16x1152xf32>
    %119 = vector.extract_strided_slice %118 {offsets = [0, 0], sizes = [16, 128], strides = [1, 1]} : vector<16x1152xf32> to vector<16x128xf32>
    %c0_84 = arith.constant 0 : index
    %c0_85 = arith.constant 0 : index
    %120 = vector.load %arg27[%c0_84, %c0_85] : memref<144x128xf32, #tpu.memory_space<vmem>>, vector<16x128xf32>
    tpu.vector_store %arg27[%c0_84, %c0_85], %119 {strides = array<i32>} : memref<144x128xf32, #tpu.memory_space<vmem>>, vector<16x128xf32>,
    %121 = vector.extract_strided_slice %118 {offsets = [0, 128], sizes = [16, 128], strides = [1, 1]} : vector<16x1152xf32> to vector<16x128xf32>
    %c16_86 = arith.constant 16 : index
    %c0_87 = arith.constant 0 : index
    %122 = vector.load %arg27[%c16_86, %c0_87] : memref<144x128xf32, #tpu.memory_space<vmem>>, vector<16x128xf32>
    tpu.vector_store %arg27[%c16_86, %c0_87], %121 {strides = array<i32>} : memref<144x128xf32, #tpu.memory_space<vmem>>, vector<16x128xf32>,
    %123 = vector.extract_strided_slice %118 {offsets = [0, 256], sizes = [16, 128], strides = [1, 1]} : vector<16x1152xf32> to vector<16x128xf32>
    %c32_88 = arith.constant 32 : index
    %c0_89 = arith.constant 0 : index
    %124 = vector.load %arg27[%c32_88, %c0_89] : memref<144x128xf32, #tpu.memory_space<vmem>>, vector<16x128xf32>
    tpu.vector_store %arg27[%c32_88, %c0_89], %123 {strides = array<i32>} : memref<144x128xf32, #tpu.memory_space<vmem>>, vector<16x128xf32>,
    %125 = vector.extract_strided_slice %118 {offsets = [0, 384], sizes = [16, 128], strides = [1, 1]} : vector<16x1152xf32> to vector<16x128xf32>
    %c48 = arith.constant 48 : index
    %c0_90 = arith.constant 0 : index
    %126 = vector.load %arg27[%c48, %c0_90] : memref<144x128xf32, #tpu.memory_space<vmem>>, vector<16x128xf32>
    tpu.vector_store %arg27[%c48, %c0_90], %125 {strides = array<i32>} : memref<144x128xf32, #tpu.memory_space<vmem>>, vector<16x128xf32>,
    %127 = vector.extract_strided_slice %118 {offsets = [0, 512], sizes = [16, 128], strides = [1, 1]} : vector<16x1152xf32> to vector<16x128xf32>
    %c64 = arith.constant 64 : index
    %c0_91 = arith.constant 0 : index
    %128 = vector.load %arg27[%c64, %c0_91] : memref<144x128xf32, #tpu.memory_space<vmem>>, vector<16x128xf32>
    tpu.vector_store %arg27[%c64, %c0_91], %127 {strides = array<i32>} : memref<144x128xf32, #tpu.memory_space<vmem>>, vector<16x128xf32>,
    %129 = vector.extract_strided_slice %118 {offsets = [0, 640], sizes = [16, 128], strides = [1, 1]} : vector<16x1152xf32> to vector<16x128xf32>
    %c80 = arith.constant 80 : index
    %c0_92 = arith.constant 0 : index
    %130 = vector.load %arg27[%c80, %c0_92] : memref<144x128xf32, #tpu.memory_space<vmem>>, vector<16x128xf32>
    tpu.vector_store %arg27[%c80, %c0_92], %129 {strides = array<i32>} : memref<144x128xf32, #tpu.memory_space<vmem>>, vector<16x128xf32>,
    %131 = vector.extract_strided_slice %118 {offsets = [0, 768], sizes = [16, 128], strides = [1, 1]} : vector<16x1152xf32> to vector<16x128xf32>
    %c96 = arith.constant 96 : index
    %c0_93 = arith.constant 0 : index
    %132 = vector.load %arg27[%c96, %c0_93] : memref<144x128xf32, #tpu.memory_space<vmem>>, vector<16x128xf32>
    tpu.vector_store %arg27[%c96, %c0_93], %131 {strides = array<i32>} : memref<144x128xf32, #tpu.memory_space<vmem>>, vector<16x128xf32>,
    %133 = vector.extract_strided_slice %118 {offsets = [0, 896], sizes = [16, 128], strides = [1, 1]} : vector<16x1152xf32> to vector<16x128xf32>
    %c112 = arith.constant 112 : index
    %c0_94 = arith.constant 0 : index
    %134 = vector.load %arg27[%c112, %c0_94] : memref<144x128xf32, #tpu.memory_space<vmem>>, vector<16x128xf32>
    tpu.vector_store %arg27[%c112, %c0_94], %133 {strides = array<i32>} : memref<144x128xf32, #tpu.memory_space<vmem>>, vector<16x128xf32>,
    %135 = vector.extract_strided_slice %118 {offsets = [0, 1024], sizes = [16, 128], strides = [1, 1]} : vector<16x1152xf32> to vector<16x128xf32>
    %c128 = arith.constant 128 : index
    %c0_95 = arith.constant 0 : index
    %136 = vector.load %arg27[%c128, %c0_95] : memref<144x128xf32, #tpu.memory_space<vmem>>, vector<16x128xf32>
    tpu.vector_store %arg27[%c128, %c0_95], %135 {strides = array<i32>} : memref<144x128xf32, #tpu.memory_space<vmem>>, vector<16x128xf32>,
    %c0_96 = arith.constant 0 : index
    %c0_97 = arith.constant 0 : index
    %137 = vector.load %arg17[%c0_96, %c0_97] : memref<32x144xf32, #tpu.memory_space<vmem>>, vector<32x144xf32>
    %c0_98 = arith.constant 0 : index
    %c0_99 = arith.constant 0 : index
    %138 = vector.load %arg27[%c0_98, %c0_99] : memref<144x128xf32, #tpu.memory_space<vmem>>, vector<144x128xf32>
    %cst_100 = arith.constant dense<0.000000e+00> : vector<32x128xf32>
    %139 = tpu.matmul %137, %138, %cst_100 {dimension_numbers = #tpu.dot_dimension_numbers<[1], [0], [0], [1], [0, 0, 1, 1], [], []>} : vector<32x144xf32>, vector<144x128xf32>, vector<32x128xf32> -> vector<32x128xf32>
    %cst_101 = arith.constant 0.000000e+00 : f32
    %140 = vector.broadcast %cst_101 : f32 to vector<32x128xf32>
    %141 = arith.maximumf %139, %140 : vector<32x128xf32>
    %cst_102 = arith.constant dense<0.000000e+00> : vector<128xf32>
    %142 = vector.multi_reduction <add>, %141, %cst_102 [0] : vector<32x128xf32> to vector<128xf32>
    %143 = vector.shape_cast %142 : vector<128xf32> to vector<1x128xf32>
    %144 = arith.mulf %141, %141 : vector<32x128xf32>
    %cst_103 = arith.constant dense<0.000000e+00> : vector<128xf32>
    %145 = vector.multi_reduction <add>, %144, %cst_103 [0] : vector<32x128xf32> to vector<128xf32>
    %146 = vector.shape_cast %145 : vector<128xf32> to vector<1x128xf32>
    %c0_104 = arith.constant 0 : index
    %c0_105 = arith.constant 0 : index
    %147 = vector.load %arg18[%c0_104, %c0_105] : memref<128x128xf32, #tpu.memory_space<vmem>>, vector<128x128xf32>
    %cst_106 = arith.constant dense<0.000000e+00> : vector<1x128xf32>
    %148 = tpu.matmul %143, %147, %cst_106 {dimension_numbers = #tpu.dot_dimension_numbers<[1], [0], [0], [1], [0, 0, 1, 1], [], []>} : vector<1x128xf32>, vector<128x128xf32>, vector<1x128xf32> -> vector<1x128xf32>
    %c0_107 = arith.constant 0 : index
    %c0_108 = arith.constant 0 : index
    %149 = vector.load %arg18[%c0_107, %c0_108] : memref<128x128xf32, #tpu.memory_space<vmem>>, vector<128x128xf32>
    %cst_109 = arith.constant dense<0.000000e+00> : vector<1x128xf32>
    %150 = tpu.matmul %146, %149, %cst_109 {dimension_numbers = #tpu.dot_dimension_numbers<[1], [0], [0], [1], [0, 0, 1, 1], [], []>} : vector<1x128xf32>, vector<128x128xf32>, vector<1x128xf32> -> vector<1x128xf32>
    %151 = arith.mulf %148, %148 : vector<1x128xf32>
    %152 = arith.subf %150, %151 : vector<1x128xf32>
    %cst_110 = arith.constant 9.99999974E-6 : f32
    %153 = vector.broadcast %cst_110 : f32 to vector<1x128xf32>
    %154 = arith.addf %152, %153 : vector<1x128xf32>
    %155 = math.rsqrt %154 : vector<1x128xf32>
    %c0_111 = arith.constant 0 : index
    %c0_112 = arith.constant 0 : index
    %156 = vector.load %arg19[%c0_111, %c0_112] : memref<1x128xf32, #tpu.memory_space<vmem>>, vector<1x128xf32>
    %157 = arith.mulf %156, %155 : vector<1x128xf32>
    %c0_113 = arith.constant 0 : index
    %c0_114 = arith.constant 0 : index
    %158 = vector.load %arg20[%c0_113, %c0_114] : memref<1x128xf32, #tpu.memory_space<vmem>>, vector<1x128xf32>
    %159 = arith.mulf %148, %157 : vector<1x128xf32>
    %160 = arith.subf %158, %159 : vector<1x128xf32>
    %161 = vector.broadcast %157 : vector<1x128xf32> to vector<32x128xf32>
    %162 = arith.mulf %141, %161 : vector<32x128xf32>
    %163 = vector.broadcast %160 : vector<1x128xf32> to vector<32x128xf32>
    %164 = arith.addf %162, %163 : vector<32x128xf32>
    %c1_i32_115 = arith.constant 1 : i32
    %165 = tpu.memref_slice %arg31[%c1_i32_115] : memref<2x!tpu.dma_semaphore, #tpu.memory_space<semaphore_mem>> -> memref<1x!tpu.dma_semaphore, #tpu.memory_space<semaphore_mem>>
    %166 = tpu.memref_squeeze %165 : memref<1x!tpu.dma_semaphore, #tpu.memory_space<semaphore_mem>> -> memref<!tpu.dma_semaphore, #tpu.memory_space<semaphore_mem>>
    tpu.wait_dma2 semaphore(%166 : memref<!tpu.dma_semaphore, #tpu.memory_space<semaphore_mem>>) src(%arg21 : memref<128x1664xf32, #tpu.memory_space<any>>) dst(%arg30 : memref<128x1664xf32, #tpu.memory_space<vmem>>)
    %c0_116 = arith.constant 0 : index
    %c0_117 = arith.constant 0 : index
    %167 = vector.load %arg30[%c0_116, %c0_117] : memref<128x1664xf32, #tpu.memory_space<vmem>>, vector<128x1664xf32>
    %cst_118 = arith.constant dense<0.000000e+00> : vector<32x1664xf32>
    %168 = tpu.matmul %164, %167, %cst_118 {dimension_numbers = #tpu.dot_dimension_numbers<[1], [0], [0], [1], [0, 0, 1, 1], [], []>} : vector<32x128xf32>, vector<128x1664xf32>, vector<32x1664xf32> -> vector<32x1664xf32>
    %169 = vector.extract_strided_slice %168 {offsets = [0, 0], sizes = [32, 128], strides = [1, 1]} : vector<32x1664xf32> to vector<32x128xf32>
    %c0_119 = arith.constant 0 : index
    %c0_120 = arith.constant 0 : index
    %170 = vector.load %arg28[%c0_119, %c0_120] : memref<416x128xf32, #tpu.memory_space<vmem>>, vector<32x128xf32>
    tpu.vector_store %arg28[%c0_119, %c0_120], %169 {strides = array<i32>} : memref<416x128xf32, #tpu.memory_space<vmem>>, vector<32x128xf32>,
    %171 = vector.extract_strided_slice %168 {offsets = [0, 128], sizes = [32, 128], strides = [1, 1]} : vector<32x1664xf32> to vector<32x128xf32>
    %c32_121 = arith.constant 32 : index
    %c0_122 = arith.constant 0 : index
    %172 = vector.load %arg28[%c32_121, %c0_122] : memref<416x128xf32, #tpu.memory_space<vmem>>, vector<32x128xf32>
    tpu.vector_store %arg28[%c32_121, %c0_122], %171 {strides = array<i32>} : memref<416x128xf32, #tpu.memory_space<vmem>>, vector<32x128xf32>,
    %173 = vector.extract_strided_slice %168 {offsets = [0, 256], sizes = [32, 128], strides = [1, 1]} : vector<32x1664xf32> to vector<32x128xf32>
    %c64_123 = arith.constant 64 : index
    %c0_124 = arith.constant 0 : index
    %174 = vector.load %arg28[%c64_123, %c0_124] : memref<416x128xf32, #tpu.memory_space<vmem>>, vector<32x128xf32>
    tpu.vector_store %arg28[%c64_123, %c0_124], %173 {strides = array<i32>} : memref<416x128xf32, #tpu.memory_space<vmem>>, vector<32x128xf32>,
    %175 = vector.extract_strided_slice %168 {offsets = [0, 384], sizes = [32, 128], strides = [1, 1]} : vector<32x1664xf32> to vector<32x128xf32>
    %c96_125 = arith.constant 96 : index
    %c0_126 = arith.constant 0 : index
    %176 = vector.load %arg28[%c96_125, %c0_126] : memref<416x128xf32, #tpu.memory_space<vmem>>, vector<32x128xf32>
    tpu.vector_store %arg28[%c96_125, %c0_126], %175 {strides = array<i32>} : memref<416x128xf32, #tpu.memory_space<vmem>>, vector<32x128xf32>,
    %177 = vector.extract_strided_slice %168 {offsets = [0, 512], sizes = [32, 128], strides = [1, 1]} : vector<32x1664xf32> to vector<32x128xf32>
    %c128_127 = arith.constant 128 : index
    %c0_128 = arith.constant 0 : index
    %178 = vector.load %arg28[%c128_127, %c0_128] : memref<416x128xf32, #tpu.memory_space<vmem>>, vector<32x128xf32>
    tpu.vector_store %arg28[%c128_127, %c0_128], %177 {strides = array<i32>} : memref<416x128xf32, #tpu.memory_space<vmem>>, vector<32x128xf32>,
    %179 = vector.extract_strided_slice %168 {offsets = [0, 640], sizes = [32, 128], strides = [1, 1]} : vector<32x1664xf32> to vector<32x128xf32>
    %c160 = arith.constant 160 : index
    %c0_129 = arith.constant 0 : index
    %180 = vector.load %arg28[%c160, %c0_129] : memref<416x128xf32, #tpu.memory_space<vmem>>, vector<32x128xf32>
    tpu.vector_store %arg28[%c160, %c0_129], %179 {strides = array<i32>} : memref<416x128xf32, #tpu.memory_space<vmem>>, vector<32x128xf32>,
    %181 = vector.extract_strided_slice %168 {offsets = [0, 768], sizes = [32, 128], strides = [1, 1]} : vector<32x1664xf32> to vector<32x128xf32>
    %c192 = arith.constant 192 : index
    %c0_130 = arith.constant 0 : index
    %182 = vector.load %arg28[%c192, %c0_130] : memref<416x128xf32, #tpu.memory_space<vmem>>, vector<32x128xf32>
    tpu.vector_store %arg28[%c192, %c0_130], %181 {strides = array<i32>} : memref<416x128xf32, #tpu.memory_space<vmem>>, vector<32x128xf32>,
    %183 = vector.extract_strided_slice %168 {offsets = [0, 896], sizes = [32, 128], strides = [1, 1]} : vector<32x1664xf32> to vector<32x128xf32>
    %c224 = arith.constant 224 : index
    %c0_131 = arith.constant 0 : index
    %184 = vector.load %arg28[%c224, %c0_131] : memref<416x128xf32, #tpu.memory_space<vmem>>, vector<32x128xf32>
    tpu.vector_store %arg28[%c224, %c0_131], %183 {strides = array<i32>} : memref<416x128xf32, #tpu.memory_space<vmem>>, vector<32x128xf32>,
    %185 = vector.extract_strided_slice %168 {offsets = [0, 1024], sizes = [32, 128], strides = [1, 1]} : vector<32x1664xf32> to vector<32x128xf32>
    %c256 = arith.constant 256 : index
    %c0_132 = arith.constant 0 : index
    %186 = vector.load %arg28[%c256, %c0_132] : memref<416x128xf32, #tpu.memory_space<vmem>>, vector<32x128xf32>
    tpu.vector_store %arg28[%c256, %c0_132], %185 {strides = array<i32>} : memref<416x128xf32, #tpu.memory_space<vmem>>, vector<32x128xf32>,
    %187 = vector.extract_strided_slice %168 {offsets = [0, 1152], sizes = [32, 128], strides = [1, 1]} : vector<32x1664xf32> to vector<32x128xf32>
    %c288 = arith.constant 288 : index
    %c0_133 = arith.constant 0 : index
    %188 = vector.load %arg28[%c288, %c0_133] : memref<416x128xf32, #tpu.memory_space<vmem>>, vector<32x128xf32>
    tpu.vector_store %arg28[%c288, %c0_133], %187 {strides = array<i32>} : memref<416x128xf32, #tpu.memory_space<vmem>>, vector<32x128xf32>,
    %189 = vector.extract_strided_slice %168 {offsets = [0, 1280], sizes = [32, 128], strides = [1, 1]} : vector<32x1664xf32> to vector<32x128xf32>
    %c320 = arith.constant 320 : index
    %c0_134 = arith.constant 0 : index
    %190 = vector.load %arg28[%c320, %c0_134] : memref<416x128xf32, #tpu.memory_space<vmem>>, vector<32x128xf32>
    tpu.vector_store %arg28[%c320, %c0_134], %189 {strides = array<i32>} : memref<416x128xf32, #tpu.memory_space<vmem>>, vector<32x128xf32>,
    %191 = vector.extract_strided_slice %168 {offsets = [0, 1408], sizes = [32, 128], strides = [1, 1]} : vector<32x1664xf32> to vector<32x128xf32>
    %c352 = arith.constant 352 : index
    %c0_135 = arith.constant 0 : index
    %192 = vector.load %arg28[%c352, %c0_135] : memref<416x128xf32, #tpu.memory_space<vmem>>, vector<32x128xf32>
    tpu.vector_store %arg28[%c352, %c0_135], %191 {strides = array<i32>} : memref<416x128xf32, #tpu.memory_space<vmem>>, vector<32x128xf32>,
    %193 = vector.extract_strided_slice %168 {offsets = [0, 1536], sizes = [32, 128], strides = [1, 1]} : vector<32x1664xf32> to vector<32x128xf32>
    %c384 = arith.constant 384 : index
    %c0_136 = arith.constant 0 : index
    %194 = vector.load %arg28[%c384, %c0_136] : memref<416x128xf32, #tpu.memory_space<vmem>>, vector<32x128xf32>
    tpu.vector_store %arg28[%c384, %c0_136], %193 {strides = array<i32>} : memref<416x128xf32, #tpu.memory_space<vmem>>, vector<32x128xf32>,
    %c0_137 = arith.constant 0 : index
    %c0_138 = arith.constant 0 : index
    %195 = vector.load %arg22[%c0_137, %c0_138] : memref<56x416xf32, #tpu.memory_space<vmem>>, vector<56x416xf32>
    %c0_139 = arith.constant 0 : index
    %c0_140 = arith.constant 0 : index
    %196 = vector.load %arg28[%c0_139, %c0_140] : memref<416x128xf32, #tpu.memory_space<vmem>>, vector<416x128xf32>
    %cst_141 = arith.constant dense<0.000000e+00> : vector<56x128xf32>
    %197 = tpu.matmul %195, %196, %cst_141 {dimension_numbers = #tpu.dot_dimension_numbers<[1], [0], [0], [1], [0, 0, 1, 1], [], []>} : vector<56x416xf32>, vector<416x128xf32>, vector<56x128xf32> -> vector<56x128xf32>
    %198 = arith.negf %197 : vector<56x128xf32>
    %199 = math.exp %198 : vector<56x128xf32>
    %cst_142 = arith.constant 1.000000e+00 : f32
    %200 = vector.broadcast %cst_142 : f32 to vector<56x128xf32>
    %201 = arith.addf %200, %199 : vector<56x128xf32>
    %202 = arith.divf %200, %201 : vector<56x128xf32>
    %c0_143 = arith.constant 0 : index
    %c0_144 = arith.constant 0 : index
    %203 = vector.load %arg23[%c0_143, %c0_144] : memref<56x128xf32, #tpu.memory_space<vmem>>, vector<56x128xf32>
    tpu.vector_store %arg23[%c0_143, %c0_144], %202 {strides = array<i32>} : memref<56x128xf32, #tpu.memory_space<vmem>>, vector<56x128xf32>,
    return
  }
}

</mosaic_0001>

<bundles_post_ra>
// kernel: _decoder_forward.1
= control target key start
LH: loop header
LB: loop body
LE: loop exit
PB: predicated region body
PF: predicated region fallthrough
CT: control target
= control target key end

     0   :  { %s6685_s0 = inlined_call_operand.hbm [shape: f32[2,16], index: 0, kind: input, shape index: {}]   ;;  %s6686_s1 = inlined_call_operand.hbm [shape: f32[16,256], index: 1, kind: input, shape index: {}]   ;;  %s6687_s2 = inlined_call_operand.vmem [shape: f32[4,4], index: 2, kind: input, shape index: {}]   ;;  %s6688_s3 = inlined_call_operand.hbm [shape: f32[128,128], index: 3, kind: input, shape index: {}]   ;;  %s6689_s4 = inlined_call_operand.hbm [shape: f32[1,128], index: 4, kind: input, shape index: {}]   ;;  %s6690_s5 = inlined_call_operand.hbm [shape: f32[1,128], index: 5, kind: input, shape index: {}]   ;;  %s6691_s6 = inlined_call_operand.hbm [shape: f32[128,384], index: 6, kind: input, shape index: {}]   ;;  %s6692_s7 = inlined_call_operand.hbm [shape: f32[8,12], index: 7, kind: input, shape index: {}]   ;;  %s6693_s8 = inlined_call_operand.hbm [shape: f32[128,128], index: 8, kind: input, shape index: {}]   ;;  %s6694_s9 = inlined_call_operand.hbm [shape: f32[1,128], index: 9, kind: input, shape index: {}]   ;;  %s6695_s10 = inlined_call_operand.hbm [shape: f32[1,128], index: 10, kind: input, shape index: {}]   ;;  %s6696_s11 = inlined_call_operand.hbm [shape: f32[128,640], index: 11, kind: input, shape index: {}]   ;;  %s6697_s12 = inlined_call_operand.hbm [shape: f32[16,40], index: 12, kind: input, shape index: {}]   ;;  %s6698_s13 = inlined_call_operand.hbm [shape: f32[128,128], index: 13, kind: input, shape index: {}]   ;;  %s6699_s14 = inlined_call_operand.hbm [shape: f32[1,128], index: 14, kind: input, shape index: {}]   ;;  %s6700_s15 = inlined_call_operand.hbm [shape: f32[1,128], index: 15, kind: input, shape index: {}]   ;;  %s6701_s16 = inlined_call_operand.hbm [shape: f32[128,1152], index: 16, kind: input, shape index: {}]   ;;  %s6702_s17 = inlined_call_operand.vmem [shape: f32[32,144], index: 17, kind: input, shape index: {}]   ;;  %s6703_s18 = inlined_call_operand.hbm [shape: f32[128,128], index: 18, kind: input, shape index: {}]   ;;  %s6704_s19 = inlined_call_operand.vmem [shape: f32[1,128], index: 19, kind: input, shape index: {}]   ;;  %s6705_s20 = inlined_call_operand.vmem [shape: f32[1,128], index: 20, kind: input, shape index: {}]   ;;  %s6706_s21 = inlined_call_operand.hbm [shape: f32[128,1664], index: 21, kind: input, shape index: {}]   ;;  %s6707_s22 = inlined_call_operand.hbm [shape: f32[56,416], index: 22, kind: input, shape index: {}]   ;;  %s6708_s23 = inlined_call_operand.hbm [shape: f32[56,128], index: 23, kind: output, shape index: {}]  }
   0x1   :  { %6717 = sst [smem:[#allocation56_spill]] %s6685_s0 }
   0x2   :  { %6718 = sst [smem:[#allocation57_spill]] %s6686_s1 }
   0x3   :  { %6719 = sst [smem:[#allocation58_spill]] %s6687_s2 }
   0x4   :  { %6720 = sst [smem:[#allocation59_spill]] %s6688_s3 }
   0x5   :  { %6721 = sst [smem:[#allocation60_spill]] %s6689_s4 }
   0x6   :  { %6722 = sst [smem:[#allocation61_spill]] %s6690_s5 }
   0x7   :  { %6723 = sst [smem:[#allocation62_spill]] %s6691_s6 }
   0x8   :  { %6724 = sst [smem:[#allocation63_spill]] %s6692_s7 }
   0x9   :  { %6725 = sst [smem:[#allocation64_spill]] %s6704_s19 }
   0xa   :  { %6726 = sst [smem:[#allocation65_spill]] %s6705_s20 }
   0xb   :  { %6727 = sst [smem:[#allocation66_spill]] %s6708_s23 }
   0xc   :  { %28 = vsyncpa [#allocation11], 0 }
   0xd   :  { %29 = vsyncpa [#allocation14], 0 }
   0xe   :  { %30 = vsyncpa [#allocation17], 0 }
   0xf   :  { %31 = vsyncpa [#allocation20], 0 }
  0x10   :  { %32 = vsyncpa [#allocation23], 0 }
  0x11   :  { %33 = vsyncpa [#allocation26], 0 }
  0x12   :  { %34 = vsyncpa [#allocation29], 0 }
  0x13   :  { %35 = vsyncpa [#allocation32], 0 }
  0x14   :  { %36 = vsyncpa [#allocation35], 0 }
  0x15   :  { %37 = vsyncpa [#allocation12], 0  ;;  %s5976_s4 = smov [#allocation13]   ;;  %s6728_s5 = sld [smem:[#allocation57_spill]] }
  0x16   :  { %s53_s30 = sshll.u32 %s5976_s4, 4  ;;  %s54_s30 = int_to_ptr.vmem [resolvable:$true] %s53_s30 }
  0x1b   :  { %s5512_s1 = scalar_lea.hbm %s6728_s5, 512 }
  0x1c   :  { %p5513_p0 = scmp.ne.s32.totalorder %s6728_s5, %s5512_s1  ;;  %p5516_p1 = scmp.lt.u32.totalorder %s5512_s1, %s6728_s5 }
  0x1e   :  { %p5518_p2 = pnand %p5516_p1, %p5513_p0 }
  0x20   :  { %5521 = shalt.err (!%p5518_p2)
}
  0x21   :  { %s5522_s7 = scalar_lea.vmem %s54_s30, 512  ;;  %p5527_p4 = scmp.lt.s32.totalorder %s54_s30, %s54_s30 }
  0x22   :  { %p5523_p3 = scmp.ne.s32.totalorder %s54_s30, %s5522_s7  ;;  %p5528_p5 = scmp.lt.s32.totalorder %s5522_s7, %s5522_s7 }
  0x24   :  { %p5529_p6 = por %p5528_p5, %p5527_p4 }
  0x26   :  { %p5530_p7 = pnand %p5529_p6, %p5523_p3 }
  0x28   :  { %5533 = shalt.err (!%p5530_p7)
}
  0x29   :  { %s5977_s28 = smov 256   ;;  %s5978_s29 = smov 16  }
  0x2a   :  { %59 = dma.hbm_to_vmem [thread:$0]  %s6728_s5, 512, %s54_s30, [#allocation14], %s5977_s28, %s5977_s28, %s5978_s29  }
  0x2b   :  { %s5979_s4 = smov [#allocation16]   ;;  %s5980_s25 = smov [#allocation19]  }
  0x2c   :  { %s80_s24 = sshll.u32 %s5979_s4, 4  ;;  %s99_s1 = sshll.u32 %s5980_s25, 4  ;;  %s81_s24 = int_to_ptr.vmem [resolvable:$true] %s80_s24  ;;  %s100_s1 = int_to_ptr.vmem [resolvable:$true] %s99_s1 }
  0x2d   :  { %s6729_s6 = sld [smem:[#allocation60_spill]] }
  0x33   :  { %s5534_s27 = scalar_lea.hbm %s6729_s6, 16 }
  0x34   :  { %p5535_p8 = scmp.ne.s32.totalorder %s6729_s6, %s5534_s27  ;;  %p5538_p9 = scmp.lt.u32.totalorder %s5534_s27, %s6729_s6 }
  0x36   :  { %p5540_p10 = pnand %p5538_p9, %p5535_p8 }
  0x38   :  { %5543 = shalt.err (!%p5540_p10)
}
  0x39   :  { %s5544_s30 = scalar_lea.vmem %s81_s24, 16  ;;  %s5548_s5 = scalar_lea.vmem %s81_s24, 32 }
  0x3a   :  { %p5545_p11 = scmp.ne.s32.totalorder %s81_s24, %s5544_s30  ;;  %p5549_p12 = scmp.lt.s32.totalorder %s81_s24, %s81_s24 }
  0x3b   :  { %p5550_p13 = scmp.lt.s32.totalorder %s5548_s5, %s5544_s30 }
  0x3d   :  { %p5551_p0 = por %p5550_p13, %p5549_p12 }
  0x3f   :  { %p5552_p1 = pnand %p5551_p0, %p5545_p11 }
  0x41   :  { %5555 = shalt.err (!%p5552_p1)
}
  0x42   :  { %83 = dma.hbm_to_vmem [thread:$0]  %s6729_s6, 16, %s81_s24, [#allocation17]  }
  0x43   :  { %s6730_s0 = sld [smem:[#allocation62_spill]] }
  0x49   :  { %s5556_s19 = scalar_lea.hbm %s6730_s0, 6144 }
  0x4a   :  { %p5557_p2 = scmp.ne.s32.totalorder %s6730_s0, %s5556_s19  ;;  %p5560_p3 = scmp.lt.u32.totalorder %s5556_s19, %s6730_s0 }
  0x4c   :  { %p5562_p4 = pnand %p5560_p3, %p5557_p2 }
  0x4e   :  { %5565 = shalt.err (!%p5562_p4)
}
  0x4f   :  { %s5566_s2 = scalar_lea.vmem %s100_s1, 6144  ;;  %p5571_p6 = scmp.lt.s32.totalorder %s100_s1, %s100_s1 }
  0x50   :  { %p5567_p5 = scmp.ne.s32.totalorder %s100_s1, %s5566_s2  ;;  %p5572_p7 = scmp.lt.s32.totalorder %s5566_s2, %s5566_s2 }
  0x52   :  { %p5573_p8 = por %p5572_p7, %p5571_p6 }
  0x54   :  { %p5574_p9 = pnand %p5573_p8, %p5567_p5 }
  0x56   :  { %5577 = shalt.err (!%p5574_p9)
}
  0x57   :  { %s5981_s24 = smov 384   ;;  %s5982_s6 = smov 24  }
  0x58   :  { %105 = dma.hbm_to_vmem [thread:$0]  %s6730_s0, 6144, %s100_s1, [#allocation20], %s5981_s24, %s5981_s24, %s5982_s6  }
  0x59   :  { %s5983_s30 = smov [#allocation22]   ;;  %s5984_s28 = smov [#allocation25]  }
  0x5a   :  { %s121_s5 = sshll.u32 %s5983_s30, 4  ;;  %s144_s29 = sshll.u32 %s5984_s28, 4  ;;  %s122_s5 = int_to_ptr.vmem [resolvable:$true] %s121_s5  ;;  %s145_s29 = int_to_ptr.vmem [resolvable:$true] %s144_s29 }
  0x5b   :  { %s5578_s19 = scalar_lea.hbm %s6693_s8, 2048 }
  0x5c   :  { %p5579_p10 = scmp.ne.s32.totalorder %s6693_s8, %s5578_s19  ;;  %p5582_p11 = scmp.lt.u32.totalorder %s5578_s19, %s6693_s8 }
  0x5e   :  { %p5584_p12 = pnand %p5582_p11, %p5579_p10 }
  0x60   :  { %5587 = shalt.err (!%p5584_p12)
}
  0x61   :  { %s5588_s1 = scalar_lea.vmem %s122_s5, 2048  ;;  %p5593_p0 = scmp.lt.s32.totalorder %s122_s5, %s122_s5 }
  0x62   :  { %p5589_p13 = scmp.ne.s32.totalorder %s122_s5, %s5588_s1  ;;  %p5594_p1 = scmp.lt.s32.totalorder %s5588_s1, %s5588_s1 }
  0x64   :  { %p5595_p2 = por %p5594_p1, %p5593_p0 }
  0x66   :  { %p5596_p3 = pnand %p5595_p2, %p5589_p13 }
  0x68   :  { %5599 = shalt.err (!%p5596_p3)
}
  0x69   :  { %s5985_s0 = smov 128   ;;  %s5986_s2 = smov 8  }
  0x6a   :  { %127 = dma.hbm_to_vmem [thread:$0]  %s6693_s8, 2048, %s122_s5, [#allocation23], %s5985_s0, %s5985_s0, %s5986_s2  }
  0x6b   :  { %s5600_s30 = scalar_lea.hbm %s6695_s10, 16 }
  0x6c   :  { %p5601_p4 = scmp.ne.s32.totalorder %s6695_s10, %s5600_s30  ;;  %p5604_p5 = scmp.lt.u32.totalorder %s5600_s30, %s6695_s10 }
  0x6e   :  { %p5606_p6 = pnand %p5604_p5, %p5601_p4 }
  0x70   :  { %5609 = shalt.err (!%p5606_p6)
}
  0x71   :  { %s5610_s20 = scalar_lea.vmem %s145_s29, 16  ;;  %s5614_s4 = scalar_lea.vmem %s145_s29, 32 }
  0x72   :  { %p5611_p7 = scmp.ne.s32.totalorder %s145_s29, %s5610_s20  ;;  %p5615_p8 = scmp.lt.s32.totalorder %s145_s29, %s145_s29 }
  0x73   :  { %p5616_p9 = scmp.lt.s32.totalorder %s5614_s4, %s5610_s20 }
  0x75   :  { %p5617_p10 = por %p5616_p9, %p5615_p8 }
  0x77   :  { %p5618_p11 = pnand %p5617_p10, %p5611_p7 }
  0x79   :  { %5621 = shalt.err (!%p5618_p11)
}
  0x7a   :  { %147 = dma.hbm_to_vmem [thread:$0]  %s6695_s10, 16, %s145_s29, [#allocation26]  }
  0x7b   :  { %s5987_s25 = smov [#allocation28]   ;;  %s5988_s1 = smov [#allocation31]  }
  0x7c   :  { %s165_s26 = sshll.u32 %s5987_s25, 4  ;;  %s190_s24 = sshll.u32 %s5988_s1, 4  ;;  %s166_s26 = int_to_ptr.vmem [resolvable:$true] %s165_s26  ;;  %s191_s24 = int_to_ptr.vmem [resolvable:$true] %s190_s24 }
  0x7d   :  { %s5622_s7 = scalar_lea.hbm %s6697_s12, 256 }
  0x7e   :  { %p5623_p12 = scmp.ne.s32.totalorder %s6697_s12, %s5622_s7  ;;  %p5626_p13 = scmp.lt.u32.totalorder %s5622_s7, %s6697_s12 }
  0x80   :  { %p5628_p0 = pnand %p5626_p13, %p5623_p12 }
  0x82   :  { %5631 = shalt.err (!%p5628_p0)
}
  0x83   :  { %s5632_s10 = scalar_lea.vmem %s166_s26, 256  ;;  %p5637_p2 = scmp.lt.s32.totalorder %s166_s26, %s166_s26 }
  0x84   :  { %p5633_p1 = scmp.ne.s32.totalorder %s166_s26, %s5632_s10  ;;  %p5638_p3 = scmp.lt.s32.totalorder %s5632_s10, %s5632_s10 }
  0x86   :  { %p5639_p4 = por %p5638_p3, %p5637_p2 }
  0x88   :  { %p5640_p5 = pnand %p5639_p4, %p5633_p1 }
  0x8a   :  { %5643 = shalt.err (!%p5640_p5)
}
  0x8b   :  { %171 = dma.hbm_to_vmem [thread:$0]  %s6697_s12, 256, %s166_s26, [#allocation29], %s5985_s0, %s5985_s0, %s5986_s2  }
  0x8c   :  { %s5644_s8 = scalar_lea.hbm %s6699_s14, 16 }
  0x8d   :  { %p5645_p6 = scmp.ne.s32.totalorder %s6699_s14, %s5644_s8  ;;  %p5648_p7 = scmp.lt.u32.totalorder %s5644_s8, %s6699_s14 }
  0x8f   :  { %p5650_p8 = pnand %p5648_p7, %p5645_p6 }
  0x91   :  { %5653 = shalt.err (!%p5650_p8)
}
  0x92   :  { %s5654_s27 = scalar_lea.vmem %s191_s24, 16  ;;  %s5658_s7 = scalar_lea.vmem %s191_s24, 32 }
  0x93   :  { %p5655_p9 = scmp.ne.s32.totalorder %s191_s24, %s5654_s27  ;;  %p5659_p10 = scmp.lt.s32.totalorder %s191_s24, %s191_s24 }
  0x94   :  { %p5660_p11 = scmp.lt.s32.totalorder %s5658_s7, %s5654_s27 }
  0x96   :  { %p5661_p12 = por %p5660_p11, %p5659_p10 }
  0x98   :  { %p5662_p13 = pnand %p5661_p12, %p5655_p9 }
  0x9a   :  { %5665 = shalt.err (!%p5662_p13)
}
  0x9b   :  { %193 = dma.hbm_to_vmem [thread:$0]  %s6699_s14, 16, %s191_s24, [#allocation32]  }
  0x9c   :  { %s5989_s30 = smov [#allocation34]   ;;  %s5990_s23 = smov [#allocation10]  }
  0x9d   :  { %s211_s28 = sshll.u32 %s5989_s30, 4  ;;  %s44_s3 = sshll.u32 %s5990_s23, 4  ;;  %s212_s28 = int_to_ptr.vmem [resolvable:$true] %s211_s28  ;;  %s45_s3 = int_to_ptr.vmem [resolvable:$true] %s44_s3 }
  0x9e   :  { %s5666_s19 = scalar_lea.hbm %s6703_s18, 2048 }
  0x9f   :  { %p5667_p0 = scmp.ne.s32.totalorder %s6703_s18, %s5666_s19  ;;  %p5670_p1 = scmp.lt.u32.totalorder %s5666_s19, %s6703_s18 }
  0xa1   :  { %p5672_p2 = pnand %p5670_p1, %p5667_p0 }
  0xa3   :  { %5675 = shalt.err (!%p5672_p2)
}
  0xa4   :  { %s5676_s14 = scalar_lea.vmem %s212_s28, 2048  ;;  %p5681_p4 = scmp.lt.s32.totalorder %s212_s28, %s212_s28 }
  0xa5   :  { %p5677_p3 = scmp.ne.s32.totalorder %s212_s28, %s5676_s14  ;;  %p5682_p5 = scmp.lt.s32.totalorder %s5676_s14, %s5676_s14 }
  0xa7   :  { %p5683_p6 = por %p5682_p5, %p5681_p4 }
  0xa9   :  { %p5684_p7 = pnand %p5683_p6, %p5677_p3 }
  0xab   :  { %5687 = shalt.err (!%p5684_p7)
}
  0xac   :  { %217 = dma.hbm_to_vmem [thread:$0]  %s6703_s18, 2048, %s212_s28, [#allocation35], %s5985_s0, %s5985_s0, %s5986_s2  }
  0xad   :  { %s6731_s27 = sld [smem:[#allocation56_spill]] }
  0xb3   :  { %s5688_s7 = scalar_lea.hbm %s6731_s27, 32 }
  0xb4   :  { %p5689_p8 = scmp.ne.s32.totalorder %s6731_s27, %s5688_s7  ;;  %p5692_p9 = scmp.lt.u32.totalorder %s5688_s7, %s6731_s27 }
  0xb6   :  { %p5694_p10 = pnand %p5692_p9, %p5689_p8 }
  0xb8   :  { %5697 = shalt.err (!%p5694_p10)
}
  0xb9   :  { %s5698_s10 = scalar_lea.vmem %s45_s3, 32  ;;  %p5703_p12 = scmp.lt.s32.totalorder %s45_s3, %s45_s3 }
  0xba   :  { %p5699_p11 = scmp.ne.s32.totalorder %s45_s3, %s5698_s10  ;;  %p5704_p13 = scmp.lt.s32.totalorder %s5698_s10, %s5698_s10 }
  0xbc   :  { %p5705_p0 = por %p5704_p13, %p5703_p12 }
  0xbe   :  { %p5706_p1 = pnand %p5705_p0, %p5699_p11 }
  0xc0   :  { %5709 = shalt.err (!%p5706_p1)
}
  0xc1   :  { %47 = dma.hbm_to_vmem [thread:$0]  %s6731_s27, 32, %s45_s3, [#allocation11]  }
  0xc2   :  { %s5991_s29 = smov [#allocation15]   ;;  %s5992_s20 = smov [#allocation18]  }
  0xc3   :  { %s67_s19 = sshll.u32 %s5991_s29, 4  ;;  %s90_s4 = sshll.u32 %s5992_s20, 4  ;;  %s68_s19 = int_to_ptr.vmem [resolvable:$true] %s67_s19  ;;  %s91_s4 = int_to_ptr.vmem [resolvable:$true] %s90_s4 }
  0xc4   :  { %s6732_s14 = sld [smem:[#allocation59_spill]] }
  0xca   :  { %s5710_s24 = scalar_lea.hbm %s6732_s14, 2048 }
  0xcb   :  { %p5711_p2 = scmp.ne.s32.totalorder %s6732_s14, %s5710_s24  ;;  %p5714_p3 = scmp.lt.u32.totalorder %s5710_s24, %s6732_s14 }
  0xcd   :  { %p5716_p4 = pnand %p5714_p3, %p5711_p2 }
  0xcf   :  { %5719 = shalt.err (!%p5716_p4)
}
  0xd0   :  { %s5720_s3 = scalar_lea.vmem %s68_s19, 2048  ;;  %p5725_p6 = scmp.lt.s32.totalorder %s68_s19, %s68_s19 }
  0xd1   :  { %p5721_p5 = scmp.ne.s32.totalorder %s68_s19, %s5720_s3  ;;  %p5726_p7 = scmp.lt.s32.totalorder %s5720_s3, %s5720_s3 }
  0xd3   :  { %p5727_p8 = por %p5726_p7, %p5725_p6 }
  0xd5   :  { %p5728_p9 = pnand %p5727_p8, %p5721_p5 }
  0xd7   :  { %5731 = shalt.err (!%p5728_p9)
}
  0xd8   :  { %73 = dma.hbm_to_vmem [thread:$0]  %s6732_s14, 2048, %s68_s19, [#allocation14], %s5985_s0, %s5985_s0, %s5986_s2  }
  0xd9   :  { %s6733_s23 = sld [smem:[#allocation61_spill]] }
  0xdf   :  { %s5732_s10 = scalar_lea.hbm %s6733_s23, 16 }
  0xe0   :  { %p5733_p10 = scmp.ne.s32.totalorder %s6733_s23, %s5732_s10  ;;  %p5736_p11 = scmp.lt.u32.totalorder %s5732_s10, %s6733_s23 }
  0xe2   :  { %p5738_p12 = pnand %p5736_p11, %p5733_p10 }
  0xe4   :  { %5741 = shalt.err (!%p5738_p12)
}
  0xe5   :  { %s5742_s8 = scalar_lea.vmem %s91_s4, 16  ;;  %s5746_s5 = scalar_lea.vmem %s91_s4, 32 }
  0xe6   :  { %p5743_p13 = scmp.ne.s32.totalorder %s91_s4, %s5742_s8  ;;  %p5747_p0 = scmp.lt.s32.totalorder %s91_s4, %s91_s4 }
  0xe7   :  { %p5748_p1 = scmp.lt.s32.totalorder %s5746_s5, %s5742_s8 }
  0xe9   :  { %p5749_p2 = por %p5748_p1, %p5747_p0 }
  0xeb   :  { %p5750_p3 = pnand %p5749_p2, %p5743_p13 }
  0xed   :  { %5753 = shalt.err (!%p5750_p3)
}
  0xee   :  { %93 = dma.hbm_to_vmem [thread:$0]  %s6733_s23, 16, %s91_s4, [#allocation17]  }
  0xef   :  { %s5993_s24 = smov [#allocation21]   ;;  %s5994_s1 = smov [#allocation24]  }
  0xf0   :  { %s112_s25 = sshll.u32 %s5993_s24, 4  ;;  %s134_s6 = sshll.u32 %s5994_s1, 4  ;;  %s113_s25 = int_to_ptr.vmem [resolvable:$true] %s112_s25  ;;  %s135_s6 = int_to_ptr.vmem [resolvable:$true] %s134_s6 }
  0xf1   :  { %s6734_s27 = sld [smem:[#allocation63_spill]] }
  0xf7   :  { %s5754_s12 = scalar_lea.hbm %s6734_s27, 128 }
  0xf8   :  { %p5755_p4 = scmp.ne.s32.totalorder %s6734_s27, %s5754_s12  ;;  %p5758_p5 = scmp.lt.u32.totalorder %s5754_s12, %s6734_s27 }
  0xfa   :  { %p5760_p6 = pnand %p5758_p5, %p5755_p4 }
  0xfc   :  { %5763 = shalt.err (!%p5760_p6)
}
  0xfd   :  { %s5764_s4 = scalar_lea.vmem %s113_s25, 128  ;;  %p5769_p8 = scmp.lt.s32.totalorder %s113_s25, %s113_s25 }
  0xfe   :  { %p5765_p7 = scmp.ne.s32.totalorder %s113_s25, %s5764_s4  ;;  %p5770_p9 = scmp.lt.s32.totalorder %s5764_s4, %s5764_s4 }
 0x100   :  { %p5771_p10 = por %p5770_p9, %p5769_p8 }
 0x102   :  { %p5772_p11 = pnand %p5771_p10, %p5765_p7 }
 0x104   :  { %5775 = shalt.err (!%p5772_p11)
}
 0x105   :  { %115 = dma.hbm_to_vmem [thread:$0]  %s6734_s27, 128, %s113_s25, [#allocation20]  }
 0x106   :  { %s5776_s8 = scalar_lea.hbm %s6694_s9, 16 }
 0x107   :  { %p5777_p12 = scmp.ne.s32.totalorder %s6694_s9, %s5776_s8  ;;  %p5780_p13 = scmp.lt.u32.totalorder %s5776_s8, %s6694_s9 }
 0x109   :  { %p5782_p0 = pnand %p5780_p13, %p5777_p12 }
 0x10b   :  { %5785 = shalt.err (!%p5782_p0)
}
 0x10c   :  { %s5786_s1 = scalar_lea.vmem %s135_s6, 16  ;;  %s5790_s7 = scalar_lea.vmem %s135_s6, 32 }
 0x10d   :  { %p5787_p1 = scmp.ne.s32.totalorder %s135_s6, %s5786_s1  ;;  %p5791_p2 = scmp.lt.s32.totalorder %s135_s6, %s135_s6 }
 0x10e   :  { %p5792_p3 = scmp.lt.s32.totalorder %s5790_s7, %s5786_s1 }
 0x110   :  { %p5793_p4 = por %p5792_p3, %p5791_p2 }
 0x112   :  { %p5794_p5 = pnand %p5793_p4, %p5787_p1 }
 0x114   :  { %5797 = shalt.err (!%p5794_p5)
}
 0x115   :  { %137 = dma.hbm_to_vmem [thread:$0]  %s6694_s9, 16, %s135_s6, [#allocation23]  }
 0x116   :  { %s5995_s27 = smov [#allocation27]   ;;  %s5798_s10 = scalar_lea.hbm %s6696_s11, 10240 }
 0x117   :  { %s153_s12 = sshll.u32 %s5995_s27, 4  ;;  %p5799_p6 = scmp.ne.s32.totalorder %s6696_s11, %s5798_s10  ;;  %s154_s12 = int_to_ptr.vmem [resolvable:$true] %s153_s12 }
 0x118   :  { %p5802_p7 = scmp.lt.u32.totalorder %s5798_s10, %s6696_s11 }
 0x11a   :  { %p5804_p8 = pnand %p5802_p7, %p5799_p6 }
 0x11c   :  { %5807 = shalt.err (!%p5804_p8)
}
 0x11d   :  { %s5808_s29 = scalar_lea.vmem %s154_s12, 10240  ;;  %p5813_p10 = scmp.lt.s32.totalorder %s154_s12, %s154_s12 }
 0x11e   :  { %p5809_p9 = scmp.ne.s32.totalorder %s154_s12, %s5808_s29  ;;  %p5814_p11 = scmp.lt.s32.totalorder %s5808_s29, %s5808_s29 }
 0x120   :  { %p5815_p12 = por %p5814_p11, %p5813_p10 }
 0x122   :  { %p5816_p13 = pnand %p5815_p12, %p5809_p9 }
 0x124   :  { %5819 = shalt.err (!%p5816_p13)
}
 0x125   :  { %s5996_s9 = smov 640   ;;  %s5997_s6 = smov 40  }
 0x126   :  { %159 = dma.hbm_to_vmem [thread:$0]  %s6696_s11, 10240, %s154_s12, [#allocation26], %s5996_s9, %s5996_s9, %s5997_s6  }
 0x127   :  { %s5998_s5 = smov [#allocation30]   ;;  %s5999_s14 = smov [#allocation33]  }
 0x128   :  { %s177_s19 = sshll.u32 %s5998_s5, 4  ;;  %s200_s24 = sshll.u32 %s5999_s14, 4  ;;  %s178_s19 = int_to_ptr.vmem [resolvable:$true] %s177_s19  ;;  %s201_s24 = int_to_ptr.vmem [resolvable:$true] %s200_s24 }
 0x129   :  { %s5820_s25 = scalar_lea.hbm %s6698_s13, 2048 }
 0x12a   :  { %p5821_p0 = scmp.ne.s32.totalorder %s6698_s13, %s5820_s25  ;;  %p5824_p1 = scmp.lt.u32.totalorder %s5820_s25, %s6698_s13 }
 0x12c   :  { %p5826_p2 = pnand %p5824_p1, %p5821_p0 }
 0x12e   :  { %5829 = shalt.err (!%p5826_p2)
}
 0x12f   :  { %s5830_s11 = scalar_lea.vmem %s178_s19, 2048  ;;  %p5835_p4 = scmp.lt.s32.totalorder %s178_s19, %s178_s19 }
 0x130   :  { %p5831_p3 = scmp.ne.s32.totalorder %s178_s19, %s5830_s11  ;;  %p5836_p5 = scmp.lt.s32.totalorder %s5830_s11, %s5830_s11 }
 0x132   :  { %p5837_p6 = por %p5836_p5, %p5835_p4 }
 0x134   :  { %p5838_p7 = pnand %p5837_p6, %p5831_p3 }
 0x136   :  { %5841 = shalt.err (!%p5838_p7)
}
 0x137   :  { %183 = dma.hbm_to_vmem [thread:$0]  %s6698_s13, 2048, %s178_s19, [#allocation29], %s5985_s0, %s5985_s0, %s5986_s2  }
 0x138   :  { %s5842_s23 = scalar_lea.hbm %s6700_s15, 16 }
 0x139   :  { %p5843_p8 = scmp.ne.s32.totalorder %s6700_s15, %s5842_s23  ;;  %p5846_p9 = scmp.lt.u32.totalorder %s5842_s23, %s6700_s15 }
 0x13b   :  { %p5848_p10 = pnand %p5846_p9, %p5843_p8 }
 0x13d   :  { %5851 = shalt.err (!%p5848_p10)
}
 0x13e   :  { %s5852_s20 = scalar_lea.vmem %s201_s24, 16  ;;  %s5856_s8 = scalar_lea.vmem %s201_s24, 32 }
 0x13f   :  { %p5853_p11 = scmp.ne.s32.totalorder %s201_s24, %s5852_s20  ;;  %p5857_p12 = scmp.lt.s32.totalorder %s201_s24, %s201_s24 }
 0x140   :  { %p5858_p13 = scmp.lt.s32.totalorder %s5856_s8, %s5852_s20 }
 0x142   :  { %p5859_p0 = por %p5858_p13, %p5857_p12 }
 0x144   :  { %p5860_p1 = pnand %p5859_p0, %p5853_p11 }
 0x146   :  { %5863 = shalt.err (!%p5860_p1)
}
 0x147   :  { %203 = dma.hbm_to_vmem [thread:$0]  %s6700_s15, 16, %s201_s24, [#allocation32]  }
 0x148   :  { %s6000_s19 = smov [#allocation36]   ;;  %s5864_s25 = scalar_lea.hbm %s6707_s22, 3584 }
 0x149   :  { %s227_s14 = sshll.u32 %s6000_s19, 4  ;;  %p5865_p2 = scmp.ne.s32.totalorder %s6707_s22, %s5864_s25  ;;  %s228_s14 = int_to_ptr.vmem [resolvable:$true] %s227_s14 }
 0x14a   :  { %p5868_p3 = scmp.lt.u32.totalorder %s5864_s25, %s6707_s22 }
 0x14c   :  { %p5870_p4 = pnand %p5868_p3, %p5865_p2 }
 0x14e   :  { %5873 = shalt.err (!%p5870_p4)
}
 0x14f   :  { %s5874_s11 = scalar_lea.vmem %s228_s14, 3584  ;;  %p5879_p6 = scmp.lt.s32.totalorder %s228_s14, %s228_s14 }
 0x150   :  { %p5875_p5 = scmp.ne.s32.totalorder %s228_s14, %s5874_s11  ;;  %p5880_p7 = scmp.lt.s32.totalorder %s5874_s11, %s5874_s11 }
 0x152   :  { %p5881_p8 = por %p5880_p7, %p5879_p6 }
 0x154   :  { %p5882_p9 = pnand %p5881_p8, %p5875_p5 }
 0x156   :  { %5885 = shalt.err (!%p5882_p9)
}
 0x157   :  { %s6001_s15 = smov 512   ;;  %s6002_s24 = smov 32  }
 0x158   :  { %233 = dma.hbm_to_vmem [thread:$0]  %s6707_s22, 3584, %s228_s14, [#allocation35], %s6001_s15, %s6001_s15, %s6002_s24  }
 0x159   :  { %5952 = dma.done.wait [#allocation11], 32  }
 0x15a   :  { %5953 = vsyncadd [#allocation11], 4294967264 }
 0x15b   :  { %5954 = dma.done.wait [#allocation14], 2560  }
 0x15c   :  { %5955 = vsyncadd [#allocation14], 4294964736 }
 0x15d   :  { %5956 = dma.done.wait [#allocation17], 32  }
 0x15e   :  { %5957 = vsyncadd [#allocation17], 4294967264 }
 0x15f   :  { %5958 = dma.done.wait [#allocation20], 6272  }
 0x160   :  { %5959 = vsyncadd [#allocation20], 4294961024 }
 0x161   :  { %5960 = dma.done.wait [#allocation23], 2064  }
 0x162   :  { %5961 = vsyncadd [#allocation23], 4294965232 }
 0x163   :  { %5962 = dma.done.wait [#allocation26], 10256  }
 0x164   :  { %5963 = vsyncadd [#allocation26], 4294957040 }
 0x165   :  { %5964 = dma.done.wait [#allocation29], 2304  }
 0x166   :  { %5965 = vsyncadd [#allocation29], 4294964992 }
 0x167   :  { %5966 = dma.done.wait [#allocation32], 32  }
 0x168   :  { %5967 = vsyncadd [#allocation32], 4294967264 }
 0x169   :  { %5968 = dma.done.wait [#allocation35], 5632  }
 0x16a   :  { %5969 = vsyncadd [#allocation35], 4294961664  ;;  %v6003_v0 = vmov 0.0   ;;  %v310_v1 = vld [vmem:[#allocation13 + $0x8] sm:$0xff]  ;;  %v312_v2 = vld [vmem:[#allocation13 + $0x18] sm:$0xff]  ;;  %vm313_vm0 = vcmask 130048  }
 0x16b   :  { %381 = vmatprep.mubr.f32.mxu0 %v6003_v0  ;;  %4169 = vmatprep.subr.mxu1 %v6003_v0  ;;  %v309_v3 = vld [vmem:[#allocation13] sm:$0xff]  ;;  %v4617_v4 = vpack.c.bf16 %v312_v2, %v310_v1  ;;  %v311_v5 = vld [vmem:[#allocation13 + $0x10] sm:$0xff]  ;;  %v308_v7 = vld [vmem:[#allocation10] sm:$0x3]  ;;  %vm6004_vm1 = vmmov 0   ;;  %v6005_v11 = vmov 0.0|0.0  }
 0x16c   :  { %v4619_v6 = vpack.c.bf16 %v311_v5, %v309_v3  ;;  %4171 = vmatprep.mubr.msk.f32.mxu1 %vm6004_vm1, %v6003_v0  ;;  %v486_v8 = vld [vmem:[#allocation15] sm:$0xff]  ;;  %v487_v9 = vld [vmem:[#allocation15 + $0x8] sm:$0xff]  ;;  %v488_v12 = vld [vmem:[#allocation15 + $0x10] sm:$0xff]  ;;  %vm396_vm2 = vcmask 1043456   ;;  %s6735_s4 = sld [smem:[#allocation58_spill]]  ;;  %vm392_vm3 = vcmask 31744  }
 0x16d   :  { %4618 = vmatprep.subr.bf16.mxu0 %v4617_v4  ;;  %v4622_v10 = vpack.c.bf16 %v487_v9, %v486_v8  ;;  %v489_v13 = vld [vmem:[#allocation15 + $0x18] sm:$0xff]  ;;  %v490_v15 = vld [vmem:[#allocation15 + $0x20] sm:$0xff]  ;;  %v491_v16 = vld [vmem:[#allocation15 + $0x28] sm:$0xff]  ;;  %vm6006_vm4 = vmmov 1   ;;  %vm860_vm6 = vcmask 97280   ;;  %vm1434_vm7 = vcmask 326656  }
 0x16e   :  { %4620 = vmatpush1.bf16.msra.mxu0 %v4619_v6  ;;  %v4625_v14 = vpack.c.bf16 %v489_v13, %v488_v12  ;;  %v4628_v17 = vpack.c.bf16 %v491_v16, %v490_v15  ;;  %v492_v18 = vld [vmem:[#allocation15 + $0x30] sm:$0xff]  ;;  %v493_v19 = vld [vmem:[#allocation15 + $0x38] sm:$0xff]  ;;  %v494_v25 = vld [vmem:[#allocation15 + $0x40] sm:$0xff]  ;;  %s6007_s23 = smov [#allocation7]   ;;  %s6008_s29 = smov [#allocation8]  }
 0x16f   :  { %4645 = vmatprep.subr.bf16.mxu0 %v6005_v11  ;;  %v4631_v20 = vpack.c.bf16 %v493_v19, %v492_v18  ;;  %v495_v26 = vld [vmem:[#allocation15 + $0x48] sm:$0xff]  ;;  %v496_v28 = vld [vmem:[#allocation15 + $0x50] sm:$0xff]  ;;  %v497_v29 = vld [vmem:[#allocation15 + $0x58] sm:$0xff]  ;;  %s292_s28 = sshll.u32 %s6007_s23, 4  ;;  %s304_s9 = sshll.u32 %s6008_s29, 4  ;;  %s293_s28 = int_to_ptr.vmem [resolvable:$true] %s292_s28  ;;  %s305_s9 = int_to_ptr.vmem [resolvable:$true] %s304_s9 }
 0x170   :  { %v4634_v27 = vpack.c.bf16 %v495_v26, %v494_v25  ;;  %v4637_v30 = vpack.c.bf16 %v497_v29, %v496_v28  ;;  %v498_v31 = vld [vmem:[#allocation15 + $0x60] sm:$0xff]  ;;  %v499_v32 = vld [vmem:[#allocation15 + $0x68] sm:$0xff]  ;;  %v500_v34 = vld [vmem:[#allocation15 + $0x70] sm:$0xff]  ;;  %s5886_s8 = scalar_lea.hbm %s6701_s16, 18432 }
 0x171   :  { %3869 = vmatmul.mubr.msk.f32.vlgmr.msra.gmra.mrb[0].mxu0 %vm313_vm0, %v308_v7  ;;  %v4640_v33 = vpack.c.bf16 %v499_v32, %v498_v31  ;;  %v501_v35 = vld [vmem:[#allocation15 + $0x78] sm:$0xff]  ;;  %v666_v37 = vld [vmem:[#allocation19 + $0x8] sm:$0xff]  ;;  %v669_v38 = vld [vmem:[#allocation19 + $0x20] sm:$0xff]  ;;  %p5887_p10 = scmp.ne.s32.totalorder %s6701_s16, %s5886_s8  ;;  %p5890_p11 = scmp.lt.u32.totalorder %s5886_s8, %s6701_s16 }
 0x172   :  { %4241 = vmatprep.mubr.msk.f32.mxu0 %vm6004_vm1, %v6003_v0  ;;  %4647 = vmatpush3.bf16.msra.mxu0 %v4622_v10  ;;  %v390_v23 = vld [vmem:[%s6735_s4] sm:$0xf]  ;;  %v4643_v36 = vpack.c.bf16 %v501_v35, %v500_v34  ;;  %v4669_v39 = vpack.c.bf16 %v669_v38, %v666_v37  ;;  %v668_v54 = vld [vmem:[#allocation19 + $0x18] sm:$0xff]  ;;  %v667_v57 = vld [vmem:[#allocation19 + $0x10] sm:$0xff] }
 0x173   :  { %4648 = vmatprep.subr.bf16.mxu0 %v6005_v11  ;;  %v665_v53 = vld [vmem:[#allocation19] sm:$0xff]  ;;  %v670_v58 = vld [vmem:[#allocation19 + $0x28] sm:$0xff]  ;;  %v672_v1 = vld [vmem:[#allocation19 + $0x38] sm:$0xff]  ;;  %p5892_p12 = pnand %p5890_p11, %p5887_p10 }
 0x174   :  { %v4671_v59 = vpack.c.bf16 %v668_v54, %v665_v53  ;;  %v4702_v62 = vpack.c.bf16 %v670_v58, %v667_v57  ;;  %v675_v2 = vld [vmem:[#allocation19 + $0x50] sm:$0xff]  ;;  %v674_v5 = vld [vmem:[#allocation19 + $0x48] sm:$0xff]  ;;  %v673_v6 = vld [vmem:[#allocation19 + $0x40] sm:$0xff] }
 0x175   :  { %v4673_v3 = vpack.c.bf16 %v675_v2, %v672_v1  ;;  %v671_v4 = vld [vmem:[#allocation19 + $0x30] sm:$0xff]  ;;  %v676_v8 = vld [vmem:[#allocation19 + $0x58] sm:$0xff]  ;;  %v681_v12 = vld [vmem:[#allocation19 + $0x80] sm:$0xff] }
 0x176   :  { %4650 = vmatpush3.bf16.msra.mxu0 %v4625_v14  ;;  %v4675_v7 = vpack.c.bf16 %v674_v5, %v671_v4  ;;  %v4705_v9 = vpack.c.bf16 %v676_v8, %v673_v6  ;;  %v680_v15 = vld [vmem:[#allocation19 + $0x78] sm:$0xff]  ;;  %v679_v16 = vld [vmem:[#allocation19 + $0x70] sm:$0xff]  ;;  %v682_v18 = vld [vmem:[#allocation19 + $0x88] sm:$0xff] }
 0x177   :  { %4651 = vmatprep.subr.bf16.mxu0 %v6005_v11  ;;  %v4708_v19 = vpack.c.bf16 %v682_v18, %v679_v16  ;;  %v685_v25 = vld [vmem:[#allocation19 + $0xa0] sm:$0xff]  ;;  %v690_v29 = vld [vmem:[#allocation19 + $0xc8] sm:$0xff]  ;;  %v691_v34 = vld [vmem:[#allocation19 + $0xd0] sm:$0xff] }
 0x178   :  { %v689_v32 = vld [vmem:[#allocation19 + $0xc0] sm:$0xff]  ;;  %v696_v38 = vld [vmem:[#allocation19 + $0xf8] sm:$0xff]  ;;  %v703_v53 = vld [vmem:[#allocation19 + $0x130] sm:$0xff] }
 0x179   :  { %v711_v57 = vld [vmem:[#allocation19 + $0x170] sm:$0xff]  ;;  %v712_v1 = vld [vmem:[#allocation19 + $0x178] sm:$0xff]  ;;  %vm4727_vm5 = vmpackc.low %vm396_vm2, %vm6006_vm4 }
 0x17a   :  { %4653 = vmatpush3.bf16.msra.mxu0 %v4628_v17 }
 0x17b   :  { %4654 = vmatprep.subr.bf16.mxu0 %v6005_v11 }
 0x17e   :  { %4656 = vmatpush3.bf16.msra.mxu0 %v4631_v20 }
 0x17f   :  { %4657 = vmatprep.subr.bf16.mxu0 %v6005_v11 }
 0x182   :  { %4659 = vmatpush3.bf16.msra.mxu0 %v4634_v27 }
 0x183   :  { %4660 = vmatprep.subr.bf16.mxu0 %v6005_v11 }
 0x186   :  { %4662 = vmatpush3.bf16.msra.mxu0 %v4637_v30 }
 0x187   :  { %4663 = vmatprep.subr.bf16.mxu0 %v6005_v11 }
 0x18a   :  { %4665 = vmatpush3.bf16.msra.mxu0 %v4640_v33 }
 0x18b   :  { %4666 = vmatprep.subr.bf16.mxu0 %v6005_v11 }
 0x18e   :  { %4668 = vmatpush3.bf16.msra.mxu0 %v4643_v36 }
 0x18f   :  { %4701 = vmatprep.subr.bf16.mxu0 %v6005_v11 }
 0x244   :  { %v383_v21 = vpop.f32.mrb[0].mxu0 }
 0x245   :  { %388 = vst [vmem:[#allocation2] sm:$0x3] %v383_v21  ;;  %v385_v22 = vpop.f32.mrb[1].mxu0  ;;  %v687_v21 = vld [vmem:[#allocation19 + $0xb0] sm:$0xff] }
 0x246   :  { %389 = vst [vmem:[#allocation2 + $0x2] sm:$0x3] %v385_v22 }
 0x24d   :  { %v391_v24 = vld [vmem:[#allocation2] sm:$0xf] }
 0x24e   :  { %4170 = vmatpush3.msk.msra.mxu1 %vm396_vm2, %v391_v24  ;;  %v686_v24 = vld [vmem:[#allocation19 + $0xa8] sm:$0xff] }
 0x24f   :  { %4172 = vmatmul.mubr.msk.f32.vlgmr.msra.gmra.mrb[0].mxu1 %vm392_vm3, %v390_v23  ;;  %4621 = vmatprep.subr.bf16.mxu1 %v6005_v11  ;;  %v683_v23 = vld [vmem:[#allocation19 + $0x90] sm:$0xff] }
 0x250   :  { %4623 = vmatpush3.bf16.msra.mxu1 %v4622_v10  ;;  %4206 = vmatprep.mubr.msk.f32.mxu1 %vm6004_vm1, %v6003_v0  ;;  %v678_v10 = vld [vmem:[#allocation19 + $0x68] sm:$0xff]  ;;  %v4683_v26 = vpack.c.bf16 %v686_v24, %v683_v23 }
 0x251   :  { %4624 = vmatprep.subr.bf16.mxu1 %v6005_v11  ;;  %v4677_v13 = vpack.c.bf16 %v681_v12, %v678_v10  ;;  %v652_v10 = vlaneseq  ;;  %v951_v24 = vld [vmem:[#allocation22] sm:$0xff] }
 0x253   :  { %v653_v12 = vshrl.u32 %v652_v10, 7  ;;  %v1130_v10 = vld [vmem:[#allocation27] sm:$0xff] }
 0x254   :  { %4626 = vmatpush3.bf16.msra.mxu1 %v4625_v14  ;;  %v677_v14 = vld [vmem:[#allocation19 + $0x60] sm:$0xff] }
 0x255   :  { %4627 = vmatprep.subr.bf16.mxu1 %v6005_v11 }
 0x258   :  { %4629 = vmatpush3.bf16.msra.mxu1 %v4628_v17  ;;  %v4679_v17 = vpack.c.bf16 %v680_v15, %v677_v14  ;;  %v6398_v14 = vsub.s32 0, %v653_v12  ;;  %v1135_v12 = vld [vmem:[#allocation27 + $0x28] sm:$0xff] }
 0x259   :  { %4630 = vmatprep.subr.bf16.mxu1 %v6005_v11 }
 0x25c   :  { %4632 = vmatpush3.bf16.msra.mxu1 %v4631_v20  ;;  %v684_v20 = vld [vmem:[#allocation19 + $0x98] sm:$0xff] }
 0x25d   :  { %4633 = vmatprep.subr.bf16.mxu1 %v6005_v11  ;;  %v4681_v22 = vpack.c.bf16 %v687_v21, %v684_v20 }
 0x260   :  { %4635 = vmatpush3.bf16.msra.mxu1 %v4634_v27  ;;  %v688_v27 = vld [vmem:[#allocation19 + $0xb8] sm:$0xff] }
 0x261   :  { %4636 = vmatprep.subr.bf16.mxu1 %v6005_v11  ;;  %v4711_v28 = vpack.c.bf16 %v688_v27, %v685_v25  ;;  %v952_v25 = vld [vmem:[#allocation22 + $0x8] sm:$0xff]  ;;  %v953_v27 = vld [vmem:[#allocation22 + $0x10] sm:$0xff] }
 0x264   :  { %4638 = vmatpush3.bf16.msra.mxu1 %v4637_v30  ;;  %v693_v30 = vld [vmem:[#allocation19 + $0xe0] sm:$0xff] }
 0x265   :  { %4639 = vmatprep.subr.bf16.mxu1 %v6005_v11  ;;  %v4685_v31 = vpack.c.bf16 %v693_v30, %v690_v29  ;;  %v956_v30 = vld [vmem:[#allocation22 + $0x28] sm:$0xff] }
 0x268   :  { %4641 = vmatpush3.bf16.msra.mxu1 %v4640_v33  ;;  %v692_v33 = vld [vmem:[#allocation19 + $0xd8] sm:$0xff] }
 0x269   :  { %4642 = vmatprep.subr.bf16.mxu1 %v6005_v11  ;;  %v4687_v35 = vpack.c.bf16 %v692_v33, %v689_v32  ;;  %v957_v32 = vld [vmem:[#allocation22 + $0x30] sm:$0xff]  ;;  %v958_v33 = vld [vmem:[#allocation22 + $0x38] sm:$0xff] }
 0x26c   :  { %4644 = vmatpush3.bf16.msra.mxu1 %v4643_v36  ;;  %v694_v36 = vld [vmem:[#allocation19 + $0xe8] sm:$0xff] }
 0x26d   :  { %4670 = vmatprep.subr.bf16.mxu1 %v4669_v39  ;;  %v4714_v37 = vpack.c.bf16 %v694_v36, %v691_v34  ;;  %v699_v39 = vld [vmem:[#allocation19 + $0x110] sm:$0xff]  ;;  %v4739_v34 = vpack.c.bf16 %v958_v33, %v957_v32 }
 0x322   :  { %v466_v40 = vpop.f32.mrb[0].mxu1 }
 0x323   :  { %v6379_v41 = vmax.f32 %v466_v40, 0.0  ;;  %v4173_v42 = vpop.f32.mrb[1].mxu1  ;;  %v4689_v40 = vpack.c.bf16 %v699_v39, %v696_v38 }
 0x324   :  { %v695_v42 = vld [vmem:[#allocation19 + $0xf0] sm:$0xff] }
 0x325   :  { %v471_v43 = vsel %vm396_vm2, %v6379_v41, 0.0  ;;  %v478_v44 = vmul.f32 %v6379_v41, %v6379_v41 }
 0x326   :  { %v472_v45 = vrot.slane %v471_v43, 4 }
 0x327   :  { %v479_v46 = vsel %vm396_vm2, %v478_v44, 0.0  ;;  %v697_v44 = vld [vmem:[#allocation19 + $0x100] sm:$0xff] }
 0x328   :  { %v473_v47 = vadd.f32 %v472_v45, %v471_v43  ;;  %v480_v48 = vrot.slane %v479_v46, 4  ;;  %v698_v43 = vld [vmem:[#allocation19 + $0x108] sm:$0xff] }
 0x329   :  { %v4691_v45 = vpack.c.bf16 %v698_v43, %v695_v42  ;;  %v857_v43 = vld [vmem:[#allocation21] sm:$0xff] }
 0x32a   :  { %v474_v49 = vrot.slane %v473_v47, 2  ;;  %v481_v50 = vadd.f32 %v480_v48, %v479_v46  ;;  %v700_v46 = vld [vmem:[#allocation19 + $0x118] sm:$0xff]  ;;  %v702_v48 = vld [vmem:[#allocation19 + $0x128] sm:$0xff] }
 0x32c   :  { %v475_v51 = vadd.f32 %v474_v49, %v473_v47  ;;  %v482_v52 = vrot.slane %v481_v50, 2  ;;  %v4717_v47 = vpack.c.bf16 %v700_v46, %v697_v44  ;;  %v705_v49 = vld [vmem:[#allocation19 + $0x140] sm:$0xff]  ;;  %v959_v44 = vld [vmem:[#allocation22 + $0x40] sm:$0xff] }
 0x32e   :  { %v476_v55 = vrot.slane %v475_v51, 1  ;;  %v483_v56 = vadd.f32 %v482_v52, %v481_v50  ;;  %v4693_v50 = vpack.c.bf16 %v705_v49, %v702_v48  ;;  %v704_v52 = vld [vmem:[#allocation19 + $0x138] sm:$0xff]  ;;  %v962_v48 = vld [vmem:[#allocation22 + $0x58] sm:$0xff] }
 0x330   :  { %v477_v60 = vadd.f32 %v476_v55, %v475_v51  ;;  %v484_v61 = vrot.slane %v483_v56, 1  ;;  %v701_v51 = vld [vmem:[#allocation19 + $0x120] sm:$0xff]  ;;  %v706_v55 = vld [vmem:[#allocation19 + $0x148] sm:$0xff] }
 0x331   :  { %v4695_v54 = vpack.c.bf16 %v704_v52, %v701_v51  ;;  %v4720_v58 = vpack.c.bf16 %v706_v55, %v703_v53  ;;  %v964_v51 = vld [vmem:[#allocation22 + $0x68] sm:$0xff]  ;;  %v965_v53 = vld [vmem:[#allocation22 + $0x70] sm:$0xff] }
 0x332   :  { %4207 = vmatmul.mubr.f32.vlgmr.msra.gmra.mrb[2].mxu1 %v477_v60  ;;  %v485_v63 = vadd.f32 %v484_v61, %v483_v56  ;;  %v708_v56 = vld [vmem:[#allocation19 + $0x158] sm:$0xff]  ;;  %v707_v60 = vld [vmem:[#allocation19 + $0x150] sm:$0xff]  ;;  %v710_v61 = vld [vmem:[#allocation19 + $0x168] sm:$0xff] }
 0x333   :  { %4672 = vmatpush1.bf16.msra.mxu1 %v4671_v59  ;;  %777 = vmatprep.mubr.f32.mxu1 %v6003_v0  ;;  %v4697_v59 = vpack.c.bf16 %v711_v57, %v708_v56  ;;  %v1131_v56 = vld [vmem:[#allocation27 + $0x8] sm:$0xff]  ;;  %v1136_v57 = vld [vmem:[#allocation27 + $0x30] sm:$0xff] }
 0x334   :  { %4242 = vmatmul.mubr.f32.vlgmr.msra.gmra.mrb[2].mxu0 %v485_v63  ;;  %4674 = vmatprep.subr.bf16.mxu1 %v4673_v3  ;;  %v4699_v63 = vpack.c.bf16 %v710_v61, %v707_v60  ;;  %v1138_v60 = vld [vmem:[#allocation27 + $0x40] sm:$0xff] }
 0x335   :  { %4703 = vmatpush3.bf16.msra.mxu0 %v4702_v62  ;;  %4276 = vmatprep.mubr.msk.f32.mxu0 %vm6004_vm1, %v6003_v0  ;;  %v709_v62 = vld [vmem:[#allocation19 + $0x160] sm:$0xff] }
 0x336   :  { %4704 = vmatprep.subr.bf16.mxu0 %v6005_v11  ;;  %v4723_v2 = vpack.c.bf16 %v712_v1, %v709_v62 }
 0x337   :  { %4676 = vmatpush1.bf16.msra.mxu1 %v4675_v7 }
 0x338   :  { %4678 = vmatprep.subr.bf16.mxu1 %v4677_v13  ;;  %v646_v13 = vld [vmem:[#allocation16] sm:$0x1] }
 0x339   :  { %4706 = vmatpush3.bf16.msra.mxu0 %v4705_v9 }
 0x33a   :  { %4707 = vmatprep.subr.bf16.mxu0 %v6005_v11 }
 0x33b   :  { %4680 = vmatpush1.bf16.msra.mxu1 %v4679_v17  ;;  %v648_v17 = vld [vmem:[#allocation18] sm:$0x1] }
 0x33c   :  { %4682 = vmatprep.subr.bf16.mxu1 %v4681_v22 }
 0x33d   :  { %4709 = vmatpush3.bf16.msra.mxu0 %v4708_v19 }
 0x33e   :  { %4710 = vmatprep.subr.bf16.mxu0 %v6005_v11 }
 0x33f   :  { %4684 = vmatpush1.bf16.msra.mxu1 %v4683_v26  ;;  %v4730_v26 = vpack.c.bf16 %v952_v25, %v951_v24 }
 0x340   :  { %4686 = vmatprep.subr.bf16.mxu1 %v4685_v31 }
 0x341   :  { %4712 = vmatpush3.bf16.msra.mxu0 %v4711_v28  ;;  %v954_v28 = vld [vmem:[#allocation22 + $0x18] sm:$0xff] }
 0x342   :  { %4713 = vmatprep.subr.bf16.mxu0 %v6005_v11  ;;  %v4733_v29 = vpack.c.bf16 %v954_v28, %v953_v27  ;;  %v1145_v27 = vld [vmem:[#allocation27 + $0x78] sm:$0xff]  ;;  %v1143_v28 = vld [vmem:[#allocation27 + $0x68] sm:$0xff] }
 0x343   :  { %4688 = vmatpush1.bf16.msra.mxu1 %v4687_v35 }
 0x344   :  { %4690 = vmatprep.subr.bf16.mxu1 %v4689_v40 }
 0x345   :  { %4715 = vmatpush3.bf16.msra.mxu0 %v4714_v37 }
 0x346   :  { %4716 = vmatprep.subr.bf16.mxu0 %v6005_v11 }
 0x347   :  { %4692 = vmatpush1.bf16.msra.mxu1 %v4691_v45  ;;  %v960_v45 = vld [vmem:[#allocation22 + $0x48] sm:$0xff] }
 0x348   :  { %4694 = vmatprep.subr.bf16.mxu1 %v4693_v50  ;;  %v4742_v46 = vpack.c.bf16 %v960_v45, %v959_v44  ;;  %v963_v50 = vld [vmem:[#allocation22 + $0x60] sm:$0xff] }
 0x349   :  { %4718 = vmatpush3.bf16.msra.mxu0 %v4717_v47  ;;  %v961_v47 = vld [vmem:[#allocation22 + $0x50] sm:$0xff]  ;;  %v4748_v52 = vpack.c.bf16 %v964_v51, %v963_v50  ;;  %v1157_v44 = vld [vmem:[#allocation27 + $0xd8] sm:$0xff] }
 0x34a   :  { %4719 = vmatprep.subr.bf16.mxu0 %v6005_v11  ;;  %v4745_v49 = vpack.c.bf16 %v962_v48, %v961_v47  ;;  %v1161_v47 = vld [vmem:[#allocation27 + $0xf8] sm:$0xff]  ;;  %v1166_v48 = vld [vmem:[#allocation27 + $0x120] sm:$0xff]  ;;  %v1160_v50 = vld [vmem:[#allocation27 + $0xf0] sm:$0xff] }
 0x34b   :  { %4696 = vmatpush1.bf16.msra.mxu1 %v4695_v54  ;;  %v966_v54 = vld [vmem:[#allocation22 + $0x78] sm:$0xff] }
 0x34c   :  { %4698 = vmatprep.subr.bf16.mxu1 %v4697_v59  ;;  %v4751_v55 = vpack.c.bf16 %v966_v54, %v965_v53  ;;  %v1133_v59 = vld [vmem:[#allocation27 + $0x18] sm:$0xff]  ;;  %v1168_v54 = vld [vmem:[#allocation27 + $0x130] sm:$0xff] }
 0x34d   :  { %4721 = vmatpush3.bf16.msra.mxu0 %v4720_v58  ;;  %v4777_v58 = vpack.c.bf16 %v1136_v57, %v1131_v56  ;;  %v4809_v61 = vpack.c.bf16 %v1138_v60, %v1133_v59  ;;  %v1165_v51 = vld [vmem:[#allocation27 + $0x118] sm:$0xff]  ;;  %v1167_v56 = vld [vmem:[#allocation27 + $0x128] sm:$0xff]  ;;  %v1176_v60 = vld [vmem:[#allocation27 + $0x170] sm:$0xff] }
 0x34e   :  { %4722 = vmatprep.subr.bf16.mxu0 %v6005_v11  ;;  %v4791_v53 = vpack.c.bf16 %v1165_v51, %v1160_v50  ;;  %v1171_v59 = vld [vmem:[#allocation27 + $0x148] sm:$0xff] }
 0x34f   :  { %4700 = vmatpush1.bf16.msra.mxu1 %v4699_v63 }
 0x350   :  { %4725 = vmatprep.subr.bf16.mxu1 %v6005_v11 }
 0x351   :  { %4724 = vmatpush3.bf16.msra.mxu0 %v4723_v2 }
 0x352   :  { %4729 = vmatprep.subr.bf16.mxu0 %v6005_v11 }
 0x405   :  { %v568_v3 = vpop.f32.mrb[2].mxu1 }
 0x406   :  { %v642_v4 = vmul.f32 %v568_v3, %v568_v3  ;;  %v4208_v5 = vpop.f32.mrb[3].mxu1 }
 0x407   :  { %v638_v6 = vpop.f32.mrb[2].mxu0 }
 0x408   :  { %v643_v7 = vsub.f32 %v638_v6, %v642_v4  ;;  %v4243_v8 = vpop.f32.mrb[3].mxu0 }
 0x40a   :  { %v644_v9 = vadd.f32 1e-05, %v643_v7 }
 0x40c   :  { %5476 = vrsqrt.f32 %v644_v9 }
 0x416   :  { %v5477_v15 = vpop.eup %5476 }
 0x417   :  { %v647_v16 = vmul.f32 %v5477_v15, %v646_v13  ;;  %v1141_v13 = vld [vmem:[#allocation27 + $0x58] sm:$0xff]  ;;  %v1146_v15 = vld [vmem:[#allocation27 + $0x80] sm:$0xff] }
 0x419   :  { %v649_v18 = vmul.f32 %v647_v16, %v568_v3  ;;  %v655_v19 = vrot.slane %v647_v16, %v6398_v14 }
 0x41b   :  { %v650_v20 = vsub.f32 %v648_v17, %v649_v18  ;;  %v657_v21 = vmul.f32 %v655_v19, %v6379_v41  ;;  %v955_v41 = vld [vmem:[#allocation22 + $0x20] sm:$0xff]  ;;  %v1132_v18 = vld [vmem:[#allocation27 + $0x10] sm:$0xff] }
 0x41c   :  { %v4736_v31 = vpack.c.bf16 %v956_v30, %v955_v41  ;;  %v1137_v19 = vld [vmem:[#allocation27 + $0x38] sm:$0xff]  ;;  %v1148_v41 = vld [vmem:[#allocation27 + $0x90] sm:$0xff]  ;;  %v1142_v30 = vld [vmem:[#allocation27 + $0x60] sm:$0xff] }
 0x41d   :  { %v662_v22 = vrot.slane %v650_v20, %v6398_v14  ;;  %v4779_v20 = vpack.c.bf16 %v1135_v12, %v1130_v10  ;;  %v4811_v24 = vpack.c.bf16 %v1137_v19, %v1132_v18  ;;  %v4813_v32 = vpack.c.bf16 %v1148_v41, %v1143_v28  ;;  %v1186_v10 = vld [vmem:[#allocation27 + $0x1c0] sm:$0xff]  ;;  %v1188_v18 = vld [vmem:[#allocation27 + $0x1d0] sm:$0xff]  ;;  %v1193_v28 = vld [vmem:[#allocation27 + $0x1f8] sm:$0xff] }
 0x41e   :  { %v1182_v19 = vld [vmem:[#allocation27 + $0x1a0] sm:$0xff] }
 0x41f   :  { %v664_v23 = vadd.f32 %v662_v22, %v657_v21  ;;  %v1198_v41 = vld [vmem:[#allocation27 + $0x220] sm:$0xff] }
 0x421   :  { %778 = vmatmul.mubr.f32.vlgmr.msra.gmra.mrb[4].mxu1 %v664_v23  ;;  %4277 = vmatmul.mubr.f32.vlgmr.msra.gmra.mrb[4].mxu0 %v664_v23  ;;  %v4781_v23 = vpack.c.bf16 %v1146_v15, %v1141_v13  ;;  %v1180_v13 = vld [vmem:[#allocation27 + $0x190] sm:$0xff]  ;;  %v1185_v15 = vld [vmem:[#allocation27 + $0x1b8] sm:$0xff] }
 0x422   :  { %4283 = vmatprep.mubr.msk.f32.mxu1 %vm6004_vm1, %v6003_v0  ;;  %4318 = vmatprep.mubr.msk.f32.mxu0 %vm6004_vm1, %v6003_v0 }
 0x423   :  { %4731 = vmatpush3.bf16.msra.mxu0 %v4730_v26 }
 0x424   :  { %4732 = vmatprep.subr.bf16.mxu0 %v6005_v11 }
 0x427   :  { %4734 = vmatpush3.bf16.msra.mxu0 %v4733_v29 }
 0x428   :  { %4735 = vmatprep.subr.bf16.mxu0 %v6005_v11 }
 0x42b   :  { %4737 = vmatpush3.bf16.msra.mxu0 %v4736_v31 }
 0x42c   :  { %4738 = vmatprep.subr.bf16.mxu0 %v6005_v11 }
 0x42f   :  { %4740 = vmatpush3.bf16.msra.mxu0 %v4739_v34 }
 0x430   :  { %4741 = vmatprep.subr.bf16.mxu0 %v6005_v11 }
 0x433   :  { %4743 = vmatpush3.bf16.msra.mxu0 %v4742_v46 }
 0x434   :  { %4744 = vmatprep.subr.bf16.mxu0 %v6005_v11 }
 0x437   :  { %4746 = vmatpush3.bf16.msra.mxu0 %v4745_v49 }
 0x438   :  { %4747 = vmatprep.subr.bf16.mxu0 %v6005_v11 }
 0x43b   :  { %4749 = vmatpush3.bf16.msra.mxu0 %v4748_v52 }
 0x43c   :  { %4750 = vmatprep.subr.bf16.mxu0 %v6005_v11 }
 0x43f   :  { %4752 = vmatpush3.bf16.msra.mxu0 %v4751_v55 }
 0x440   :  { %4778 = vmatprep.subr.bf16.mxu0 %v4777_v58 }
 0x4f4   :  { %v779_v35 = vpop.f32.mrb[4].mxu1  ;;  %v850_v36 = vpop.f32.mrb[4].mxu0 }
 0x4f5   :  { %854 = vst [vmem:[#allocation3] sm:$0xf] %v779_v35  ;;  %856 = vst [vmem:[#allocation3 + $0x8] sm:$0xf] %v850_v36  ;;  %v781_v37 = vpop.f32.mrb[5].mxu1  ;;  %v4278_v38 = vpop.f32.mrb[5].mxu0 }
 0x4f6   :  { %855 = vst [vmem:[#allocation3 + $0x4] sm:$0xf] %v781_v37  ;;  %v1156_v35 = vld [vmem:[#allocation27 + $0xd0] sm:$0xff]  ;;  %v1150_v37 = vld [vmem:[#allocation27 + $0xa0] sm:$0xff]  ;;  %v1155_v38 = vld [vmem:[#allocation27 + $0xc8] sm:$0xff] }
 0x4fc   :  { %v859_v39 = vld [vmem:[#allocation3 + $0x8] sm:$0xf] }
 0x4fd   :  { %v858_v40 = vld [vmem:[#allocation3] sm:$0xff] }
 0x4fe   :  { %v4726_v42 = vpack.c.bf16 %v859_v39, %v858_v40  ;;  %v1153_v39 = vld [vmem:[#allocation27 + $0xb8] sm:$0xff]  ;;  %v4787_v40 = vpack.c.bf16 %v1155_v38, %v1150_v37 }
 0x4ff   :  { %v1205_v38 = vld [vmem:[#allocation27 + $0x258] sm:$0xff] }
 0x500   :  { %4728 = vmatpush3.bf16.msk.msra.mxu1 %vm4727_vm5, %v4726_v42  ;;  %v1158_v42 = vld [vmem:[#allocation27 + $0xe0] sm:$0xff] }
 0x501   :  { %4753 = vmatprep.subr.bf16.mxu1 %v6005_v11  ;;  %v4817_v45 = vpack.c.bf16 %v1158_v42, %v1153_v39  ;;  %v1203_v39 = vld [vmem:[#allocation27 + $0x248] sm:$0xff] }
 0x503   :  { %4284 = vmatmul.mubr.msk.f32.vlgmr.msra.gmra.mrb[6].mxu1 %vm860_vm6, %v857_v43  ;;  %v1152_v43 = vld [vmem:[#allocation27 + $0xb0] sm:$0xff] }
 0x504   :  { %4755 = vmatpush3.bf16.msra.mxu1 %v4730_v26  ;;  %4353 = vmatprep.mubr.msk.f32.mxu1 %vm6004_vm1, %v6003_v0  ;;  %v1140_v26 = vld [vmem:[#allocation27 + $0x50] sm:$0xff] }
 0x505   :  { %4756 = vmatprep.subr.bf16.mxu1 %v6005_v11 }
 0x508   :  { %4758 = vmatpush3.bf16.msra.mxu1 %v4733_v29  ;;  %v4783_v29 = vpack.c.bf16 %v1145_v27, %v1140_v26  ;;  %v1190_v26 = vld [vmem:[#allocation27 + $0x1e0] sm:$0xff]  ;;  %v1195_v27 = vld [vmem:[#allocation27 + $0x208] sm:$0xff] }
 0x509   :  { %4759 = vmatprep.subr.bf16.mxu1 %v6005_v11 }
 0x50c   :  { %4761 = vmatpush3.bf16.msra.mxu1 %v4736_v31  ;;  %v1147_v31 = vld [vmem:[#allocation27 + $0x88] sm:$0xff] }
 0x50d   :  { %4762 = vmatprep.subr.bf16.mxu1 %v6005_v11  ;;  %v4815_v33 = vpack.c.bf16 %v1147_v31, %v1142_v30  ;;  %v1192_v30 = vld [vmem:[#allocation27 + $0x1f0] sm:$0xff]  ;;  %v1197_v31 = vld [vmem:[#allocation27 + $0x218] sm:$0xff] }
 0x510   :  { %4764 = vmatpush3.bf16.msra.mxu1 %v4739_v34  ;;  %v1151_v34 = vld [vmem:[#allocation27 + $0xa8] sm:$0xff] }
 0x511   :  { %4765 = vmatprep.subr.bf16.mxu1 %v6005_v11  ;;  %v4785_v36 = vpack.c.bf16 %v1156_v35, %v1151_v34  ;;  %v1201_v34 = vld [vmem:[#allocation27 + $0x238] sm:$0xff]  ;;  %v1206_v35 = vld [vmem:[#allocation27 + $0x260] sm:$0xff] }
 0x512   :  { %v4805_v37 = vpack.c.bf16 %v1206_v35, %v1201_v34  ;;  %v1539_v34 = vld [vmem:[#allocation30 + $0x28] sm:$0xff] }
 0x514   :  { %4767 = vmatpush3.bf16.msra.mxu1 %v4742_v46  ;;  %v4819_v46 = vpack.c.bf16 %v1157_v44, %v1152_v43  ;;  %v1202_v44 = vld [vmem:[#allocation27 + $0x240] sm:$0xff] }
 0x515   :  { %4768 = vmatprep.subr.bf16.mxu1 %v6005_v11 }
 0x518   :  { %4770 = vmatpush3.bf16.msra.mxu1 %v4745_v49  ;;  %v4789_v49 = vpack.c.bf16 %v1166_v48, %v1161_v47 }
 0x519   :  { %4771 = vmatprep.subr.bf16.mxu1 %v6005_v11 }
 0x51c   :  { %4773 = vmatpush3.bf16.msra.mxu1 %v4748_v52  ;;  %v1163_v52 = vld [vmem:[#allocation27 + $0x108] sm:$0xff] }
 0x51d   :  { %4774 = vmatprep.subr.bf16.mxu1 %v6005_v11  ;;  %v4821_v57 = vpack.c.bf16 %v1168_v54, %v1163_v52  ;;  %v1111_v54 = vld [vmem:[#allocation24] sm:$0x1] }
 0x520   :  { %4776 = vmatpush3.bf16.msra.mxu1 %v4751_v55  ;;  %v1162_v55 = vld [vmem:[#allocation27 + $0x100] sm:$0xff] }
 0x521   :  { %4810 = vmatprep.subr.bf16.mxu1 %v4809_v61  ;;  %v4823_v58 = vpack.c.bf16 %v1167_v56, %v1162_v55  ;;  %v4793_v61 = vpack.c.bf16 %v1176_v60, %v1171_v59 }
 0x5d6   :  { %v933_v62 = vpop.f32.mrb[6].mxu1 }
 0x5d7   :  { %v6425_v63 = vmax.f32 %v933_v62, 0.0  ;;  %v4285_v1 = vpop.f32.mrb[7].mxu1  ;;  %v1170_v62 = vld [vmem:[#allocation27 + $0x140] sm:$0xff] }
 0x5d8   :  { %v1175_v1 = vld [vmem:[#allocation27 + $0x168] sm:$0xff] }
 0x5d9   :  { %v938_v2 = vrot.slane %v6425_v63, 4  ;;  %v944_v3 = vmul.f32 %v6425_v63, %v6425_v63 }
 0x5db   :  { %v939_v4 = vadd.f32 %v938_v2, %v6425_v63  ;;  %v945_v5 = vrot.slane %v944_v3, 4  ;;  %v1173_v2 = vld [vmem:[#allocation27 + $0x158] sm:$0xff] }
 0x5dd   :  { %v940_v6 = vrot.slane %v939_v4, 2  ;;  %v946_v7 = vadd.f32 %v945_v5, %v944_v3  ;;  %v4795_v3 = vpack.c.bf16 %v1175_v1, %v1170_v62  ;;  %v1172_v5 = vld [vmem:[#allocation27 + $0x150] sm:$0xff]  ;;  %v1139_v62 = vld [vmem:[#allocation27 + $0x48] sm:$0xff] }
 0x5df   :  { %v941_v8 = vadd.f32 %v940_v6, %v939_v4  ;;  %v947_v9 = vrot.slane %v946_v7, 2  ;;  %v1178_v4 = vld [vmem:[#allocation27 + $0x180] sm:$0xff]  ;;  %v1177_v6 = vld [vmem:[#allocation27 + $0x178] sm:$0xff] }
 0x5e1   :  { %v942_v16 = vrot.slane %v941_v8, 1  ;;  %v948_v17 = vadd.f32 %v947_v9, %v946_v7  ;;  %v4825_v7 = vpack.c.bf16 %v1178_v4, %v1173_v2  ;;  %v1181_v9 = vld [vmem:[#allocation27 + $0x198] sm:$0xff] }
 0x5e2   :  { %v4797_v12 = vpack.c.bf16 %v1186_v10, %v1181_v9  ;;  %v1159_v9 = vld [vmem:[#allocation27 + $0xe8] sm:$0xff]  ;;  %v1164_v10 = vld [vmem:[#allocation27 + $0x110] sm:$0xff] }
 0x5e3   :  { %v943_v21 = vadd.f32 %v942_v16, %v941_v8  ;;  %v949_v22 = vrot.slane %v948_v17, 1  ;;  %v4827_v8 = vpack.c.bf16 %v1177_v6, %v1172_v5  ;;  %v1183_v16 = vld [vmem:[#allocation27 + $0x1a8] sm:$0xff]  ;;  %v1144_v5 = vld [vmem:[#allocation27 + $0x70] sm:$0xff]  ;;  %v1149_v6 = vld [vmem:[#allocation27 + $0x98] sm:$0xff] }
 0x5e5   :  { %4319 = vmatmul.mubr.f32.vlgmr.msra.gmra.mrb[6].mxu0 %v943_v21  ;;  %v950_v25 = vadd.f32 %v949_v22, %v948_v17  ;;  %v4799_v17 = vpack.c.bf16 %v1185_v15, %v1180_v13  ;;  %v4829_v21 = vpack.c.bf16 %v1188_v18, %v1183_v16  ;;  %v1174_v15 = vld [vmem:[#allocation27 + $0x160] sm:$0xff]  ;;  %v1179_v16 = vld [vmem:[#allocation27 + $0x188] sm:$0xff]  ;;  %v1184_v18 = vld [vmem:[#allocation27 + $0x1b0] sm:$0xff] }
 0x5e6   :  { %4780 = vmatpush1.bf16.msra.mxu0 %v4779_v20  ;;  %1274 = vmatprep.mubr.f32.mxu0 %v6003_v0  ;;  %v1187_v20 = vld [vmem:[#allocation27 + $0x1c8] sm:$0xff] }
 0x5e7   :  { %4354 = vmatmul.mubr.f32.vlgmr.msra.gmra.mrb[8].mxu1 %v950_v25  ;;  %4782 = vmatprep.subr.bf16.mxu0 %v4781_v23  ;;  %v4831_v22 = vpack.c.bf16 %v1187_v20, %v1182_v19  ;;  %v1191_v23 = vld [vmem:[#allocation27 + $0x1e8] sm:$0xff]  ;;  %v1189_v19 = vld [vmem:[#allocation27 + $0x1d8] sm:$0xff] }
 0x5e8   :  { %4812 = vmatpush1.bf16.msra.mxu1 %v4811_v24  ;;  %1345 = vmatprep.mubr.f32.mxu1 %v6003_v0  ;;  %v1196_v24 = vld [vmem:[#allocation27 + $0x210] sm:$0xff]  ;;  %v4857_v20 = vpack.c.bf16 %v1189_v19, %v1184_v18 }
 0x5e9   :  { %4814 = vmatprep.subr.bf16.mxu1 %v4813_v32  ;;  %v4801_v25 = vpack.c.bf16 %v1196_v24, %v1191_v23  ;;  %v4833_v32 = vpack.c.bf16 %v1198_v41, %v1193_v28  ;;  %v1204_v24 = vld [vmem:[#allocation27 + $0x250] sm:$0xff] }
 0x5ea   :  { %4784 = vmatpush1.bf16.msra.mxu0 %v4783_v29  ;;  %v4803_v29 = vpack.c.bf16 %v1195_v27, %v1190_v26  ;;  %v1427_v27 = vld [vmem:[#allocation28] sm:$0xff]  ;;  %v1534_v28 = vld [vmem:[#allocation30] sm:$0xff] }
 0x5eb   :  { %4786 = vmatprep.subr.bf16.mxu0 %v4785_v36  ;;  %v1200_v36 = vld [vmem:[#allocation27 + $0x230] sm:$0xff] }
 0x5ec   :  { %4816 = vmatpush1.bf16.msra.mxu1 %v4815_v33  ;;  %v4835_v33 = vpack.c.bf16 %v1197_v31, %v1192_v30  ;;  %v4807_v42 = vpack.c.bf16 %v1205_v38, %v1200_v36  ;;  %v1536_v30 = vld [vmem:[#allocation30 + $0x10] sm:$0xff]  ;;  %v1537_v31 = vld [vmem:[#allocation30 + $0x18] sm:$0xff] }
 0x5ed   :  { %4818 = vmatprep.subr.bf16.mxu1 %v4817_v45  ;;  %v1207_v45 = vld [vmem:[#allocation27 + $0x268] sm:$0xff]  ;;  %v1540_v36 = vld [vmem:[#allocation30 + $0x30] sm:$0xff] }
 0x5ee   :  { %4788 = vmatpush1.bf16.msra.mxu0 %v4787_v40  ;;  %v1208_v40 = vld [vmem:[#allocation27 + $0x270] sm:$0xff] }
 0x5ef   :  { %4790 = vmatprep.subr.bf16.mxu0 %v4789_v49  ;;  %v4837_v43 = vpack.c.bf16 %v1208_v40, %v1203_v39 }
 0x5f0   :  { %4820 = vmatpush1.bf16.msra.mxu1 %v4819_v46  ;;  %v4839_v46 = vpack.c.bf16 %v1207_v45, %v1202_v44 }
 0x5f1   :  { %4822 = vmatprep.subr.bf16.mxu1 %v4821_v57  ;;  %v1113_v57 = vld [vmem:[#allocation25] sm:$0x1] }
 0x5f2   :  { %4792 = vmatpush1.bf16.msra.mxu0 %v4791_v53 }
 0x5f3   :  { %4794 = vmatprep.subr.bf16.mxu0 %v4793_v61  ;;  %v1134_v61 = vld [vmem:[#allocation27 + $0x20] sm:$0xff] }
 0x5f4   :  { %4824 = vmatpush1.bf16.msra.mxu1 %v4823_v58 }
 0x5f5   :  { %4826 = vmatprep.subr.bf16.mxu1 %v4825_v7  ;;  %v4845_v7 = vpack.c.bf16 %v1149_v6, %v1144_v5 }
 0x5f6   :  { %4796 = vmatpush1.bf16.msra.mxu0 %v4795_v3  ;;  %v4842_v3 = vpack.c.bf16 %v1139_v62, %v1134_v61 }
 0x5f7   :  { %4798 = vmatprep.subr.bf16.mxu0 %v4797_v12  ;;  %v1169_v12 = vld [vmem:[#allocation27 + $0x138] sm:$0xff] }
 0x5f8   :  { %4828 = vmatpush1.bf16.msra.mxu1 %v4827_v8  ;;  %v1154_v8 = vld [vmem:[#allocation27 + $0xc0] sm:$0xff]  ;;  %v4851_v13 = vpack.c.bf16 %v1169_v12, %v1164_v10 }
 0x5f9   :  { %4830 = vmatprep.subr.bf16.mxu1 %v4829_v21  ;;  %v1194_v21 = vld [vmem:[#allocation27 + $0x200] sm:$0xff] }
 0x5fa   :  { %4800 = vmatpush1.bf16.msra.mxu0 %v4799_v17  ;;  %v4854_v17 = vpack.c.bf16 %v1179_v16, %v1174_v15 }
 0x5fb   :  { %4802 = vmatprep.subr.bf16.mxu0 %v4801_v25  ;;  %v1209_v25 = vld [vmem:[#allocation27 + $0x278] sm:$0xff] }
 0x5fc   :  { %4832 = vmatpush1.bf16.msra.mxu1 %v4831_v22  ;;  %v1199_v22 = vld [vmem:[#allocation27 + $0x228] sm:$0xff]  ;;  %v4863_v26 = vpack.c.bf16 %v1209_v25, %v1204_v24 }
 0x5fd   :  { %4834 = vmatprep.subr.bf16.mxu1 %v4833_v32  ;;  %v4860_v23 = vpack.c.bf16 %v1199_v22, %v1194_v21  ;;  %v4877_v32 = vpack.c.bf16 %v1537_v31, %v1536_v30 }
 0x5fe   :  { %4804 = vmatpush1.bf16.msra.mxu0 %v4803_v29  ;;  %v1535_v29 = vld [vmem:[#allocation30 + $0x8] sm:$0xff] }
 0x5ff   :  { %4806 = vmatprep.subr.bf16.mxu0 %v4805_v37  ;;  %v4874_v41 = vpack.c.bf16 %v1535_v29, %v1534_v28  ;;  %v1541_v37 = vld [vmem:[#allocation30 + $0x38] sm:$0xff] }
 0x600   :  { %4836 = vmatpush1.bf16.msra.mxu1 %v4835_v33  ;;  %v1538_v33 = vld [vmem:[#allocation30 + $0x20] sm:$0xff]  ;;  %v4883_v38 = vpack.c.bf16 %v1541_v37, %v1540_v36 }
 0x601   :  { %4838 = vmatprep.subr.bf16.mxu1 %v4837_v43  ;;  %v4880_v35 = vpack.c.bf16 %v1539_v34, %v1538_v33 }
 0x602   :  { %4808 = vmatpush1.bf16.msra.mxu0 %v4807_v42 }
 0x603   :  { %4841 = vmatprep.subr.bf16.mxu0 %v6005_v11 }
 0x604   :  { %4840 = vmatpush1.bf16.msra.mxu1 %v4839_v46 }
 0x605   :  { %4873 = vmatprep.subr.bf16.mxu1 %v6005_v11 }
 0x6b8   :  { %v1033_v47 = vpop.f32.mrb[6].mxu0 }
 0x6b9   :  { %v1107_v48 = vmul.f32 %v1033_v47, %v1033_v47  ;;  %v4320_v49 = vpop.f32.mrb[7].mxu0 }
 0x6ba   :  { %v1103_v50 = vpop.f32.mrb[8].mxu1  ;;  %v1542_v49 = vld [vmem:[#allocation30 + $0x40] sm:$0xff] }
 0x6bb   :  { %v1108_v51 = vsub.f32 %v1103_v50, %v1107_v48  ;;  %v4355_v52 = vpop.f32.mrb[9].mxu1  ;;  %v1543_v50 = vld [vmem:[#allocation30 + $0x48] sm:$0xff] }
 0x6bc   :  { %v1544_v52 = vld [vmem:[#allocation30 + $0x50] sm:$0xff] }
 0x6bd   :  { %v1109_v53 = vadd.f32 1e-05, %v1108_v51  ;;  %v4886_v51 = vpack.c.bf16 %v1543_v50, %v1542_v49 }
 0x6bf   :  { %5478 = vrsqrt.f32 %v1109_v53  ;;  %v1545_v53 = vld [vmem:[#allocation30 + $0x58] sm:$0xff] }
 0x6c9   :  { %v5479_v55 = vpop.eup %5478 }
 0x6ca   :  { %v1112_v56 = vmul.f32 %v5479_v55, %v1111_v54  ;;  %v4889_v54 = vpack.c.bf16 %v1545_v53, %v1544_v52  ;;  %v1546_v55 = vld [vmem:[#allocation30 + $0x60] sm:$0xff] }
 0x6cc   :  { %v1114_v58 = vmul.f32 %v1112_v56, %v1033_v47  ;;  %v1120_v59 = vrot.slane %v1112_v56, %v6398_v14  ;;  %v1428_v47 = vld [vmem:[#allocation28 + $0x8] sm:$0xff]  ;;  %v1547_v56 = vld [vmem:[#allocation30 + $0x68] sm:$0xff] }
 0x6ce   :  { %v1115_v60 = vsub.f32 %v1113_v57, %v1114_v58  ;;  %v1122_v1 = vmul.f32 %v1120_v59, %v6425_v63  ;;  %v4848_v63 = vpack.c.bf16 %v1159_v9, %v1154_v8  ;;  %v4892_v57 = vpack.c.bf16 %v1547_v56, %v1546_v55  ;;  %v1548_v58 = vld [vmem:[#allocation30 + $0x70] sm:$0xff]  ;;  %v1549_v59 = vld [vmem:[#allocation30 + $0x78] sm:$0xff] }
 0x6d0   :  { %v1127_v2 = vrot.slane %v1115_v60, %v6398_v14  ;;  %v4895_v60 = vpack.c.bf16 %v1549_v59, %v1548_v58 }
 0x6d2   :  { %v1129_v4 = vadd.f32 %v1127_v2, %v1122_v1 }
 0x6d4   :  { %1275 = vmatmul.mubr.f32.vlgmr.msra.gmra.mrb[8].mxu0 %v1129_v4  ;;  %1346 = vmatmul.mubr.f32.vlgmr.msra.gmra.mrb[10].mxu1 %v1129_v4 }
 0x6d5   :  { %4843 = vmatpush3.bf16.msra.mxu0 %v4842_v3  ;;  %4388 = vmatprep.mubr.msk.f32.mxu0 %vm6004_vm1, %v6003_v0 }
 0x6d6   :  { %4844 = vmatprep.subr.bf16.mxu0 %v6005_v11  ;;  %4436 = vmatprep.mubr.msk.f32.mxu1 %vm6004_vm1, %v6003_v0 }
 0x6d7   :  { %4875 = vmatpush3.bf16.msra.mxu1 %v4874_v41 }
 0x6d8   :  { %4876 = vmatprep.subr.bf16.mxu1 %v6005_v11 }
 0x6d9   :  { %4846 = vmatpush3.bf16.msra.mxu0 %v4845_v7 }
 0x6da   :  { %4847 = vmatprep.subr.bf16.mxu0 %v6005_v11 }
 0x6db   :  { %4878 = vmatpush3.bf16.msra.mxu1 %v4877_v32 }
 0x6dc   :  { %4879 = vmatprep.subr.bf16.mxu1 %v6005_v11 }
 0x6dd   :  { %4849 = vmatpush3.bf16.msra.mxu0 %v4848_v63 }
 0x6de   :  { %4850 = vmatprep.subr.bf16.mxu0 %v6005_v11 }
 0x6df   :  { %4881 = vmatpush3.bf16.msra.mxu1 %v4880_v35 }
 0x6e0   :  { %4882 = vmatprep.subr.bf16.mxu1 %v6005_v11 }
 0x6e1   :  { %4852 = vmatpush3.bf16.msra.mxu0 %v4851_v13 }
 0x6e2   :  { %4853 = vmatprep.subr.bf16.mxu0 %v6005_v11 }
 0x6e3   :  { %4884 = vmatpush3.bf16.msra.mxu1 %v4883_v38 }
 0x6e4   :  { %4885 = vmatprep.subr.bf16.mxu1 %v6005_v11 }
 0x6e5   :  { %4855 = vmatpush3.bf16.msra.mxu0 %v4854_v17 }
 0x6e6   :  { %4856 = vmatprep.subr.bf16.mxu0 %v6005_v11 }
 0x6e7   :  { %4887 = vmatpush3.bf16.msra.mxu1 %v4886_v51 }
 0x6e8   :  { %4888 = vmatprep.subr.bf16.mxu1 %v6005_v11 }
 0x6e9   :  { %4858 = vmatpush3.bf16.msra.mxu0 %v4857_v20 }
 0x6ea   :  { %4859 = vmatprep.subr.bf16.mxu0 %v6005_v11 }
 0x6eb   :  { %4890 = vmatpush3.bf16.msra.mxu1 %v4889_v54 }
 0x6ec   :  { %4891 = vmatprep.subr.bf16.mxu1 %v6005_v11 }
 0x6ed   :  { %4861 = vmatpush3.bf16.msra.mxu0 %v4860_v23 }
 0x6ee   :  { %4862 = vmatprep.subr.bf16.mxu0 %v6005_v11 }
 0x6ef   :  { %4893 = vmatpush3.bf16.msra.mxu1 %v4892_v57 }
 0x6f0   :  { %4894 = vmatprep.subr.bf16.mxu1 %v6005_v11 }
 0x6f1   :  { %4864 = vmatpush3.bf16.msra.mxu0 %v4863_v26 }
 0x6f3   :  { %4896 = vmatpush3.bf16.msra.mxu1 %v4895_v60 }
 0x6f4   :  { %4389 = vmatmul.mubr.f32.vlgmr.msra.gmra.mrb[10].mxu0 %v1129_v4 }
 0x6f5   :  { %4401 = vmatprep.mubr.msk.f32.mxu0 %vm1434_vm7, %v1427_v27 }
 0x7a7   :  { %v1276_v39 = vpop.f32.mrb[8].mxu0  ;;  %v1347_v40 = vpop.f32.mrb[10].mxu1 }
 0x7a8   :  { %v1278_v42 = vpop.f32.mrb[9].mxu0  ;;  %v1349_v43 = vpop.f32.mrb[11].mxu1 }
 0x7a9   :  { %v4865_v44 = vpack.c.bf16 %v1278_v42, %v1276_v39  ;;  %v4869_v45 = vpack.c.bf16 %v1349_v43, %v1347_v40 }
 0x7ab   :  { %4866 = vmatprep.subr.bf16.mxu0 %v4865_v44 }
 0x7ac   :  { %4868 = vmatpush3.bf16.msra.mxu0 %v4865_v44 }
 0x7ad   :  { %4870 = vmatprep.subr.bf16.mxu0 %v4869_v45 }
 0x7b0   :  { %4872 = vmatpush3.bf16.msra.mxu0 %v4869_v45 }
 0x7c7   :  { %v1418_v46 = vpop.f32.mrb[10].mxu0 }
 0x7c8   :  { %v4390_v48 = vpop.f32.mrb[11].mxu0  ;;  %4399 = vmatprep.subr.mxu0 %v1418_v46 }
 0x7c9   :  { %4400 = vmatpush3.msra.mxu0 %v1418_v46 }
 0x7ca   :  { %4402 = vmatmul.mubr.msk.f32.vlgmr.msra.gmra.mrb[12].mxu0 %vm1434_vm7, %v1428_v47  ;;  %4897 = vmatprep.subr.bf16.mxu0 %v6005_v11 }
 0x7cb   :  { %4899 = vmatpush3.bf16.msra.mxu0 %v4874_v41  ;;  %4471 = vmatprep.mubr.msk.f32.mxu0 %vm6004_vm1, %v6003_v0 }
 0x7cc   :  { %4900 = vmatprep.subr.bf16.mxu0 %v6005_v11 }
 0x7cf   :  { %4902 = vmatpush3.bf16.msra.mxu0 %v4877_v32 }
 0x7d0   :  { %4903 = vmatprep.subr.bf16.mxu0 %v6005_v11 }
 0x7d3   :  { %4905 = vmatpush3.bf16.msra.mxu0 %v4880_v35 }
 0x7d4   :  { %4906 = vmatprep.subr.bf16.mxu0 %v6005_v11 }
 0x7d7   :  { %4908 = vmatpush3.bf16.msra.mxu0 %v4883_v38 }
 0x7d8   :  { %4909 = vmatprep.subr.bf16.mxu0 %v6005_v11 }
 0x7db   :  { %4911 = vmatpush3.bf16.msra.mxu0 %v4886_v51 }
 0x7dc   :  { %4912 = vmatprep.subr.bf16.mxu0 %v6005_v11 }
 0x7df   :  { %4914 = vmatpush3.bf16.msra.mxu0 %v4889_v54 }
 0x7e0   :  { %4915 = vmatprep.subr.bf16.mxu0 %v6005_v11 }
 0x7e3   :  { %4917 = vmatpush3.bf16.msra.mxu0 %v4892_v57 }
 0x7e4   :  { %4918 = vmatprep.subr.bf16.mxu0 %v6005_v11 }
 0x7e7   :  { %4920 = vmatpush3.bf16.msra.mxu0 %v4895_v60 }
 0x89d   :  { %v4403_v61 = vpop.f32.mrb[12].mxu0 }
 0x89e   :  { %v6468_v62 = vmax.f32 %v4403_v61, 0.0  ;;  %v1507_v1 = vpop.f32.mrb[13].mxu0 }
 0x89f   :  { %v6470_v2 = vmax.f32 %v1507_v1, 0.0 }
 0x8a0   :  { %v1526_v3 = vmul.f32 %v6468_v62, %v6468_v62 }
 0x8a1   :  { %v1518_v4 = vadd.f32 %v6468_v62, %v6470_v2  ;;  %v1525_v5 = vmul.f32 %v6470_v2, %v6470_v2 }
 0x8a3   :  { %v1519_v6 = vrot.slane %v1518_v4, 4  ;;  %v1527_v7 = vadd.f32 %v1526_v3, %v1525_v5 }
 0x8a5   :  { %v1520_v8 = vadd.f32 %v1519_v6, %v1518_v4  ;;  %v1528_v9 = vrot.slane %v1527_v7, 4 }
 0x8a7   :  { %v1521_v63 = vrot.slane %v1520_v8, 2  ;;  %v1529_v10 = vadd.f32 %v1528_v9, %v1527_v7 }
 0x8a9   :  { %v1522_v12 = vadd.f32 %v1521_v63, %v1520_v8  ;;  %v1530_v13 = vrot.slane %v1529_v10, 2 }
 0x8ab   :  { %v1523_v15 = vrot.slane %v1522_v12, 1  ;;  %v1531_v16 = vadd.f32 %v1530_v13, %v1529_v10 }
 0x8ad   :  { %v1524_v17 = vadd.f32 %v1523_v15, %v1522_v12  ;;  %v1532_v18 = vrot.slane %v1531_v16, 1 }
 0x8af   :  { %4437 = vmatmul.mubr.f32.vlgmr.msra.gmra.mrb[12].mxu1 %v1524_v17  ;;  %v1533_v19 = vadd.f32 %v1532_v18, %v1531_v16 }
 0x8b1   :  { %4472 = vmatmul.mubr.f32.vlgmr.msra.gmra.mrb[14].mxu0 %v1533_v19 }
 0x8b2   :  { %5895 = shalt.err (!%p5892_p12)  }
 0x8b3   :  { %s5896_s1 = scalar_lea.vmem %s293_s28, 18432  ;;  %p5901_p0 = scmp.lt.s32.totalorder %s293_s28, %s293_s28 }
 0x8b4   :  { %p5897_p13 = scmp.ne.s32.totalorder %s293_s28, %s5896_s1  ;;  %p5902_p1 = scmp.lt.s32.totalorder %s5896_s1, %s5896_s1 }
 0x8b6   :  { %p5903_p2 = por %p5902_p1, %p5901_p0 }
 0x8b8   :  { %p5904_p3 = pnand %p5903_p2, %p5897_p13 }
 0x8ba   :  { %5907 = shalt.err (!%p5904_p3)  }
 0x8bb   :  { %295 = dma.hbm_to_vmem [thread:$0]  %s6701_s16, 18432, %s293_s28, [#allocation9] }
 0x8bc   :  { %s5908_s26 = scalar_lea.hbm %s6706_s21, 26624 }
 0x8bd   :  { %p5909_p4 = scmp.ne.s32.totalorder %s6706_s21, %s5908_s26  ;;  %p5912_p5 = scmp.lt.u32.totalorder %s5908_s26, %s6706_s21 }
 0x8bf   :  { %p5914_p6 = pnand %p5912_p5, %p5909_p4 }
 0x8c1   :  { %5917 = shalt.err (!%p5914_p6)  }
 0x8c2   :  { %s5918_s12 = scalar_lea.vmem %s305_s9, 26624  ;;  %p5923_p8 = scmp.lt.s32.totalorder %s305_s9, %s305_s9 }
 0x8c3   :  { %p5919_p7 = scmp.ne.s32.totalorder %s305_s9, %s5918_s12  ;;  %p5924_p9 = scmp.lt.s32.totalorder %s5918_s12, %s5918_s12 }
 0x8c5   :  { %p5925_p10 = por %p5924_p9, %p5923_p8 }
 0x8c7   :  { %p5926_p11 = pnand %p5925_p10, %p5919_p7 }
 0x8c9   :  { %5929 = shalt.err (!%p5926_p11)  }
 0x8ca   :  { %307 = dma.hbm_to_vmem [thread:$0]  %s6706_s21, 26624, %s305_s9, [#allocation9 + $0x1]  ;;  %v1694_v27 = vld [vmem:[#allocation31] sm:$0x1]  ;;  %v1696_v41 = vld [vmem:[#allocation33] sm:$0x1] }
 0x982   :  { %v1616_v20 = vpop.f32.mrb[12].mxu1 }
 0x983   :  { %v1690_v21 = vmul.f32 %v1616_v20, %v1616_v20  ;;  %v4438_v22 = vpop.f32.mrb[13].mxu1 }
 0x984   :  { %v1686_v23 = vpop.f32.mrb[14].mxu0 }
 0x985   :  { %v1691_v24 = vsub.f32 %v1686_v23, %v1690_v21  ;;  %v4473_v25 = vpop.f32.mrb[15].mxu0 }
 0x987   :  { %v1692_v26 = vadd.f32 1e-05, %v1691_v24 }
 0x989   :  { %5480 = vrsqrt.f32 %v1692_v26 }
 0x993   :  { %v5481_v28 = vpop.eup %5480 }
 0x994   :  { %v1695_v29 = vmul.f32 %v5481_v28, %v1694_v27 }
 0x996   :  { %v1697_v30 = vmul.f32 %v1695_v29, %v1616_v20  ;;  %v1703_v31 = vrot.slane %v1695_v29, %v6398_v14 }
 0x998   :  { %v1698_v32 = vsub.f32 %v1696_v41, %v1697_v30  ;;  %v1705_v33 = vmul.f32 %v1703_v31, %v6470_v2  ;;  %v1706_v34 = vmul.f32 %v1703_v31, %v6468_v62 }
 0x99a   :  { %v1711_v35 = vrot.slane %v1698_v32, %v6398_v14 }
 0x99c   :  { %v6506_v36 = vadd.f32 %v1711_v35, %v1705_v33  ;;  %v6508_v37 = vadd.f32 %v1711_v35, %v1706_v34 }
 0x99d   :  { %5970 = dma.done.wait [#allocation9], 18432 }
 0x99e   :  { %5971 = vsyncadd [#allocation9], 4294948864  ;;  %1927 = vmatprep.mubr.f32.mxu1 %v6003_v0  ;;  %2004 = vmatprep.mubr.f32.mxu0 %v6003_v0  ;;  %v1720_v38 = vld [vmem:[#allocation7 + $0x8] sm:$0xff]  ;;  %v1729_v39 = vld [vmem:[#allocation7 + $0x50] sm:$0xff]  ;;  %s6736_s25 = sld [smem:[#allocation64_spill]]  ;;  %s6737_s26 = sld [smem:[#allocation65_spill]] }
 0x99f   :  { %v1719_v40 = vld [vmem:[#allocation7] sm:$0xff]  ;;  %v4921_v42 = vpack.c.bf16 %v1729_v39, %v1720_v38  ;;  %v1728_v43 = vld [vmem:[#allocation7 + $0x48] sm:$0xff]  ;;  %v1738_v44 = vld [vmem:[#allocation7 + $0x98] sm:$0xff] }
 0x9a0   :  { %v1747_v45 = vld [vmem:[#allocation7 + $0xe0] sm:$0xff]  ;;  %v4923_v46 = vpack.c.bf16 %v1728_v43, %v1719_v40  ;;  %v1737_v48 = vld [vmem:[#allocation7 + $0x90] sm:$0xff]  ;;  %v1746_v49 = vld [vmem:[#allocation7 + $0xd8] sm:$0xff] }
 0x9a1   :  { %v4925_v47 = vpack.c.bf16 %v1747_v45, %v1738_v44  ;;  %v1756_v50 = vld [vmem:[#allocation7 + $0x128] sm:$0xff]  ;;  %4922 = vmatprep.subr.bf16.mxu1 %v4921_v42  ;;  %v1765_v51 = vld [vmem:[#allocation7 + $0x170] sm:$0xff]  ;;  %v4927_v52 = vpack.c.bf16 %v1746_v49, %v1737_v48  ;;  %v1755_v53 = vld [vmem:[#allocation7 + $0x120] sm:$0xff] }
 0x9a2   :  { %4924 = vmatpush1.bf16.msra.mxu1 %v4923_v46  ;;  %v1764_v54 = vld [vmem:[#allocation7 + $0x168] sm:$0xff]  ;;  %v4929_v55 = vpack.c.bf16 %v1765_v51, %v1756_v50  ;;  %v1774_v56 = vld [vmem:[#allocation7 + $0x1b8] sm:$0xff]  ;;  %v1731_v58 = vld [vmem:[#allocation7 + $0x60] sm:$0xff] }
 0x9a3   :  { %4926 = vmatprep.subr.bf16.mxu1 %v4925_v47  ;;  %v1722_v57 = vld [vmem:[#allocation7 + $0x18] sm:$0xff]  ;;  %v1783_v59 = vld [vmem:[#allocation7 + $0x200] sm:$0xff]  ;;  %v1721_v61 = vld [vmem:[#allocation7 + $0x10] sm:$0xff]  ;;  %v4931_v2 = vpack.c.bf16 %v1764_v54, %v1755_v53 }
 0x9a4   :  { %v4953_v60 = vpack.c.bf16 %v1731_v58, %v1722_v57  ;;  %v1730_v62 = vld [vmem:[#allocation7 + $0x58] sm:$0xff]  ;;  %v1740_v3 = vld [vmem:[#allocation7 + $0xa8] sm:$0xff]  ;;  %v1749_v4 = vld [vmem:[#allocation7 + $0xf0] sm:$0xff]  ;;  %v4933_v6 = vpack.c.bf16 %v1783_v59, %v1774_v56 }
 0x9a5   :  { %v4955_v1 = vpack.c.bf16 %v1730_v62, %v1721_v61  ;;  %v1739_v5 = vld [vmem:[#allocation7 + $0xa0] sm:$0xff]  ;;  %v1773_v7 = vld [vmem:[#allocation7 + $0x1b0] sm:$0xff]  ;;  %v1782_v8 = vld [vmem:[#allocation7 + $0x1f8] sm:$0xff]  ;;  %v4957_v9 = vpack.c.bf16 %v1749_v4, %v1740_v3 }
 0x9a6   :  { %4928 = vmatpush1.bf16.msra.mxu1 %v4927_v52  ;;  %4954 = vmatprep.subr.bf16.mxu0 %v4953_v60  ;;  %v1748_v63 = vld [vmem:[#allocation7 + $0xe8] sm:$0xff]  ;;  %v1801_v12 = vld [vmem:[#allocation7 + $0x290] sm:$0xff]  ;;  %v1758_v15 = vld [vmem:[#allocation7 + $0x138] sm:$0xff]  ;;  %v4935_v19 = vpack.c.bf16 %v1782_v8, %v1773_v7 }
 0x9a7   :  { %4930 = vmatprep.subr.bf16.mxu1 %v4929_v55  ;;  %4956 = vmatpush1.bf16.msra.mxu0 %v4955_v1  ;;  %v1792_v10 = vld [vmem:[#allocation7 + $0x248] sm:$0xff]  ;;  %v4959_v13 = vpack.c.bf16 %v1748_v63, %v1739_v5  ;;  %v1767_v16 = vld [vmem:[#allocation7 + $0x180] sm:$0xff]  ;;  %v1757_v17 = vld [vmem:[#allocation7 + $0x130] sm:$0xff] }
 0x9a8   :  { %4958 = vmatprep.subr.bf16.mxu0 %v4957_v9  ;;  %v1766_v18 = vld [vmem:[#allocation7 + $0x178] sm:$0xff]  ;;  %v1791_v20 = vld [vmem:[#allocation7 + $0x240] sm:$0xff]  ;;  %v1800_v21 = vld [vmem:[#allocation7 + $0x288] sm:$0xff]  ;;  %v4961_v22 = vpack.c.bf16 %v1767_v16, %v1758_v15  ;;  %v4937_v23 = vpack.c.bf16 %v1801_v12, %v1792_v10 }
 0x9a9   :  { %v1810_v24 = vld [vmem:[#allocation7 + $0x2d8] sm:$0xff]  ;;  %v4963_v25 = vpack.c.bf16 %v1766_v18, %v1757_v17  ;;  %v1776_v26 = vld [vmem:[#allocation7 + $0x1c8] sm:$0xff]  ;;  %v1785_v27 = vld [vmem:[#allocation7 + $0x210] sm:$0xff]  ;;  %v4939_v31 = vpack.c.bf16 %v1800_v21, %v1791_v20 }
 0x9aa   :  { %4932 = vmatpush1.bf16.msra.mxu1 %v4931_v2  ;;  %v1819_v28 = vld [vmem:[#allocation7 + $0x320] sm:$0xff]  ;;  %v4965_v29 = vpack.c.bf16 %v1785_v27, %v1776_v26  ;;  %v1784_v30 = vld [vmem:[#allocation7 + $0x208] sm:$0xff]  ;;  %v1794_v32 = vld [vmem:[#allocation7 + $0x258] sm:$0xff] }
 0x9ab   :  { %4934 = vmatprep.subr.bf16.mxu1 %v4933_v6  ;;  %4960 = vmatpush1.bf16.msra.mxu0 %v4959_v13  ;;  %v1775_v41 = vld [vmem:[#allocation7 + $0x1c0] sm:$0xff]  ;;  %v4941_v34 = vpack.c.bf16 %v1819_v28, %v1810_v24  ;;  %v1809_v35 = vld [vmem:[#allocation7 + $0x2d0] sm:$0xff]  ;;  %v1818_v38 = vld [vmem:[#allocation7 + $0x318] sm:$0xff] }
 0x9ac   :  { %4962 = vmatprep.subr.bf16.mxu0 %v4961_v22  ;;  %v1803_v33 = vld [vmem:[#allocation7 + $0x2a0] sm:$0xff]  ;;  %v1828_v39 = vld [vmem:[#allocation7 + $0x368] sm:$0xff]  ;;  %v4967_v40 = vpack.c.bf16 %v1784_v30, %v1775_v41  ;;  %v1837_v42 = vld [vmem:[#allocation7 + $0x3b0] sm:$0xff]  ;;  %v4943_v48 = vpack.c.bf16 %v1818_v38, %v1809_v35 }
 0x9ad   :  { %v4969_v43 = vpack.c.bf16 %v1803_v33, %v1794_v32  ;;  %v1793_v44 = vld [vmem:[#allocation7 + $0x250] sm:$0xff]  ;;  %v1802_v45 = vld [vmem:[#allocation7 + $0x298] sm:$0xff]  ;;  %v1812_v46 = vld [vmem:[#allocation7 + $0x2e8] sm:$0xff]  ;;  %v4945_v49 = vpack.c.bf16 %v1837_v42, %v1828_v39 }
 0x9ae   :  { %4936 = vmatpush1.bf16.msra.mxu1 %v4935_v19  ;;  %v1821_v47 = vld [vmem:[#allocation7 + $0x330] sm:$0xff]  ;;  %v1827_v50 = vld [vmem:[#allocation7 + $0x360] sm:$0xff]  ;;  %v1836_v51 = vld [vmem:[#allocation7 + $0x3a8] sm:$0xff]  ;;  %v4971_v53 = vpack.c.bf16 %v1802_v45, %v1793_v44 }
 0x9af   :  { %4938 = vmatprep.subr.bf16.mxu1 %v4937_v23  ;;  %4964 = vmatpush1.bf16.msra.mxu0 %v4963_v25  ;;  %v1846_v52 = vld [vmem:[#allocation7 + $0x3f8] sm:$0xff]  ;;  %v1855_v54 = vld [vmem:[#allocation7 + $0x440] sm:$0xff]  ;;  %v4973_v55 = vpack.c.bf16 %v1821_v47, %v1812_v46  ;;  %v1820_v57 = vld [vmem:[#allocation7 + $0x328] sm:$0xff]  ;;  %v4947_v60 = vpack.c.bf16 %v1836_v51, %v1827_v50 }
 0x9b0   :  { %4966 = vmatprep.subr.bf16.mxu0 %v4965_v29  ;;  %v1811_v56 = vld [vmem:[#allocation7 + $0x2e0] sm:$0xff]  ;;  %v1830_v58 = vld [vmem:[#allocation7 + $0x378] sm:$0xff]  ;;  %v4949_v61 = vpack.c.bf16 %v1855_v54, %v1846_v52  ;;  %v1845_v62 = vld [vmem:[#allocation7 + $0x3f0] sm:$0xff] }
 0x9b1   :  { %v1839_v59 = vld [vmem:[#allocation7 + $0x3c0] sm:$0xff]  ;;  %v1854_v1 = vld [vmem:[#allocation7 + $0x438] sm:$0xff]  ;;  %v1724_v2 = vld [vmem:[#allocation7 + $0x28] sm:$0xff]  ;;  %v4975_v3 = vpack.c.bf16 %v1820_v57, %v1811_v56 }
 0x9b2   :  { %4940 = vmatpush1.bf16.msra.mxu1 %v4939_v31  ;;  %v1733_v4 = vld [vmem:[#allocation7 + $0x70] sm:$0xff]  ;;  %v4977_v5 = vpack.c.bf16 %v1839_v59, %v1830_v58  ;;  %v1838_v7 = vld [vmem:[#allocation7 + $0x3b8] sm:$0xff]  ;;  %v1848_v8 = vld [vmem:[#allocation7 + $0x408] sm:$0xff]  ;;  %v4951_v63 = vpack.c.bf16 %v1854_v1, %v1845_v62 }
 0x9b3   :  { %4942 = vmatprep.subr.bf16.mxu1 %v4941_v34  ;;  %4968 = vmatpush1.bf16.msra.mxu0 %v4967_v40  ;;  %v1829_v6 = vld [vmem:[#allocation7 + $0x370] sm:$0xff]  ;;  %v4985_v10 = vpack.c.bf16 %v1733_v4, %v1724_v2  ;;  %v1723_v12 = vld [vmem:[#allocation7 + $0x20] sm:$0xff]  ;;  %v1732_v13 = vld [vmem:[#allocation7 + $0x68] sm:$0xff] }
 0x9b4   :  { %4970 = vmatprep.subr.bf16.mxu0 %v4969_v43  ;;  %v1857_v9 = vld [vmem:[#allocation7 + $0x450] sm:$0xff]  ;;  %v1742_v15 = vld [vmem:[#allocation7 + $0xb8] sm:$0xff]  ;;  %v4979_v16 = vpack.c.bf16 %v1838_v7, %v1829_v6  ;;  %v1751_v17 = vld [vmem:[#allocation7 + $0x100] sm:$0xff]  ;;  %v4987_v23 = vpack.c.bf16 %v1732_v13, %v1723_v12 }
 0x9b5   :  { %v4981_v18 = vpack.c.bf16 %v1857_v9, %v1848_v8  ;;  %v1847_v19 = vld [vmem:[#allocation7 + $0x400] sm:$0xff]  ;;  %v1856_v20 = vld [vmem:[#allocation7 + $0x448] sm:$0xff]  ;;  %v1726_v21 = vld [vmem:[#allocation7 + $0x38] sm:$0xff]  ;;  %v4989_v24 = vpack.c.bf16 %v1751_v17, %v1742_v15 }
 0x9b6   :  { %4944 = vmatpush1.bf16.msra.mxu1 %v4943_v48  ;;  %v1735_v22 = vld [vmem:[#allocation7 + $0x80] sm:$0xff]  ;;  %v1741_v25 = vld [vmem:[#allocation7 + $0xb0] sm:$0xff]  ;;  %v1750_v26 = vld [vmem:[#allocation7 + $0xf8] sm:$0xff]  ;;  %v4983_v28 = vpack.c.bf16 %v1856_v20, %v1847_v19 }
 0x9b7   :  { %4946 = vmatprep.subr.bf16.mxu1 %v4945_v49  ;;  %4972 = vmatpush1.bf16.msra.mxu0 %v4971_v53  ;;  %v1760_v27 = vld [vmem:[#allocation7 + $0x148] sm:$0xff]  ;;  %v1769_v29 = vld [vmem:[#allocation7 + $0x190] sm:$0xff]  ;;  %v5017_v41 = vpack.c.bf16 %v1735_v22, %v1726_v21  ;;  %v1734_v31 = vld [vmem:[#allocation7 + $0x78] sm:$0xff]  ;;  %v4991_v34 = vpack.c.bf16 %v1750_v26, %v1741_v25 }
 0x9b8   :  { %4974 = vmatprep.subr.bf16.mxu0 %v4973_v55  ;;  %v1725_v30 = vld [vmem:[#allocation7 + $0x30] sm:$0xff]  ;;  %v1744_v32 = vld [vmem:[#allocation7 + $0xc8] sm:$0xff]  ;;  %v4993_v35 = vpack.c.bf16 %v1769_v29, %v1760_v27  ;;  %v1759_v38 = vld [vmem:[#allocation7 + $0x140] sm:$0xff] }
 0x9b9   :  { %v1753_v33 = vld [vmem:[#allocation7 + $0x110] sm:$0xff]  ;;  %v1768_v39 = vld [vmem:[#allocation7 + $0x188] sm:$0xff]  ;;  %v1778_v40 = vld [vmem:[#allocation7 + $0x1d8] sm:$0xff]  ;;  %v5019_v42 = vpack.c.bf16 %v1734_v31, %v1725_v30 }
 0x9ba   :  { %4948 = vmatpush1.bf16.msra.mxu1 %v4947_v60  ;;  %v1787_v43 = vld [vmem:[#allocation7 + $0x220] sm:$0xff]  ;;  %v5021_v44 = vpack.c.bf16 %v1753_v33, %v1744_v32  ;;  %v1752_v46 = vld [vmem:[#allocation7 + $0x108] sm:$0xff]  ;;  %v1762_v47 = vld [vmem:[#allocation7 + $0x158] sm:$0xff]  ;;  %v4995_v49 = vpack.c.bf16 %v1768_v39, %v1759_v38 }
 0x9bb   :  { %4950 = vmatprep.subr.bf16.mxu1 %v4949_v61  ;;  %4976 = vmatpush1.bf16.msra.mxu0 %v4975_v3  ;;  %v1743_v45 = vld [vmem:[#allocation7 + $0xc0] sm:$0xff]  ;;  %v4997_v50 = vpack.c.bf16 %v1787_v43, %v1778_v40  ;;  %v1777_v51 = vld [vmem:[#allocation7 + $0x1d0] sm:$0xff]  ;;  %v1786_v52 = vld [vmem:[#allocation7 + $0x218] sm:$0xff] }
 0x9bc   :  { %4978 = vmatprep.subr.bf16.mxu0 %v4977_v5  ;;  %v1771_v48 = vld [vmem:[#allocation7 + $0x1a0] sm:$0xff]  ;;  %v1796_v53 = vld [vmem:[#allocation7 + $0x268] sm:$0xff]  ;;  %v5023_v54 = vpack.c.bf16 %v1752_v46, %v1743_v45  ;;  %v1805_v55 = vld [vmem:[#allocation7 + $0x2b0] sm:$0xff]  ;;  %v4999_v61 = vpack.c.bf16 %v1786_v52, %v1777_v51 }
 0x9bd   :  { %v5025_v56 = vpack.c.bf16 %v1771_v48, %v1762_v47  ;;  %v1761_v57 = vld [vmem:[#allocation7 + $0x150] sm:$0xff]  ;;  %v1770_v58 = vld [vmem:[#allocation7 + $0x198] sm:$0xff]  ;;  %v1780_v59 = vld [vmem:[#allocation7 + $0x1e8] sm:$0xff]  ;;  %v5001_v62 = vpack.c.bf16 %v1805_v55, %v1796_v53 }
 0x9be   :  { %4952 = vmatpush1.bf16.msra.mxu1 %v4951_v63  ;;  %v1789_v60 = vld [vmem:[#allocation7 + $0x230] sm:$0xff]  ;;  %v1795_v1 = vld [vmem:[#allocation7 + $0x260] sm:$0xff]  ;;  %v1804_v2 = vld [vmem:[#allocation7 + $0x2a8] sm:$0xff]  ;;  %v5027_v4 = vpack.c.bf16 %v1770_v58, %v1761_v57 }
 0x9bf   :  { %4986 = vmatprep.subr.bf16.mxu1 %v4985_v10  ;;  %4980 = vmatpush1.bf16.msra.mxu0 %v4979_v16  ;;  %v1814_v3 = vld [vmem:[#allocation7 + $0x2f8] sm:$0xff]  ;;  %v1823_v5 = vld [vmem:[#allocation7 + $0x340] sm:$0xff]  ;;  %v5029_v6 = vpack.c.bf16 %v1789_v60, %v1780_v59  ;;  %v1788_v8 = vld [vmem:[#allocation7 + $0x228] sm:$0xff]  ;;  %v5003_v10 = vpack.c.bf16 %v1804_v2, %v1795_v1 }
 0x9c0   :  { %4982 = vmatprep.subr.bf16.mxu0 %v4981_v18  ;;  %v1779_v7 = vld [vmem:[#allocation7 + $0x1e0] sm:$0xff]  ;;  %v1798_v9 = vld [vmem:[#allocation7 + $0x278] sm:$0xff]  ;;  %v5005_v12 = vpack.c.bf16 %v1823_v5, %v1814_v3  ;;  %v1813_v13 = vld [vmem:[#allocation7 + $0x2f0] sm:$0xff] }
 0x9c1   :  { %1928 = vmatmul.mubr.f32.vlgmr.msra.gmra.mrb[14].mxu1 %v6506_v36  ;;  %v1807_v63 = vld [vmem:[#allocation7 + $0x2c0] sm:$0xff]  ;;  %v1822_v15 = vld [vmem:[#allocation7 + $0x338] sm:$0xff]  ;;  %v1832_v16 = vld [vmem:[#allocation7 + $0x388] sm:$0xff]  ;;  %v5031_v17 = vpack.c.bf16 %v1788_v8, %v1779_v7 }
 0x9c2   :  { %4988 = vmatpush1.bf16.msra.mxu1 %v4987_v23  ;;  %1933 = vmatprep.mubr.f32.mxu1 %v6003_v0  ;;  %v1841_v18 = vld [vmem:[#allocation7 + $0x3d0] sm:$0xff]  ;;  %v5033_v19 = vpack.c.bf16 %v1807_v63, %v1798_v9  ;;  %v1806_v21 = vld [vmem:[#allocation7 + $0x2b8] sm:$0xff]  ;;  %v1816_v22 = vld [vmem:[#allocation7 + $0x308] sm:$0xff] }
 0x9c3   :  { %4990 = vmatprep.subr.bf16.mxu1 %v4989_v24  ;;  %4984 = vmatpush1.bf16.msra.mxu0 %v4983_v28  ;;  %v1797_v20 = vld [vmem:[#allocation7 + $0x270] sm:$0xff]  ;;  %v5007_v24 = vpack.c.bf16 %v1822_v15, %v1813_v13  ;;  %v5009_v25 = vpack.c.bf16 %v1841_v18, %v1832_v16  ;;  %v1831_v26 = vld [vmem:[#allocation7 + $0x380] sm:$0xff]  ;;  %v1840_v27 = vld [vmem:[#allocation7 + $0x3c8] sm:$0xff] }
 0x9c4   :  { %5018 = vmatprep.subr.bf16.mxu0 %v5017_v41  ;;  %v1825_v23 = vld [vmem:[#allocation7 + $0x350] sm:$0xff]  ;;  %v1850_v28 = vld [vmem:[#allocation7 + $0x418] sm:$0xff]  ;;  %v5035_v29 = vpack.c.bf16 %v1806_v21, %v1797_v20  ;;  %v1859_v41 = vld [vmem:[#allocation7 + $0x460] sm:$0xff] }
 0x9c5   :  { %1934 = vmatmul.mubr.f32.gmra.mrb[16].mxu1 %v6508_v37  ;;  %v5037_v30 = vpack.c.bf16 %v1825_v23, %v1816_v22  ;;  %v1815_v31 = vld [vmem:[#allocation7 + $0x300] sm:$0xff]  ;;  %v1824_v32 = vld [vmem:[#allocation7 + $0x348] sm:$0xff]  ;;  %v1834_v33 = vld [vmem:[#allocation7 + $0x398] sm:$0xff]  ;;  %v5013_v38 = vpack.c.bf16 %v1859_v41, %v1850_v28 }
 0x9c6   :  { %4992 = vmatpush1.bf16.msra.mxu1 %v4991_v34  ;;  %2005 = vmatmul.mubr.f32.vlgmr.msra.gmra.mrb[16].mxu0 %v6506_v36  ;;  %v1843_v34 = vld [vmem:[#allocation7 + $0x3e0] sm:$0xff]  ;;  %v1849_v39 = vld [vmem:[#allocation7 + $0x410] sm:$0xff]  ;;  %v1858_v40 = vld [vmem:[#allocation7 + $0x458] sm:$0xff]  ;;  %v5039_v43 = vpack.c.bf16 %v1824_v32, %v1815_v31 }
 0x9c7   :  { %4994 = vmatprep.subr.bf16.mxu1 %v4993_v35  ;;  %5020 = vmatpush1.bf16.msra.mxu0 %v5019_v42  ;;  %v5011_v35 = vpack.c.bf16 %v1840_v27, %v1831_v26  ;;  %v1727_v42 = vld [vmem:[#allocation7 + $0x40] sm:$0xff]  ;;  %v5041_v45 = vpack.c.bf16 %v1843_v34, %v1834_v33  ;;  %v1833_v46 = vld [vmem:[#allocation7 + $0x390] sm:$0xff]  ;;  %v1842_v47 = vld [vmem:[#allocation7 + $0x3d8] sm:$0xff] }
 0x9c8   :  { %2010 = vmatprep.mubr.f32.mxu0 %v6003_v0  ;;  %5022 = vmatprep.subr.bf16.mxu0 %v5021_v44  ;;  %v1736_v44 = vld [vmem:[#allocation7 + $0x88] sm:$0xff]  ;;  %v1745_v52 = vld [vmem:[#allocation7 + $0xd0] sm:$0xff]  ;;  %v5043_v53 = vpack.c.bf16 %v1842_v47, %v1833_v46  ;;  %v1763_v60 = vld [vmem:[#allocation7 + $0x160] sm:$0xff] }
 0x9c9   :  { %2081 = vmatprep.mubr.f32.mxu1 %v6003_v0  ;;  %v1852_v48 = vld [vmem:[#allocation7 + $0x428] sm:$0xff]  ;;  %v5049_v51 = vpack.c.bf16 %v1736_v44, %v1727_v42  ;;  %v1781_v1 = vld [vmem:[#allocation7 + $0x1f0] sm:$0xff]  ;;  %v1790_v2 = vld [vmem:[#allocation7 + $0x238] sm:$0xff] }
 0x9ca   :  { %4996 = vmatpush1.bf16.msra.mxu1 %v4995_v49  ;;  %2011 = vmatmul.mubr.f32.gmra.mrb[18].mxu0 %v6508_v37  ;;  %v1861_v49 = vld [vmem:[#allocation7 + $0x470] sm:$0xff]  ;;  %v1860_v57 = vld [vmem:[#allocation7 + $0x468] sm:$0xff]  ;;  %v5061_v3 = vpack.c.bf16 %v1790_v2, %v1781_v1  ;;  %v1826_v8 = vld [vmem:[#allocation7 + $0x358] sm:$0xff] }
 0x9cb   :  { %4998 = vmatprep.subr.bf16.mxu1 %v4997_v50  ;;  %5024 = vmatpush1.bf16.msra.mxu0 %v5023_v54  ;;  %v5015_v50 = vpack.c.bf16 %v1858_v40, %v1849_v39  ;;  %v1754_v54 = vld [vmem:[#allocation7 + $0x118] sm:$0xff]  ;;  %v5045_v55 = vpack.c.bf16 %v1861_v49, %v1852_v48  ;;  %v1808_v5 = vld [vmem:[#allocation7 + $0x2c8] sm:$0xff]  ;;  %v1817_v7 = vld [vmem:[#allocation7 + $0x310] sm:$0xff] }
 0x9cc   :  { %5026 = vmatprep.subr.bf16.mxu0 %v5025_v56  ;;  %2158 = vmatprep.mubr.f32.mxu0 %v6003_v0  ;;  %v1851_v56 = vld [vmem:[#allocation7 + $0x420] sm:$0xff]  ;;  %v5053_v58 = vpack.c.bf16 %v1754_v54, %v1745_v52  ;;  %v5069_v9 = vpack.c.bf16 %v1826_v8, %v1817_v7  ;;  %v1853_v13 = vld [vmem:[#allocation7 + $0x430] sm:$0xff]  ;;  %v1862_v15 = vld [vmem:[#allocation7 + $0x478] sm:$0xff] }
 0x9cd   :  { %v5047_v59 = vpack.c.bf16 %v1860_v57, %v1851_v56  ;;  %v1835_v63 = vld [vmem:[#allocation7 + $0x3a0] sm:$0xff]  ;;  %v2265_v16 = vld [vmem:[%s6702_s17 + $0x8] sm:$0xff]  ;;  %v2264_v48 = vld [vmem:[%s6702_s17] sm:$0xff] }
 0x9ce   :  { %5000 = vmatpush1.bf16.msra.mxu1 %v4999_v61  ;;  %v1772_v61 = vld [vmem:[#allocation7 + $0x1a8] sm:$0xff]  ;;  %v2270_v54 = vld [vmem:[%s6702_s17 + $0x30] sm:$0xff] }
 0x9cf   :  { %5002 = vmatprep.subr.bf16.mxu1 %v5001_v62  ;;  %5028 = vmatpush1.bf16.msra.mxu0 %v5027_v4  ;;  %v5057_v62 = vpack.c.bf16 %v1772_v61, %v1763_v60  ;;  %v1799_v4 = vld [vmem:[#allocation7 + $0x280] sm:$0xff]  ;;  %v2414_v18 = vld [vmem:[#allocation34 + $0x8] sm:$0xff]  ;;  %v2419_v61 = vld [vmem:[#allocation34 + $0x30] sm:$0xff] }
 0x9d0   :  { %5030 = vmatprep.subr.bf16.mxu0 %v5029_v6  ;;  %v5065_v6 = vpack.c.bf16 %v1808_v5, %v1799_v4  ;;  %v2267_v49 = vld [vmem:[%s6702_s17 + $0x18] sm:$0xff]  ;;  %v2268_v52 = vld [vmem:[%s6702_s17 + $0x20] sm:$0xff]  ;;  %v2423_v5 = vld [vmem:[#allocation34 + $0x50] sm:$0xff] }
 0x9d1   :  { %v2416_v56 = vld [vmem:[#allocation34 + $0x18] sm:$0xff]  ;;  %v2421_v2 = vld [vmem:[#allocation34 + $0x40] sm:$0xff] }
 0x9d2   :  { %5004 = vmatpush1.bf16.msra.mxu1 %v5003_v10  ;;  %v1844_v10 = vld [vmem:[#allocation7 + $0x3e8] sm:$0xff] }
 0x9d3   :  { %5006 = vmatprep.subr.bf16.mxu1 %v5005_v12  ;;  %5032 = vmatpush1.bf16.msra.mxu0 %v5031_v17  ;;  %v5073_v12 = vpack.c.bf16 %v1844_v10, %v1835_v63  ;;  %v2413_v17 = vld [vmem:[#allocation34] sm:$0xff]  ;;  %v2427_v10 = vld [vmem:[#allocation34 + $0x70] sm:$0xff] }
 0x9d4   :  { %5034 = vmatprep.subr.bf16.mxu0 %v5033_v19  ;;  %v5109_v19 = vpack.c.bf16 %v2414_v18, %v2413_v17  ;;  %v2425_v8 = vld [vmem:[#allocation34 + $0x60] sm:$0xff] }
 0x9d6   :  { %5008 = vmatpush1.bf16.msra.mxu1 %v5007_v24 }
 0x9d7   :  { %5010 = vmatprep.subr.bf16.mxu1 %v5009_v25  ;;  %5036 = vmatpush1.bf16.msra.mxu0 %v5035_v29 }
 0x9d8   :  { %5038 = vmatprep.subr.bf16.mxu0 %v5037_v30 }
 0x9da   :  { %5012 = vmatpush1.bf16.msra.mxu1 %v5011_v35 }
 0x9db   :  { %5014 = vmatprep.subr.bf16.mxu1 %v5013_v38  ;;  %5040 = vmatpush1.bf16.msra.mxu0 %v5039_v43 }
 0x9dc   :  { %5042 = vmatprep.subr.bf16.mxu0 %v5041_v45 }
 0x9de   :  { %5016 = vmatpush1.bf16.msra.mxu1 %v5015_v50  ;;  %v2266_v50 = vld [vmem:[%s6702_s17 + $0x10] sm:$0xff] }
 0x9df   :  { %5050 = vmatprep.subr.bf16.mxu1 %v5049_v51  ;;  %5044 = vmatpush1.bf16.msra.mxu0 %v5043_v53  ;;  %v2271_v53 = vld [vmem:[%s6702_s17 + $0x38] sm:$0xff] }
 0x9e0   :  { %5046 = vmatprep.subr.bf16.mxu0 %v5045_v55  ;;  %v2415_v55 = vld [vmem:[#allocation34 + $0x10] sm:$0xff] }
 0x9e1   :  { %2082 = vmatmul.mubr.f32.vlgmr.msra.gmra.mrb[18].mxu1 %v6506_v36  ;;  %v5112_v57 = vpack.c.bf16 %v2416_v56, %v2415_v55  ;;  %v2573_v56 = vld [vmem:[%s6736_s25] sm:$0x1] }
 0x9e2   :  { %5052 = vmatpush3.bf16.msra.mxu1 %v5049_v51  ;;  %2087 = vmatprep.mubr.f32.mxu1 %v6003_v0  ;;  %v2269_v51 = vld [vmem:[%s6702_s17 + $0x28] sm:$0xff] }
 0x9e3   :  { %5054 = vmatprep.subr.bf16.mxu1 %v5053_v58  ;;  %5048 = vmatpush1.bf16.msra.mxu0 %v5047_v59  ;;  %v2418_v59 = vld [vmem:[#allocation34 + $0x28] sm:$0xff] }
 0x9e4   :  { %5081 = vmatprep.subr.bf16.mxu0 %v6005_v11 }
 0x9e5   :  { %2088 = vmatmul.mubr.f32.gmra.mrb[20].mxu1 %v6508_v37 }
 0x9e6   :  { %5056 = vmatpush3.bf16.msra.mxu1 %v5053_v58  ;;  %2159 = vmatmul.mubr.f32.vlgmr.msra.gmra.mrb[20].mxu0 %v6506_v36  ;;  %v2417_v58 = vld [vmem:[#allocation34 + $0x20] sm:$0xff] }
 0x9e7   :  { %5058 = vmatprep.subr.bf16.mxu1 %v5057_v62  ;;  %2164 = vmatprep.mubr.f32.mxu0 %v6003_v0  ;;  %v5115_v60 = vpack.c.bf16 %v2418_v59, %v2417_v58  ;;  %v2575_v59 = vld [vmem:[%s6737_s26] sm:$0x1] }
 0x9e8   :  { %4506 = vmatprep.mubr.f32.mxu1 %v6506_v36  ;;  %v5077_v36 = vpack.c.bf16 %v1862_v15, %v1853_v13 }
 0x9ea   :  { %5060 = vmatpush3.bf16.msra.mxu1 %v5057_v62  ;;  %2165 = vmatmul.mubr.f32.gmra.mrb[22].mxu0 %v6508_v37  ;;  %v2420_v62 = vld [vmem:[#allocation34 + $0x38] sm:$0xff] }
 0x9eb   :  { %5062 = vmatprep.subr.bf16.mxu1 %v5061_v3  ;;  %3876 = vmatprep.mubr.msk.f32.mxu0 %vm313_vm0, %v2265_v16  ;;  %v5118_v1 = vpack.c.bf16 %v2420_v62, %v2419_v61 }
 0x9ee   :  { %5064 = vmatpush3.bf16.msra.mxu1 %v5061_v3  ;;  %v2422_v3 = vld [vmem:[#allocation34 + $0x48] sm:$0xff] }
 0x9ef   :  { %5066 = vmatprep.subr.bf16.mxu1 %v5065_v6  ;;  %v5121_v4 = vpack.c.bf16 %v2422_v3, %v2421_v2 }
 0x9f2   :  { %5068 = vmatpush3.bf16.msra.mxu1 %v5065_v6  ;;  %v2424_v6 = vld [vmem:[#allocation34 + $0x58] sm:$0xff] }
 0x9f3   :  { %5070 = vmatprep.subr.bf16.mxu1 %v5069_v9  ;;  %v5124_v7 = vpack.c.bf16 %v2424_v6, %v2423_v5 }
 0x9f6   :  { %5072 = vmatpush3.bf16.msra.mxu1 %v5069_v9  ;;  %v2426_v9 = vld [vmem:[#allocation34 + $0x68] sm:$0xff] }
 0x9f7   :  { %5074 = vmatprep.subr.bf16.mxu1 %v5073_v12  ;;  %v5127_v63 = vpack.c.bf16 %v2426_v9, %v2425_v8 }
 0x9fa   :  { %5076 = vmatpush3.bf16.msra.mxu1 %v5073_v12  ;;  %v2428_v12 = vld [vmem:[#allocation34 + $0x78] sm:$0xff] }
 0x9fb   :  { %5078 = vmatprep.subr.bf16.mxu1 %v5077_v36  ;;  %v5130_v13 = vpack.c.bf16 %v2428_v12, %v2427_v10 }
 0x9fe   :  { %5080 = vmatpush3.bf16.msra.mxu1 %v5077_v36 }
 0x9ff   :  { %5108 = vmatprep.subr.bf16.mxu1 %v6005_v11 }
 0xa01   :  { %4507 = vmatmul.mubr.f32.vlgmr.msra.gmra.mrb[22].mxu1 %v6508_v37 }
 0xa02   :  { %4541 = vmatprep.mubr.msk.f32.mxu1 %vm6004_vm1, %v6003_v0  ;;  %5110 = vmatpush3.bf16.msra.mxu1 %v5109_v19 }
 0xa03   :  { %5111 = vmatprep.subr.bf16.mxu1 %v6005_v11 }
 0xa06   :  { %5113 = vmatpush3.bf16.msra.mxu1 %v5112_v57 }
 0xa07   :  { %5114 = vmatprep.subr.bf16.mxu1 %v6005_v11 }
 0xa0a   :  { %5116 = vmatpush3.bf16.msra.mxu1 %v5115_v60 }
 0xa0b   :  { %5117 = vmatprep.subr.bf16.mxu1 %v6005_v11 }
 0xa0e   :  { %5119 = vmatpush3.bf16.msra.mxu1 %v5118_v1 }
 0xa0f   :  { %5120 = vmatprep.subr.bf16.mxu1 %v6005_v11 }
 0xa12   :  { %5122 = vmatpush3.bf16.msra.mxu1 %v5121_v4 }
 0xa13   :  { %5123 = vmatprep.subr.bf16.mxu1 %v6005_v11 }
 0xa16   :  { %5125 = vmatpush3.bf16.msra.mxu1 %v5124_v7 }
 0xa17   :  { %5126 = vmatprep.subr.bf16.mxu1 %v6005_v11 }
 0xa1a   :  { %5128 = vmatpush3.bf16.msra.mxu1 %v5127_v63 }
 0xa1b   :  { %5129 = vmatprep.subr.bf16.mxu1 %v6005_v11 }
 0xa1e   :  { %5131 = vmatpush3.bf16.msra.mxu1 %v5130_v13 }
 0xa94   :  { %v1929_v20 = vpop.f32.mrb[14].mxu1 }
 0xa95   :  { %v1931_v21 = vpop.f32.mrb[15].mxu1 }
 0xa98   :  { %v1935_v22 = vpop.f32.mrb[16].mxu1 }
 0xa99   :  { %v5082_v23 = vpack.c.bf16 %v1935_v22, %v1929_v20  ;;  %v1937_v37 = vpop.f32.mrb[17].mxu1  ;;  %v2006_v24 = vpop.f32.mrb[16].mxu0 }
 0xa9a   :  { %v5085_v25 = vpack.c.bf16 %v1937_v37, %v1931_v21  ;;  %v2008_v26 = vpop.f32.mrb[17].mxu0 }
 0xa9b   :  { %5083 = vmatpush1.bf16.msra.mxu0 %v5082_v23 }
 0xa9c   :  { %5084 = vmatprep.subr.bf16.mxu0 %v6005_v11 }
 0xa9d   :  { %v2012_v27 = vpop.f32.mrb[18].mxu0 }
 0xa9e   :  { %v5088_v28 = vpack.c.bf16 %v2012_v27, %v2006_v24  ;;  %v2014_v29 = vpop.f32.mrb[19].mxu0 }
 0xa9f   :  { %5086 = vmatpush1.bf16.msra.mxu0 %v5085_v25  ;;  %v5091_v41 = vpack.c.bf16 %v2014_v29, %v2008_v26 }
 0xaa0   :  { %5087 = vmatprep.subr.bf16.mxu0 %v6005_v11 }
 0xaa3   :  { %5089 = vmatpush1.bf16.msra.mxu0 %v5088_v28 }
 0xaa4   :  { %5090 = vmatprep.subr.bf16.mxu0 %v6005_v11 }
 0xaa7   :  { %5092 = vmatpush1.bf16.msra.mxu0 %v5091_v41 }
 0xaa8   :  { %5093 = vmatprep.subr.bf16.mxu0 %v6005_v11 }
 0xab4   :  { %v2083_v30 = vpop.f32.mrb[18].mxu1 }
 0xab5   :  { %v2085_v31 = vpop.f32.mrb[19].mxu1 }
 0xab8   :  { %v2089_v32 = vpop.f32.mrb[20].mxu1 }
 0xab9   :  { %v5094_v33 = vpack.c.bf16 %v2089_v32, %v2083_v30  ;;  %v2091_v34 = vpop.f32.mrb[21].mxu1  ;;  %v2160_v35 = vpop.f32.mrb[20].mxu0 }
 0xaba   :  { %v5097_v38 = vpack.c.bf16 %v2091_v34, %v2085_v31  ;;  %v2162_v39 = vpop.f32.mrb[21].mxu0 }
 0xabb   :  { %5095 = vmatpush1.bf16.msra.mxu0 %v5094_v33 }
 0xabc   :  { %5096 = vmatprep.subr.bf16.mxu0 %v6005_v11 }
 0xabd   :  { %v2166_v40 = vpop.f32.mrb[22].mxu0 }
 0xabe   :  { %v5100_v42 = vpack.c.bf16 %v2166_v40, %v2160_v35  ;;  %v2168_v43 = vpop.f32.mrb[23].mxu0 }
 0xabf   :  { %5098 = vmatpush1.bf16.msra.mxu0 %v5097_v38  ;;  %v5103_v44 = vpack.c.bf16 %v2168_v43, %v2162_v39 }
 0xac0   :  { %5099 = vmatprep.subr.bf16.mxu0 %v6005_v11 }
 0xac3   :  { %5101 = vmatpush1.bf16.msra.mxu0 %v5100_v42 }
 0xac4   :  { %5102 = vmatprep.subr.bf16.mxu0 %v6005_v11 }
 0xac7   :  { %5104 = vmatpush1.bf16.msra.mxu0 %v5103_v44 }
 0xac8   :  { %5105 = vmatprep.subr.bf16.mxu0 %v6005_v11 }
 0xad4   :  { %v4508_v45 = vpop.f32.mrb[22].mxu1 }
 0xad5   :  { %v2237_v46 = vpop.f32.mrb[23].mxu1 }
 0xad6   :  { %v5106_v47 = vpack.c.bf16 %v4508_v45, %v2237_v46 }
 0xad8   :  { %5107 = vmatpush1.bf16.msra.mxu0 %v5106_v47 }
 0xad9   :  { %5132 = vmatprep.subr.bf16.mxu0 %v6005_v11 }
 0xadb   :  { %2367 = vmatmul.mubr.f32.vlgmr.msra.gmra.mrb[24].mxu0 %v2264_v48 }
 0xadc   :  { %3877 = vmatprep.mubr.msk.f32.mxu0 %vm313_vm0, %v2267_v49  ;;  %5134 = vmatpush3.bf16.msra.mxu0 %v5109_v19 }
 0xadd   :  { %5135 = vmatprep.subr.bf16.mxu0 %v6005_v11 }
 0xadf   :  { %2372 = vmatmul.mubr.f32.gmra.mrb[26].mxu0 %v2266_v50 }
 0xae0   :  { %3878 = vmatprep.mubr.msk.f32.mxu0 %vm313_vm0, %v2269_v51  ;;  %5137 = vmatpush3.bf16.msra.mxu0 %v5112_v57 }
 0xae1   :  { %5138 = vmatprep.subr.bf16.mxu0 %v6005_v11 }
 0xae3   :  { %2377 = vmatmul.mubr.f32.gmra.mrb[28].mxu0 %v2268_v52 }
 0xae4   :  { %3879 = vmatprep.mubr.msk.f32.mxu0 %vm313_vm0, %v2271_v53  ;;  %5140 = vmatpush3.bf16.msra.mxu0 %v5115_v60 }
 0xae5   :  { %5141 = vmatprep.subr.bf16.mxu0 %v6005_v11 }
 0xae7   :  { %2382 = vmatmul.mubr.f32.gmra.mrb[30].mxu0 %v2270_v54 }
 0xae8   :  { %4576 = vmatprep.mubr.msk.f32.mxu0 %vm6004_vm1, %v6003_v0  ;;  %5143 = vmatpush3.bf16.msra.mxu0 %v5118_v1 }
 0xae9   :  { %5144 = vmatprep.subr.bf16.mxu0 %v6005_v11 }
 0xaec   :  { %5146 = vmatpush3.bf16.msra.mxu0 %v5121_v4 }
 0xaed   :  { %5147 = vmatprep.subr.bf16.mxu0 %v6005_v11 }
 0xaf0   :  { %5149 = vmatpush3.bf16.msra.mxu0 %v5124_v7 }
 0xaf1   :  { %5150 = vmatprep.subr.bf16.mxu0 %v6005_v11 }
 0xaf4   :  { %5152 = vmatpush3.bf16.msra.mxu0 %v5127_v63 }
 0xaf5   :  { %5153 = vmatprep.subr.bf16.mxu0 %v6005_v11 }
 0xaf8   :  { %5155 = vmatpush3.bf16.msra.mxu0 %v5130_v13 }
 0xbae   :  { %v2368_v15 = vpop.f32.mrb[24].mxu0 }
 0xbaf   :  { %v2370_v36 = vpop.f32.mrb[25].mxu0  ;;  %v2387_v19 = vmax.f32 %v2368_v15, 0.0 }
 0xbb1   :  { %v2400_v37 = vmul.f32 %v2387_v19, %v2387_v19 }
 0xbb2   :  { %v2373_v16 = vpop.f32.mrb[26].mxu0 }
 0xbb3   :  { %v2388_v17 = vmax.f32 %v2373_v16, 0.0  ;;  %v2375_v18 = vpop.f32.mrb[27].mxu0 }
 0xbb5   :  { %v2401_v21 = vmul.f32 %v2388_v17, %v2388_v17  ;;  %v2391_v24 = vadd.f32 %v2388_v17, %v2387_v19 }
 0xbb6   :  { %v2378_v20 = vpop.f32.mrb[28].mxu0 }
 0xbb7   :  { %v2389_v22 = vmax.f32 %v2378_v20, 0.0  ;;  %v2380_v23 = vpop.f32.mrb[29].mxu0  ;;  %v2404_v27 = vadd.f32 %v2401_v21, %v2400_v37 }
 0xbb9   :  { %v2402_v25 = vmul.f32 %v2389_v22, %v2389_v22  ;;  %v2392_v28 = vadd.f32 %v2391_v24, %v2389_v22 }
 0xbba   :  { %v2383_v26 = vpop.f32.mrb[30].mxu0 }
 0xbbb   :  { %v2390_v29 = vmax.f32 %v2383_v26, 0.0  ;;  %v2385_v41 = vpop.f32.mrb[31].mxu0  ;;  %v2405_v30 = vadd.f32 %v2404_v27, %v2402_v25 }
 0xbbd   :  { %v2393_v31 = vadd.f32 %v2392_v28, %v2390_v29  ;;  %v2403_v32 = vmul.f32 %v2390_v29, %v2390_v29 }
 0xbbf   :  { %v2394_v33 = vrot.slane %v2393_v31, 4  ;;  %v2406_v34 = vadd.f32 %v2405_v30, %v2403_v32 }
 0xbc1   :  { %v2395_v35 = vadd.f32 %v2394_v33, %v2393_v31  ;;  %v2407_v38 = vrot.slane %v2406_v34, 4 }
 0xbc3   :  { %v2396_v39 = vrot.slane %v2395_v35, 2  ;;  %v2408_v40 = vadd.f32 %v2407_v38, %v2406_v34 }
 0xbc5   :  { %v2397_v42 = vadd.f32 %v2396_v39, %v2395_v35  ;;  %v2409_v43 = vrot.slane %v2408_v40, 2 }
 0xbc7   :  { %v2410_v44 = vadd.f32 %v2409_v43, %v2408_v40  ;;  %v2398_v45 = vrot.slane %v2397_v42, 1 }
 0xbc9   :  { %v2411_v46 = vrot.slane %v2410_v44, 1  ;;  %v2399_v47 = vadd.f32 %v2398_v45, %v2397_v42 }
 0xbcb   :  { %4542 = vmatmul.mubr.f32.vlgmr.msra.gmra.mrb[24].mxu1 %v2399_v47  ;;  %v2412_v48 = vadd.f32 %v2411_v46, %v2410_v44 }
 0xbcd   :  { %4577 = vmatmul.mubr.f32.vlgmr.msra.gmra.mrb[32].mxu0 %v2412_v48 }
 0xc9e   :  { %v2495_v49 = vpop.f32.mrb[24].mxu1 }
 0xc9f   :  { %v2569_v50 = vmul.f32 %v2495_v49, %v2495_v49  ;;  %v4543_v51 = vpop.f32.mrb[25].mxu1 }
 0xca0   :  { %v2565_v52 = vpop.f32.mrb[32].mxu0 }
 0xca1   :  { %v2570_v53 = vsub.f32 %v2565_v52, %v2569_v50  ;;  %v4578_v54 = vpop.f32.mrb[33].mxu0 }
 0xca3   :  { %v2571_v55 = vadd.f32 1e-05, %v2570_v53 }
 0xca5   :  { %5482 = vrsqrt.f32 %v2571_v55 }
 0xcaf   :  { %v5483_v57 = vpop.eup %5482 }
 0xcb0   :  { %v2574_v58 = vmul.f32 %v5483_v57, %v2573_v56 }
 0xcb2   :  { %v2576_v60 = vmul.f32 %v2574_v58, %v2495_v49  ;;  %v2582_v61 = vrot.slane %v2574_v58, %v6398_v14 }
 0xcb4   :  { %v2577_v62 = vsub.f32 %v2575_v59, %v2576_v60  ;;  %v2584_v1 = vmul.f32 %v2582_v61, %v2387_v19  ;;  %v2585_v2 = vmul.f32 %v2582_v61, %v2388_v17  ;;  %v2586_v3 = vmul.f32 %v2582_v61, %v2389_v22 }
 0xcb5   :  { %v2587_v4 = vmul.f32 %v2582_v61, %v2390_v29 }
 0xcb6   :  { %v2592_v5 = vrot.slane %v2577_v62, %v6398_v14 }
 0xcb8   :  { %v6593_v6 = vadd.f32 %v2592_v5, %v2584_v1  ;;  %v6595_v7 = vadd.f32 %v2592_v5, %v2585_v2  ;;  %v6597_v8 = vadd.f32 %v2592_v5, %v2586_v3  ;;  %v6599_v9 = vadd.f32 %v2592_v5, %v2587_v4 }
 0xcb9   :  { %5972 = dma.done.wait [#allocation9 + $0x1], 26624 }
 0xcba   :  { %5973 = vsyncadd [#allocation9 + $0x1], 4294940672  ;;  %2873 = vmatprep.mubr.f32.mxu1 %v6003_v0  ;;  %2962 = vmatprep.mubr.f32.mxu0 %v6003_v0  ;;  %v2602_v63 = vld [vmem:[#allocation8 + $0x8] sm:$0xff]  ;;  %v2615_v10 = vld [vmem:[#allocation8 + $0x70] sm:$0xff]  ;;  %vm3560_vm8 = vcmask 261120   ;;  %s6009_s30 = smov [#allocation37]  }
 0xcbb   :  { %v2601_v12 = vld [vmem:[#allocation8] sm:$0xff]  ;;  %v5156_v13 = vpack.c.bf16 %v2615_v10, %v2602_v63  ;;  %v2614_v15 = vld [vmem:[#allocation8 + $0x68] sm:$0xff]  ;;  %v2628_v14 = vld [vmem:[#allocation8 + $0xd8] sm:$0xff]  ;;  %s3836_s11 = sshll.u32 %s6009_s30, 4  ;;  %s3837_s11 = int_to_ptr.vmem [resolvable:$true] %s3836_s11 }
 0xcbc   :  { %v2641_v36 = vld [vmem:[#allocation8 + $0x140] sm:$0xff]  ;;  %v5158_v16 = vpack.c.bf16 %v2614_v15, %v2601_v12  ;;  %v2627_v18 = vld [vmem:[#allocation8 + $0xd0] sm:$0xff]  ;;  %v2640_v19 = vld [vmem:[#allocation8 + $0x138] sm:$0xff]  ;;  %s5930_s15 = scalar_lea.vmem %s3837_s11, 896  ;;  %p5935_p13 = scmp.lt.s32.totalorder %s3837_s11, %s3837_s11 }
 0xcbd   :  { %v5160_v17 = vpack.c.bf16 %v2641_v36, %v2628_v14  ;;  %v2654_v20 = vld [vmem:[#allocation8 + $0x1a8] sm:$0xff]  ;;  %5157 = vmatprep.subr.bf16.mxu1 %v5156_v13  ;;  %v2667_v21 = vld [vmem:[#allocation8 + $0x210] sm:$0xff]  ;;  %v5162_v22 = vpack.c.bf16 %v2640_v19, %v2627_v18  ;;  %v2653_v23 = vld [vmem:[#allocation8 + $0x1a0] sm:$0xff]  ;;  %p5931_p12 = scmp.ne.s32.totalorder %s3837_s11, %s5930_s15  ;;  %p5936_p0 = scmp.lt.s32.totalorder %s5930_s15, %s5930_s15 }
 0xcbe   :  { %5159 = vmatpush1.bf16.msra.mxu1 %v5158_v16  ;;  %v2604_v37 = vld [vmem:[#allocation8 + $0x18] sm:$0xff]  ;;  %v2617_v24 = vld [vmem:[#allocation8 + $0x80] sm:$0xff]  ;;  %v5164_v25 = vpack.c.bf16 %v2667_v21, %v2654_v20  ;;  %v2666_v26 = vld [vmem:[#allocation8 + $0x208] sm:$0xff] }
 0xcbf   :  { %5161 = vmatprep.subr.bf16.mxu1 %v5160_v17  ;;  %v5188_v27 = vpack.c.bf16 %v2617_v24, %v2604_v37  ;;  %v2603_v28 = vld [vmem:[#allocation8 + $0x10] sm:$0xff]  ;;  %v2616_v29 = vld [vmem:[#allocation8 + $0x78] sm:$0xff]  ;;  %v2693_v30 = vld [vmem:[#allocation8 + $0x2e0] sm:$0xff]  ;;  %v5166_v34 = vpack.c.bf16 %v2666_v26, %v2653_v23  ;;  %p5937_p1 = por %p5936_p0, %p5935_p13 }
 0xcc0   :  { %v2680_v41 = vld [vmem:[#allocation8 + $0x278] sm:$0xff]  ;;  %v5190_v31 = vpack.c.bf16 %v2616_v29, %v2603_v28  ;;  %v2630_v32 = vld [vmem:[#allocation8 + $0xe8] sm:$0xff]  ;;  %v2643_v33 = vld [vmem:[#allocation8 + $0x150] sm:$0xff] }
 0xcc1   :  { %5189 = vmatprep.subr.bf16.mxu0 %v5188_v27  ;;  %v2679_v35 = vld [vmem:[#allocation8 + $0x270] sm:$0xff]  ;;  %v5192_v38 = vpack.c.bf16 %v2643_v33, %v2630_v32  ;;  %v2629_v39 = vld [vmem:[#allocation8 + $0xe0] sm:$0xff]  ;;  %v2642_v40 = vld [vmem:[#allocation8 + $0x148] sm:$0xff]  ;;  %v5168_v42 = vpack.c.bf16 %v2693_v30, %v2680_v41  ;;  %p5938_p2 = pnand %p5937_p1, %p5931_p12 }
 0xcc2   :  { %5163 = vmatpush1.bf16.msra.mxu1 %v5162_v22  ;;  %5191 = vmatpush1.bf16.msra.mxu0 %v5190_v31  ;;  %v2692_v43 = vld [vmem:[#allocation8 + $0x2d8] sm:$0xff]  ;;  %v5194_v44 = vpack.c.bf16 %v2642_v40, %v2629_v39  ;;  %v2669_v46 = vld [vmem:[#allocation8 + $0x220] sm:$0xff]  ;;  %v2706_v47 = vld [vmem:[#allocation8 + $0x348] sm:$0xff] }
 0xcc3   :  { %5165 = vmatprep.subr.bf16.mxu1 %v5164_v25  ;;  %v2656_v45 = vld [vmem:[#allocation8 + $0x1b8] sm:$0xff]  ;;  %5193 = vmatprep.subr.bf16.mxu0 %v5192_v38  ;;  %v2719_v48 = vld [vmem:[#allocation8 + $0x3b0] sm:$0xff]  ;;  %v5170_v52 = vpack.c.bf16 %v2692_v43, %v2679_v35  ;;  %v2705_v53 = vld [vmem:[#allocation8 + $0x340] sm:$0xff] }
 0xcc4   :  { %v5196_v49 = vpack.c.bf16 %v2669_v46, %v2656_v45  ;;  %v2655_v50 = vld [vmem:[#allocation8 + $0x1b0] sm:$0xff]  ;;  %v2668_v51 = vld [vmem:[#allocation8 + $0x218] sm:$0xff]  ;;  %v2682_v55 = vld [vmem:[#allocation8 + $0x288] sm:$0xff]  ;;  %v5172_v57 = vpack.c.bf16 %v2719_v48, %v2706_v47 }
 0xcc5   :  { %v5198_v54 = vpack.c.bf16 %v2668_v51, %v2655_v50  ;;  %v2695_v56 = vld [vmem:[#allocation8 + $0x2f0] sm:$0xff]  ;;  %v2718_v58 = vld [vmem:[#allocation8 + $0x3a8] sm:$0xff]  ;;  %v2681_v60 = vld [vmem:[#allocation8 + $0x280] sm:$0xff] }
 0xcc6   :  { %5167 = vmatpush1.bf16.msra.mxu1 %v5166_v34  ;;  %5195 = vmatpush1.bf16.msra.mxu0 %v5194_v44  ;;  %v5200_v59 = vpack.c.bf16 %v2695_v56, %v2682_v55  ;;  %v2694_v61 = vld [vmem:[#allocation8 + $0x2e8] sm:$0xff]  ;;  %v2732_v62 = vld [vmem:[#allocation8 + $0x418] sm:$0xff]  ;;  %v2745_v1 = vld [vmem:[#allocation8 + $0x480] sm:$0xff]  ;;  %v5174_v4 = vpack.c.bf16 %v2718_v58, %v2705_v53 }
 0xcc7   :  { %5169 = vmatprep.subr.bf16.mxu1 %v5168_v42  ;;  %5197 = vmatprep.subr.bf16.mxu0 %v5196_v49  ;;  %v2708_v2 = vld [vmem:[#allocation8 + $0x358] sm:$0xff]  ;;  %v2721_v3 = vld [vmem:[#allocation8 + $0x3c0] sm:$0xff]  ;;  %v2731_v5 = vld [vmem:[#allocation8 + $0x410] sm:$0xff]  ;;  %v5202_v10 = vpack.c.bf16 %v2694_v61, %v2681_v60  ;;  %v5176_v12 = vpack.c.bf16 %v2745_v1, %v2732_v62 }
 0xcc8   :  { %v2744_v63 = vld [vmem:[#allocation8 + $0x478] sm:$0xff]  ;;  %v2758_v13 = vld [vmem:[#allocation8 + $0x4e8] sm:$0xff]  ;;  %v5204_v15 = vpack.c.bf16 %v2721_v3, %v2708_v2  ;;  %v2707_v14 = vld [vmem:[#allocation8 + $0x350] sm:$0xff] }
 0xcc9   :  { %v2720_v36 = vld [vmem:[#allocation8 + $0x3b8] sm:$0xff]  ;;  %v2771_v16 = vld [vmem:[#allocation8 + $0x550] sm:$0xff]  ;;  %v2734_v17 = vld [vmem:[#allocation8 + $0x428] sm:$0xff]  ;;  %v5178_v19 = vpack.c.bf16 %v2744_v63, %v2731_v5 }
 0xcca   :  { %5171 = vmatpush1.bf16.msra.mxu1 %v5170_v52  ;;  %5199 = vmatpush1.bf16.msra.mxu0 %v5198_v54  ;;  %v2747_v18 = vld [vmem:[#allocation8 + $0x490] sm:$0xff]  ;;  %v2757_v20 = vld [vmem:[#allocation8 + $0x4e0] sm:$0xff]  ;;  %v2770_v21 = vld [vmem:[#allocation8 + $0x548] sm:$0xff]  ;;  %v5206_v22 = vpack.c.bf16 %v2720_v36, %v2707_v14  ;;  %v5180_v23 = vpack.c.bf16 %v2771_v16, %v2758_v13 }
 0xccb   :  { %5173 = vmatprep.subr.bf16.mxu1 %v5172_v57  ;;  %5201 = vmatprep.subr.bf16.mxu0 %v5200_v59  ;;  %v2784_v37 = vld [vmem:[#allocation8 + $0x5b8] sm:$0xff]  ;;  %v5208_v24 = vpack.c.bf16 %v2747_v18, %v2734_v17  ;;  %v2733_v25 = vld [vmem:[#allocation8 + $0x420] sm:$0xff]  ;;  %v2746_v26 = vld [vmem:[#allocation8 + $0x488] sm:$0xff]  ;;  %v5182_v41 = vpack.c.bf16 %v2770_v21, %v2757_v20 }
 0xccc   :  { %v2797_v27 = vld [vmem:[#allocation8 + $0x620] sm:$0xff]  ;;  %v2760_v28 = vld [vmem:[#allocation8 + $0x4f8] sm:$0xff]  ;;  %v2783_v30 = vld [vmem:[#allocation8 + $0x5b0] sm:$0xff]  ;;  %v5210_v32 = vpack.c.bf16 %v2746_v26, %v2733_v25 }
 0xccd   :  { %v2773_v29 = vld [vmem:[#allocation8 + $0x560] sm:$0xff]  ;;  %v2796_v31 = vld [vmem:[#allocation8 + $0x618] sm:$0xff]  ;;  %v5184_v33 = vpack.c.bf16 %v2797_v27, %v2784_v37  ;;  %v2606_v34 = vld [vmem:[#allocation8 + $0x28] sm:$0xff] }
 0xcce   :  { %5175 = vmatpush1.bf16.msra.mxu1 %v5174_v4  ;;  %5203 = vmatpush1.bf16.msra.mxu0 %v5202_v10  ;;  %v5212_v35 = vpack.c.bf16 %v2773_v29, %v2760_v28  ;;  %v2759_v38 = vld [vmem:[#allocation8 + $0x4f0] sm:$0xff]  ;;  %v2772_v39 = vld [vmem:[#allocation8 + $0x558] sm:$0xff]  ;;  %v2786_v42 = vld [vmem:[#allocation8 + $0x5c8] sm:$0xff]  ;;  %v5186_v44 = vpack.c.bf16 %v2796_v31, %v2783_v30 }
 0xccf   :  { %5177 = vmatprep.subr.bf16.mxu1 %v5176_v12  ;;  %5205 = vmatprep.subr.bf16.mxu0 %v5204_v15  ;;  %v2619_v40 = vld [vmem:[#allocation8 + $0x90] sm:$0xff]  ;;  %v5214_v45 = vpack.c.bf16 %v2772_v39, %v2759_v38  ;;  %v2605_v47 = vld [vmem:[#allocation8 + $0x20] sm:$0xff]  ;;  %v2618_v48 = vld [vmem:[#allocation8 + $0x88] sm:$0xff] }
 0xcd0   :  { %v2799_v43 = vld [vmem:[#allocation8 + $0x630] sm:$0xff]  ;;  %v5220_v46 = vpack.c.bf16 %v2619_v40, %v2606_v34  ;;  %v2632_v49 = vld [vmem:[#allocation8 + $0xf8] sm:$0xff]  ;;  %v2645_v51 = vld [vmem:[#allocation8 + $0x160] sm:$0xff]  ;;  %v5222_v56 = vpack.c.bf16 %v2618_v48, %v2605_v47 }
 0xcd1   :  { %v5216_v50 = vpack.c.bf16 %v2799_v43, %v2786_v42  ;;  %v2785_v52 = vld [vmem:[#allocation8 + $0x5c0] sm:$0xff]  ;;  %v2798_v53 = vld [vmem:[#allocation8 + $0x628] sm:$0xff]  ;;  %v2608_v54 = vld [vmem:[#allocation8 + $0x38] sm:$0xff]  ;;  %v5224_v57 = vpack.c.bf16 %v2645_v51, %v2632_v49 }
 0xcd2   :  { %5179 = vmatpush1.bf16.msra.mxu1 %v5178_v19  ;;  %5207 = vmatpush1.bf16.msra.mxu0 %v5206_v22  ;;  %v2621_v55 = vld [vmem:[#allocation8 + $0xa0] sm:$0xff]  ;;  %v2631_v58 = vld [vmem:[#allocation8 + $0xf0] sm:$0xff]  ;;  %v2644_v59 = vld [vmem:[#allocation8 + $0x158] sm:$0xff]  ;;  %v5218_v60 = vpack.c.bf16 %v2798_v53, %v2785_v52 }
 0xcd3   :  { %5181 = vmatprep.subr.bf16.mxu1 %v5180_v23  ;;  %5209 = vmatprep.subr.bf16.mxu0 %v5208_v24  ;;  %v2658_v61 = vld [vmem:[#allocation8 + $0x1c8] sm:$0xff]  ;;  %v2671_v62 = vld [vmem:[#allocation8 + $0x230] sm:$0xff]  ;;  %v5252_v1 = vpack.c.bf16 %v2621_v55, %v2608_v54  ;;  %v2620_v3 = vld [vmem:[#allocation8 + $0x98] sm:$0xff]  ;;  %v5226_v63 = vpack.c.bf16 %v2644_v59, %v2631_v58 }
 0xcd4   :  { %v2607_v2 = vld [vmem:[#allocation8 + $0x30] sm:$0xff]  ;;  %v2634_v4 = vld [vmem:[#allocation8 + $0x108] sm:$0xff]  ;;  %v5228_v10 = vpack.c.bf16 %v2671_v62, %v2658_v61  ;;  %v2657_v12 = vld [vmem:[#allocation8 + $0x1c0] sm:$0xff] }
 0xcd5   :  { %v2647_v5 = vld [vmem:[#allocation8 + $0x170] sm:$0xff]  ;;  %v2670_v13 = vld [vmem:[#allocation8 + $0x228] sm:$0xff]  ;;  %v2684_v15 = vld [vmem:[#allocation8 + $0x298] sm:$0xff]  ;;  %v5254_v14 = vpack.c.bf16 %v2620_v3, %v2607_v2 }
 0xcd6   :  { %5183 = vmatpush1.bf16.msra.mxu1 %v5182_v41  ;;  %5211 = vmatpush1.bf16.msra.mxu0 %v5210_v32  ;;  %v2697_v36 = vld [vmem:[#allocation8 + $0x300] sm:$0xff]  ;;  %v5256_v16 = vpack.c.bf16 %v2647_v5, %v2634_v4  ;;  %v2646_v18 = vld [vmem:[#allocation8 + $0x168] sm:$0xff]  ;;  %v2660_v19 = vld [vmem:[#allocation8 + $0x1d8] sm:$0xff]  ;;  %v5230_v21 = vpack.c.bf16 %v2670_v13, %v2657_v12 }
 0xcd7   :  { %5185 = vmatprep.subr.bf16.mxu1 %v5184_v33  ;;  %5213 = vmatprep.subr.bf16.mxu0 %v5212_v35  ;;  %v2633_v17 = vld [vmem:[#allocation8 + $0x100] sm:$0xff]  ;;  %v5232_v22 = vpack.c.bf16 %v2697_v36, %v2684_v15  ;;  %v2683_v23 = vld [vmem:[#allocation8 + $0x290] sm:$0xff]  ;;  %v2696_v37 = vld [vmem:[#allocation8 + $0x2f8] sm:$0xff] }
 0xcd8   :  { %v2673_v20 = vld [vmem:[#allocation8 + $0x240] sm:$0xff]  ;;  %v2710_v24 = vld [vmem:[#allocation8 + $0x368] sm:$0xff]  ;;  %v5258_v25 = vpack.c.bf16 %v2646_v18, %v2633_v17  ;;  %v2723_v26 = vld [vmem:[#allocation8 + $0x3d0] sm:$0xff]  ;;  %v5234_v31 = vpack.c.bf16 %v2696_v37, %v2683_v23 }
 0xcd9   :  { %v5260_v27 = vpack.c.bf16 %v2673_v20, %v2660_v19  ;;  %v2659_v28 = vld [vmem:[#allocation8 + $0x1d0] sm:$0xff]  ;;  %v2672_v29 = vld [vmem:[#allocation8 + $0x238] sm:$0xff]  ;;  %v2686_v41 = vld [vmem:[#allocation8 + $0x2a8] sm:$0xff]  ;;  %v5236_v32 = vpack.c.bf16 %v2723_v26, %v2710_v24 }
 0xcda   :  { %5187 = vmatpush1.bf16.msra.mxu1 %v5186_v44  ;;  %5215 = vmatpush1.bf16.msra.mxu0 %v5214_v45  ;;  %v2699_v30 = vld [vmem:[#allocation8 + $0x310] sm:$0xff]  ;;  %v2709_v33 = vld [vmem:[#allocation8 + $0x360] sm:$0xff]  ;;  %v2722_v34 = vld [vmem:[#allocation8 + $0x3c8] sm:$0xff]  ;;  %v5262_v38 = vpack.c.bf16 %v2672_v29, %v2659_v28 }
 0xcdb   :  { %5221 = vmatprep.subr.bf16.mxu1 %v5220_v46  ;;  %5217 = vmatprep.subr.bf16.mxu0 %v5216_v50  ;;  %v2736_v35 = vld [vmem:[#allocation8 + $0x438] sm:$0xff]  ;;  %v2749_v39 = vld [vmem:[#allocation8 + $0x4a0] sm:$0xff]  ;;  %v5264_v40 = vpack.c.bf16 %v2699_v30, %v2686_v41  ;;  %v2698_v43 = vld [vmem:[#allocation8 + $0x308] sm:$0xff]  ;;  %v5238_v46 = vpack.c.bf16 %v2722_v34, %v2709_v33 }
 0xcdc   :  { %v2685_v42 = vld [vmem:[#allocation8 + $0x2a0] sm:$0xff]  ;;  %v2712_v44 = vld [vmem:[#allocation8 + $0x378] sm:$0xff]  ;;  %v5240_v47 = vpack.c.bf16 %v2749_v39, %v2736_v35  ;;  %v2735_v48 = vld [vmem:[#allocation8 + $0x430] sm:$0xff] }
 0xcdd   :  { %2874 = vmatmul.mubr.f32.vlgmr.msra.gmra.mrb[26].mxu1 %v6593_v6  ;;  %v2725_v45 = vld [vmem:[#allocation8 + $0x3e0] sm:$0xff]  ;;  %v2748_v49 = vld [vmem:[#allocation8 + $0x498] sm:$0xff]  ;;  %v2762_v50 = vld [vmem:[#allocation8 + $0x508] sm:$0xff]  ;;  %v5266_v51 = vpack.c.bf16 %v2698_v43, %v2685_v42 }
 0xcde   :  { %5223 = vmatpush1.bf16.msra.mxu1 %v5222_v56  ;;  %2879 = vmatprep.mubr.f32.mxu1 %v6003_v0  ;;  %v2775_v52 = vld [vmem:[#allocation8 + $0x570] sm:$0xff]  ;;  %v5268_v53 = vpack.c.bf16 %v2725_v45, %v2712_v44  ;;  %v2724_v55 = vld [vmem:[#allocation8 + $0x3d8] sm:$0xff]  ;;  %v2738_v56 = vld [vmem:[#allocation8 + $0x448] sm:$0xff]  ;;  %v5242_v58 = vpack.c.bf16 %v2748_v49, %v2735_v48 }
 0xcdf   :  { %5225 = vmatprep.subr.bf16.mxu1 %v5224_v57  ;;  %5219 = vmatpush1.bf16.msra.mxu0 %v5218_v60  ;;  %v2711_v54 = vld [vmem:[#allocation8 + $0x370] sm:$0xff]  ;;  %v5244_v59 = vpack.c.bf16 %v2775_v52, %v2762_v50  ;;  %v2761_v60 = vld [vmem:[#allocation8 + $0x500] sm:$0xff]  ;;  %v2774_v61 = vld [vmem:[#allocation8 + $0x568] sm:$0xff] }
 0xce0   :  { %5253 = vmatprep.subr.bf16.mxu0 %v5252_v1  ;;  %v2751_v57 = vld [vmem:[#allocation8 + $0x4b0] sm:$0xff]  ;;  %v2788_v62 = vld [vmem:[#allocation8 + $0x5d8] sm:$0xff]  ;;  %v5270_v1 = vpack.c.bf16 %v2724_v55, %v2711_v54  ;;  %v2801_v2 = vld [vmem:[#allocation8 + $0x640] sm:$0xff]  ;;  %v5246_v12 = vpack.c.bf16 %v2774_v61, %v2761_v60 }
 0xce1   :  { %2880 = vmatmul.mubr.f32.gmra.mrb[28].mxu1 %v6595_v7  ;;  %v5272_v3 = vpack.c.bf16 %v2751_v57, %v2738_v56  ;;  %v2737_v4 = vld [vmem:[#allocation8 + $0x440] sm:$0xff]  ;;  %v2750_v5 = vld [vmem:[#allocation8 + $0x4a8] sm:$0xff]  ;;  %v5248_v13 = vpack.c.bf16 %v2801_v2, %v2788_v62  ;;  %v2787_v15 = vld [vmem:[#allocation8 + $0x5d0] sm:$0xff] }
 0xce2   :  { %5227 = vmatpush1.bf16.msra.mxu1 %v5226_v63  ;;  %2963 = vmatmul.mubr.f32.vlgmr.msra.gmra.mrb[34].mxu0 %v6593_v6  ;;  %v2764_v63 = vld [vmem:[#allocation8 + $0x518] sm:$0xff]  ;;  %v5274_v36 = vpack.c.bf16 %v2750_v5, %v2737_v4  ;;  %v2623_v17 = vld [vmem:[#allocation8 + $0xb0] sm:$0xff]  ;;  %v2609_v24 = vld [vmem:[#allocation8 + $0x40] sm:$0xff] }
 0xce3   :  { %5229 = vmatprep.subr.bf16.mxu1 %v5228_v10  ;;  %5255 = vmatpush1.bf16.msra.mxu0 %v5254_v14  ;;  %v2777_v10 = vld [vmem:[#allocation8 + $0x580] sm:$0xff]  ;;  %v2800_v14 = vld [vmem:[#allocation8 + $0x638] sm:$0xff]  ;;  %v2763_v19 = vld [vmem:[#allocation8 + $0x510] sm:$0xff] }
 0xce4   :  { %2968 = vmatprep.mubr.f32.mxu0 %v6003_v0  ;;  %5257 = vmatprep.subr.bf16.mxu0 %v5256_v16  ;;  %v2610_v16 = vld [vmem:[#allocation8 + $0x48] sm:$0xff]  ;;  %v5276_v18 = vpack.c.bf16 %v2777_v10, %v2764_v63  ;;  %v2776_v20 = vld [vmem:[#allocation8 + $0x578] sm:$0xff]  ;;  %v5250_v23 = vpack.c.bf16 %v2800_v14, %v2787_v15  ;;  %v2649_v28 = vld [vmem:[#allocation8 + $0x180] sm:$0xff] }
 0xce5   :  { %2885 = vmatprep.mubr.f32.mxu1 %v6003_v0  ;;  %v5284_v37 = vpack.c.bf16 %v2623_v17, %v2610_v16  ;;  %v5278_v26 = vpack.c.bf16 %v2776_v20, %v2763_v19  ;;  %v2789_v41 = vld [vmem:[#allocation8 + $0x5e0] sm:$0xff]  ;;  %v2802_v30 = vld [vmem:[#allocation8 + $0x648] sm:$0xff]  ;;  %v2635_v35 = vld [vmem:[#allocation8 + $0x110] sm:$0xff] }
 0xce6   :  { %5231 = vmatpush1.bf16.msra.mxu1 %v5230_v21  ;;  %2969 = vmatmul.mubr.f32.gmra.mrb[36].mxu0 %v6595_v7  ;;  %v2790_v21 = vld [vmem:[#allocation8 + $0x5e8] sm:$0xff]  ;;  %v5282_v39 = vpack.c.bf16 %v2802_v30, %v2789_v41  ;;  %v2675_v42 = vld [vmem:[#allocation8 + $0x250] sm:$0xff]  ;;  %v2624_v45 = vld [vmem:[#allocation8 + $0xb8] sm:$0xff] }
 0xce7   :  { %5233 = vmatprep.subr.bf16.mxu1 %v5232_v22  ;;  %5259 = vmatpush1.bf16.msra.mxu0 %v5258_v25  ;;  %v2803_v22 = vld [vmem:[#allocation8 + $0x650] sm:$0xff]  ;;  %v2622_v25 = vld [vmem:[#allocation8 + $0xa8] sm:$0xff]  ;;  %v2661_v50 = vld [vmem:[#allocation8 + $0x1e0] sm:$0xff] }
 0xce8   :  { %5261 = vmatprep.subr.bf16.mxu0 %v5260_v27  ;;  %2886 = vmatmul.mubr.f32.gmra.mrb[30].mxu1 %v6597_v8  ;;  %v2636_v27 = vld [vmem:[#allocation8 + $0x118] sm:$0xff]  ;;  %v5280_v29 = vpack.c.bf16 %v2803_v22, %v2790_v21  ;;  %v5286_v33 = vpack.c.bf16 %v2622_v25, %v2609_v24  ;;  %v2611_v44 = vld [vmem:[#allocation8 + $0x50] sm:$0xff]  ;;  %v2637_v56 = vld [vmem:[#allocation8 + $0x120] sm:$0xff] }
 0xce9   :  { %2891 = vmatprep.mubr.f32.mxu1 %v6003_v0  ;;  %2974 = vmatprep.mubr.f32.mxu0 %v6003_v0  ;;  %v5288_v34 = vpack.c.bf16 %v2649_v28, %v2636_v27  ;;  %v2651_v48 = vld [vmem:[#allocation8 + $0x190] sm:$0xff]  ;;  %v2688_v52 = vld [vmem:[#allocation8 + $0x2b8] sm:$0xff]  ;;  %v5318_v54 = vpack.c.bf16 %v2624_v45, %v2611_v44  ;;  %v2650_v57 = vld [vmem:[#allocation8 + $0x188] sm:$0xff] }
 0xcea   :  { %5235 = vmatpush1.bf16.msra.mxu1 %v5234_v31  ;;  %2975 = vmatmul.mubr.f32.gmra.mrb[38].mxu0 %v6597_v8  ;;  %v2612_v31 = vld [vmem:[#allocation8 + $0x58] sm:$0xff]  ;;  %v2677_v60 = vld [vmem:[#allocation8 + $0x260] sm:$0xff]  ;;  %v2687_v62 = vld [vmem:[#allocation8 + $0x2b0] sm:$0xff]  ;;  %v5322_v4 = vpack.c.bf16 %v2650_v57, %v2637_v56 }
 0xceb   :  { %5237 = vmatprep.subr.bf16.mxu1 %v5236_v32  ;;  %5263 = vmatpush1.bf16.msra.mxu0 %v5262_v38  ;;  %v2625_v32 = vld [vmem:[#allocation8 + $0xc0] sm:$0xff]  ;;  %v2648_v38 = vld [vmem:[#allocation8 + $0x178] sm:$0xff]  ;;  %v2714_v2 = vld [vmem:[#allocation8 + $0x388] sm:$0xff] }
 0xcec   :  { %5265 = vmatprep.subr.bf16.mxu0 %v5264_v40  ;;  %2892 = vmatmul.mubr.f32.gmra.mrb[32].mxu1 %v6599_v9  ;;  %v2662_v40 = vld [vmem:[#allocation8 + $0x1e8] sm:$0xff]  ;;  %v5316_v43 = vpack.c.bf16 %v2625_v32, %v2612_v31  ;;  %v2663_v63 = vld [vmem:[#allocation8 + $0x1f0] sm:$0xff]  ;;  %v2676_v10 = vld [vmem:[#allocation8 + $0x258] sm:$0xff] }
 0xced   :  { %3051 = vmatprep.mubr.f32.mxu1 %v6003_v0  ;;  %2980 = vmatprep.mubr.f32.mxu0 %v6003_v0  ;;  %v5292_v49 = vpack.c.bf16 %v2675_v42, %v2662_v40  ;;  %v2703_v15 = vld [vmem:[#allocation8 + $0x330] sm:$0xff]  ;;  %v2726_v16 = vld [vmem:[#allocation8 + $0x3e8] sm:$0xff]  ;;  %v2740_v17 = vld [vmem:[#allocation8 + $0x458] sm:$0xff]  ;;  %v5326_v19 = vpack.c.bf16 %v2676_v10, %v2663_v63 }
 0xcee   :  { %5239 = vmatpush1.bf16.msra.mxu1 %v5238_v46  ;;  %2981 = vmatmul.mubr.f32.gmra.mrb[40].mxu0 %v6599_v9  ;;  %v5290_v46 = vpack.c.bf16 %v2648_v38, %v2635_v35  ;;  %v2689_v21 = vld [vmem:[#allocation8 + $0x2c0] sm:$0xff]  ;;  %v2702_v22 = vld [vmem:[#allocation8 + $0x328] sm:$0xff]  ;;  %v2752_v27 = vld [vmem:[#allocation8 + $0x4b8] sm:$0xff] }
 0xcef   :  { %5241 = vmatprep.subr.bf16.mxu1 %v5240_v47  ;;  %5267 = vmatpush1.bf16.msra.mxu0 %v5266_v51  ;;  %v2638_v47 = vld [vmem:[#allocation8 + $0x128] sm:$0xff]  ;;  %v2729_v24 = vld [vmem:[#allocation8 + $0x400] sm:$0xff]  ;;  %v5330_v41 = vpack.c.bf16 %v2702_v22, %v2689_v21  ;;  %v2715_v31 = vld [vmem:[#allocation8 + $0x390] sm:$0xff] }
 0xcf0   :  { %5269 = vmatprep.subr.bf16.mxu0 %v5268_v53  ;;  %3140 = vmatprep.mubr.f32.mxu0 %v6003_v0  ;;  %v2674_v51 = vld [vmem:[#allocation8 + $0x248] sm:$0xff]  ;;  %v2701_v53 = vld [vmem:[#allocation8 + $0x320] sm:$0xff]  ;;  %v5320_v55 = vpack.c.bf16 %v2651_v48, %v2638_v47  ;;  %v2728_v32 = vld [vmem:[#allocation8 + $0x3f8] sm:$0xff] }
 0xcf1   :  { %v5296_v61 = vpack.c.bf16 %v2701_v53, %v2688_v52  ;;  %v2766_v28 = vld [vmem:[#allocation8 + $0x528] sm:$0xff]  ;;  %v2755_v35 = vld [vmem:[#allocation8 + $0x4d0] sm:$0xff]  ;;  %v2792_v42 = vld [vmem:[#allocation8 + $0x5f8] sm:$0xff]  ;;  %v5334_v44 = vpack.c.bf16 %v2728_v32, %v2715_v31 }
 0xcf2   :  { %5243 = vmatpush1.bf16.msra.mxu1 %v5242_v58  ;;  %v5294_v58 = vpack.c.bf16 %v2674_v51, %v2661_v50  ;;  %v2778_v40 = vld [vmem:[#allocation8 + $0x588] sm:$0xff]  ;;  %v2781_v50 = vld [vmem:[#allocation8 + $0x5a0] sm:$0xff]  ;;  %v2791_v52 = vld [vmem:[#allocation8 + $0x5f0] sm:$0xff] }
 0xcf3   :  { %5245 = vmatprep.subr.bf16.mxu1 %v5244_v59  ;;  %5271 = vmatpush1.bf16.msra.mxu0 %v5270_v1  ;;  %v2664_v59 = vld [vmem:[#allocation8 + $0x1f8] sm:$0xff]  ;;  %v2754_v47 = vld [vmem:[#allocation8 + $0x4c8] sm:$0xff]  ;;  %v2793_v63 = vld [vmem:[#allocation8 + $0x600] sm:$0xff] }
 0xcf4   :  { %5273 = vmatprep.subr.bf16.mxu0 %v5272_v3  ;;  %v2700_v1 = vld [vmem:[#allocation8 + $0x318] sm:$0xff]  ;;  %v2727_v3 = vld [vmem:[#allocation8 + $0x3f0] sm:$0xff]  ;;  %v5324_v5 = vpack.c.bf16 %v2677_v60, %v2664_v59  ;;  %v2626_v56 = vld [vmem:[#allocation8 + $0xc8] sm:$0xff] }
 0xcf5   :  { %v5300_v14 = vpack.c.bf16 %v2727_v3, %v2714_v2  ;;  %v2804_v53 = vld [vmem:[#allocation8 + $0x658] sm:$0xff]  ;;  %v2639_v3 = vld [vmem:[#allocation8 + $0x130] sm:$0xff]  ;;  %v2806_v10 = vld [vmem:[#allocation8 + $0x668] sm:$0xff] }
 0xcf6   :  { %5247 = vmatpush1.bf16.msra.mxu1 %v5246_v12  ;;  %v5298_v12 = vpack.c.bf16 %v2700_v1, %v2687_v62  ;;  %v2780_v59 = vld [vmem:[#allocation8 + $0x598] sm:$0xff]  ;;  %v5314_v60 = vpack.c.bf16 %v2804_v53, %v2791_v52  ;;  %v2807_v62 = vld [vmem:[#allocation8 + $0x670] sm:$0xff] }
 0xcf7   :  { %5249 = vmatprep.subr.bf16.mxu1 %v5248_v13  ;;  %5275 = vmatpush1.bf16.msra.mxu0 %v5274_v36  ;;  %v2690_v13 = vld [vmem:[#allocation8 + $0x2c8] sm:$0xff]  ;;  %v2713_v36 = vld [vmem:[#allocation8 + $0x380] sm:$0xff]  ;;  %v2743_v22 = vld [vmem:[#allocation8 + $0x470] sm:$0xff] }
 0xcf8   :  { %5277 = vmatprep.subr.bf16.mxu0 %v5276_v18  ;;  %v2753_v18 = vld [vmem:[#allocation8 + $0x4c0] sm:$0xff]  ;;  %v5328_v20 = vpack.c.bf16 %v2703_v15, %v2690_v13  ;;  %v5346_v13 = vpack.c.bf16 %v2806_v10, %v2793_v63 }
 0xcf9   :  { %v5304_v25 = vpack.c.bf16 %v2753_v18, %v2740_v17  ;;  %v2665_v15 = vld [vmem:[#allocation8 + $0x200] sm:$0xff]  ;;  %v2704_v17 = vld [vmem:[#allocation8 + $0x338] sm:$0xff] }
 0xcfa   :  { %5251 = vmatpush1.bf16.msra.mxu1 %v5250_v23  ;;  %v5302_v23 = vpack.c.bf16 %v2726_v16, %v2713_v36  ;;  %v2691_v16 = vld [vmem:[#allocation8 + $0x2d0] sm:$0xff] }
 0xcfb   :  { %5285 = vmatprep.subr.bf16.mxu1 %v5284_v37  ;;  %5279 = vmatpush1.bf16.msra.mxu0 %v5278_v26  ;;  %v2716_v37 = vld [vmem:[#allocation8 + $0x398] sm:$0xff]  ;;  %v2739_v26 = vld [vmem:[#allocation8 + $0x450] sm:$0xff]  ;;  %v5360_v18 = vpack.c.bf16 %v2704_v17, %v2691_v16 }
 0xcfc   :  { %5281 = vmatprep.subr.bf16.mxu0 %v5280_v29  ;;  %v2779_v29 = vld [vmem:[#allocation8 + $0x590] sm:$0xff]  ;;  %v5332_v30 = vpack.c.bf16 %v2729_v24, %v2716_v37  ;;  %v2769_v24 = vld [vmem:[#allocation8 + $0x540] sm:$0xff] }
 0xcfd   :  { %3052 = vmatmul.mubr.f32.vlgmr.msra.gmra.mrb[34].mxu1 %v6593_v6  ;;  %v5308_v38 = vpack.c.bf16 %v2779_v29, %v2766_v28  ;;  %v2808_v28 = vld [vmem:[#allocation8 + $0x678] sm:$0xff] }
 0xcfe   :  { %5287 = vmatpush1.bf16.msra.mxu1 %v5286_v33  ;;  %3057 = vmatprep.mubr.f32.mxu1 %v6003_v0  ;;  %v5306_v33 = vpack.c.bf16 %v2752_v27, %v2739_v26  ;;  %v2795_v27 = vld [vmem:[#allocation8 + $0x610] sm:$0xff] }
 0xcff   :  { %5289 = vmatprep.subr.bf16.mxu1 %v5288_v34  ;;  %5283 = vmatpush1.bf16.msra.mxu0 %v5282_v39  ;;  %v2742_v34 = vld [vmem:[#allocation8 + $0x468] sm:$0xff]  ;;  %v2765_v39 = vld [vmem:[#allocation8 + $0x520] sm:$0xff]  ;;  %v5376_v29 = vpack.c.bf16 %v2808_v28, %v2795_v27 }
 0xd00   :  { %5317 = vmatprep.subr.bf16.mxu0 %v5316_v43  ;;  %v2805_v43 = vld [vmem:[#allocation8 + $0x660] sm:$0xff]  ;;  %v5336_v45 = vpack.c.bf16 %v2755_v35, %v2742_v34  ;;  %v5310_v48 = vpack.c.bf16 %v2778_v40, %v2765_v39  ;;  %v3485_v28 = vld [vmem:[#allocation36 + $0x28] sm:$0xff] }
 0xd01   :  { %3058 = vmatmul.mubr.f32.gmra.mrb[36].mxu1 %v6595_v7  ;;  %v5312_v51 = vpack.c.bf16 %v2805_v43, %v2792_v42 }
 0xd02   :  { %5291 = vmatpush1.bf16.msra.mxu1 %v5290_v46  ;;  %3063 = vmatprep.mubr.f32.mxu1 %v6003_v0  ;;  %v2741_v46 = vld [vmem:[#allocation8 + $0x460] sm:$0xff] }
 0xd03   :  { %5293 = vmatprep.subr.bf16.mxu1 %v5292_v49  ;;  %3141 = vmatmul.mubr.f32.vlgmr.msra.gmra.mrb[42].mxu0 %v6593_v6  ;;  %v2768_v49 = vld [vmem:[#allocation8 + $0x538] sm:$0xff] }
 0xd04   :  { %5319 = vmatpush1.bf16.msra.mxu0 %v5318_v54  ;;  %3146 = vmatprep.mubr.f32.mxu0 %v6003_v0  ;;  %v5338_v54 = vpack.c.bf16 %v2754_v47, %v2741_v46  ;;  %v5340_v57 = vpack.c.bf16 %v2781_v50, %v2768_v49 }
 0xd05   :  { %3064 = vmatmul.mubr.f32.gmra.mrb[38].mxu1 %v6597_v8  ;;  %5321 = vmatprep.subr.bf16.mxu0 %v5320_v55  ;;  %v2613_v55 = vld [vmem:[#allocation8 + $0x60] sm:$0xff] }
 0xd06   :  { %5295 = vmatpush1.bf16.msra.mxu1 %v5294_v58  ;;  %3069 = vmatprep.mubr.f32.mxu1 %v6003_v0  ;;  %v2767_v58 = vld [vmem:[#allocation8 + $0x530] sm:$0xff]  ;;  %v5348_v1 = vpack.c.bf16 %v2626_v56, %v2613_v55 }
 0xd07   :  { %5297 = vmatprep.subr.bf16.mxu1 %v5296_v61  ;;  %3147 = vmatmul.mubr.f32.gmra.mrb[44].mxu0 %v6595_v7  ;;  %v2794_v61 = vld [vmem:[#allocation8 + $0x608] sm:$0xff]  ;;  %v5342_v2 = vpack.c.bf16 %v2780_v59, %v2767_v58 }
 0xd08   :  { %5323 = vmatpush1.bf16.msra.mxu0 %v5322_v4  ;;  %3152 = vmatprep.mubr.f32.mxu0 %v6003_v0  ;;  %v2652_v4 = vld [vmem:[#allocation8 + $0x198] sm:$0xff] }
 0xd09   :  { %3070 = vmatmul.mubr.f32.gmra.mrb[40].mxu1 %v6599_v9  ;;  %5325 = vmatprep.subr.bf16.mxu0 %v5324_v5  ;;  %v5344_v5 = vpack.c.bf16 %v2807_v62, %v2794_v61 }
 0xd0a   :  { %5299 = vmatpush1.bf16.msra.mxu1 %v5298_v12  ;;  %3229 = vmatprep.mubr.f32.mxu1 %v6003_v0  ;;  %v5352_v12 = vpack.c.bf16 %v2652_v4, %v2639_v3 }
 0xd0b   :  { %5301 = vmatprep.subr.bf16.mxu1 %v5300_v14  ;;  %3153 = vmatmul.mubr.f32.gmra.mrb[46].mxu0 %v6597_v8  ;;  %v2678_v14 = vld [vmem:[#allocation8 + $0x268] sm:$0xff] }
 0xd0c   :  { %5327 = vmatpush1.bf16.msra.mxu0 %v5326_v19  ;;  %3158 = vmatprep.mubr.f32.mxu0 %v6003_v0  ;;  %v5356_v36 = vpack.c.bf16 %v2678_v14, %v2665_v15  ;;  %v2717_v19 = vld [vmem:[#allocation8 + $0x3a0] sm:$0xff] }
 0xd0d   :  { %5329 = vmatprep.subr.bf16.mxu0 %v5328_v20  ;;  %v2730_v20 = vld [vmem:[#allocation8 + $0x408] sm:$0xff] }
 0xd0e   :  { %5303 = vmatpush1.bf16.msra.mxu1 %v5302_v23  ;;  %v5364_v21 = vpack.c.bf16 %v2730_v20, %v2717_v19  ;;  %v2756_v23 = vld [vmem:[#allocation8 + $0x4d8] sm:$0xff] }
 0xd0f   :  { %5305 = vmatprep.subr.bf16.mxu1 %v5304_v25  ;;  %3159 = vmatmul.mubr.f32.gmra.mrb[48].mxu0 %v6599_v9  ;;  %v5368_v37 = vpack.c.bf16 %v2756_v23, %v2743_v22  ;;  %v2782_v25 = vld [vmem:[#allocation8 + $0x5a8] sm:$0xff] }
 0xd10   :  { %5331 = vmatpush1.bf16.msra.mxu0 %v5330_v41  ;;  %3318 = vmatprep.mubr.f32.mxu0 %v6003_v0  ;;  %v5372_v26 = vpack.c.bf16 %v2782_v25, %v2769_v24 }
 0xd11   :  { %5333 = vmatprep.subr.bf16.mxu0 %v5332_v30 }
 0xd12   :  { %5307 = vmatpush1.bf16.msra.mxu1 %v5306_v33 }
 0xd13   :  { %5309 = vmatprep.subr.bf16.mxu1 %v5308_v38 }
 0xd14   :  { %5335 = vmatpush1.bf16.msra.mxu0 %v5334_v44 }
 0xd15   :  { %5337 = vmatprep.subr.bf16.mxu0 %v5336_v45 }
 0xd16   :  { %5311 = vmatpush1.bf16.msra.mxu1 %v5310_v48 }
 0xd17   :  { %5313 = vmatprep.subr.bf16.mxu1 %v5312_v51 }
 0xd18   :  { %5339 = vmatpush1.bf16.msra.mxu0 %v5338_v54 }
 0xd19   :  { %5341 = vmatprep.subr.bf16.mxu0 %v5340_v57 }
 0xd1a   :  { %5315 = vmatpush1.bf16.msra.mxu1 %v5314_v60 }
 0xd1b   :  { %5349 = vmatprep.subr.bf16.mxu1 %v5348_v1 }
 0xd1c   :  { %5343 = vmatpush1.bf16.msra.mxu0 %v5342_v2 }
 0xd1d   :  { %3230 = vmatmul.mubr.f32.vlgmr.msra.gmra.mrb[42].mxu1 %v6593_v6  ;;  %5345 = vmatprep.subr.bf16.mxu0 %v5344_v5 }
 0xd1e   :  { %3235 = vmatprep.mubr.f32.mxu1 %v6003_v0  ;;  %5351 = vmatpush3.bf16.msra.mxu1 %v5348_v1 }
 0xd1f   :  { %5353 = vmatprep.subr.bf16.mxu1 %v5352_v12 }
 0xd20   :  { %5347 = vmatpush1.bf16.msra.mxu0 %v5346_v13 }
 0xd21   :  { %3236 = vmatmul.mubr.f32.gmra.mrb[44].mxu1 %v6595_v7 }
 0xd22   :  { %3241 = vmatprep.mubr.f32.mxu1 %v6003_v0  ;;  %5355 = vmatpush3.bf16.msra.mxu1 %v5352_v12 }
 0xd23   :  { %3319 = vmatmul.mubr.f32.vlgmr.msra.gmra.mrb[50].mxu0 %v6593_v6  ;;  %5357 = vmatprep.subr.bf16.mxu1 %v5356_v36 }
 0xd24   :  { %3324 = vmatprep.mubr.f32.mxu0 %v6003_v0 }
 0xd25   :  { %3242 = vmatmul.mubr.f32.gmra.mrb[46].mxu1 %v6597_v8 }
 0xd26   :  { %3247 = vmatprep.mubr.f32.mxu1 %v6003_v0  ;;  %5359 = vmatpush3.bf16.msra.mxu1 %v5356_v36 }
 0xd27   :  { %3325 = vmatmul.mubr.f32.gmra.mrb[52].mxu0 %v6595_v7  ;;  %5361 = vmatprep.subr.bf16.mxu1 %v5360_v18 }
 0xd28   :  { %3330 = vmatprep.mubr.f32.mxu0 %v6003_v0 }
 0xd29   :  { %3248 = vmatmul.mubr.f32.gmra.mrb[48].mxu1 %v6599_v9 }
 0xd2a   :  { %5363 = vmatpush3.bf16.msra.mxu1 %v5360_v18  ;;  %4611 = vmatprep.mubr.f32.mxu1 %v6593_v6  ;;  %v3483_v6 = vld [vmem:[#allocation36 + $0x18] sm:$0xff] }
 0xd2b   :  { %3331 = vmatmul.mubr.f32.gmra.mrb[54].mxu0 %v6597_v8  ;;  %5365 = vmatprep.subr.bf16.mxu1 %v5364_v21 }
 0xd2c   :  { %3336 = vmatprep.mubr.f32.mxu0 %v6003_v0  ;;  %v3481_v0 = vld [vmem:[#allocation36 + $0x8] sm:$0xff] }
 0xd2e   :  { %5367 = vmatpush3.bf16.msra.mxu1 %v5364_v21 }
 0xd2f   :  { %3337 = vmatmul.mubr.f32.gmra.mrb[56].mxu0 %v6599_v9  ;;  %5369 = vmatprep.subr.bf16.mxu1 %v5368_v37 }
 0xd30   :  { %3646 = vmatprep.mubr.f32.mxu0 %v3481_v0 }
 0xd32   :  { %5371 = vmatpush3.bf16.msra.mxu1 %v5368_v37 }
 0xd33   :  { %5373 = vmatprep.subr.bf16.mxu1 %v5372_v26 }
 0xd36   :  { %5375 = vmatpush3.bf16.msra.mxu1 %v5372_v26  ;;  %v3480_v26 = vld [vmem:[#allocation36] sm:$0xff] }
 0xd37   :  { %5377 = vmatprep.subr.bf16.mxu1 %v5376_v29 }
 0xd3a   :  { %5379 = vmatpush3.bf16.msra.mxu1 %v5376_v29 }
 0xd3b   :  { %5412 = vmatprep.subr.bf16.mxu1 %v6005_v11 }
 0xd3d   :  { %4612 = vmatmul.mubr.f32.vlgmr.msra.gmra.mrb[50].mxu1 %v6595_v7 }
 0xd3e   :  { %4614 = vmatprep.mubr.f32.mxu1 %v6597_v8 }
 0xd41   :  { %4615 = vmatmul.mubr.f32.gmra.mrb[52].mxu1 %v6599_v9 }
 0xd42   :  { %3880 = vmatprep.mubr.msk.f32.mxu1 %vm3560_vm8, %v3483_v6 }
 0xdb0   :  { %v2875_v41 = vpop.f32.mrb[26].mxu1 }
 0xdb1   :  { %v2877_v30 = vpop.f32.mrb[27].mxu1 }
 0xdb4   :  { %v2881_v31 = vpop.f32.mrb[28].mxu1 }
 0xdb5   :  { %v5382_v32 = vpack.c.bf16 %v2881_v31, %v2875_v41  ;;  %v2883_v33 = vpop.f32.mrb[29].mxu1  ;;  %v2964_v34 = vpop.f32.mrb[34].mxu0  ;;  %v3484_v31 = vld [vmem:[#allocation36 + $0x20] sm:$0xff] }
 0xdb6   :  { %v5390_v35 = vpack.c.bf16 %v2883_v33, %v2877_v30  ;;  %v2966_v38 = vpop.f32.mrb[35].mxu0 }
 0xdb9   :  { %v2970_v39 = vpop.f32.mrb[36].mxu0 }
 0xdba   :  { %v5398_v7 = vpack.c.bf16 %v2970_v39, %v2964_v34  ;;  %v2972_v40 = vpop.f32.mrb[37].mxu0  ;;  %v3489_v34 = vld [vmem:[#allocation36 + $0x48] sm:$0xff] }
 0xdbb   :  { %v5406_v8 = vpack.c.bf16 %v2972_v40, %v2966_v38  ;;  %v2887_v42 = vpop.f32.mrb[30].mxu1  ;;  %v3493_v40 = vld [vmem:[#allocation36 + $0x68] sm:$0xff] }
 0xdbc   :  { %v2889_v9 = vpop.f32.mrb[31].mxu1 }
 0xdbd   :  { %v2976_v43 = vpop.f32.mrb[38].mxu0 }
 0xdbe   :  { %v2978_v44 = vpop.f32.mrb[39].mxu0 }
 0xdbf   :  { %v2893_v45 = vpop.f32.mrb[32].mxu1 }
 0xdc0   :  { %v5386_v46 = vpack.c.bf16 %v2893_v45, %v2887_v42  ;;  %v2895_v47 = vpop.f32.mrb[33].mxu1  ;;  %v3497_v45 = vld [vmem:[#allocation36 + $0x88] sm:$0xff] }
 0xdc1   :  { %v5394_v48 = vpack.c.bf16 %v2895_v47, %v2889_v9  ;;  %v2982_v49 = vpop.f32.mrb[40].mxu0  ;;  %v3501_v47 = vld [vmem:[#allocation36 + $0xa8] sm:$0xff] }
 0xdc2   :  { %v5402_v50 = vpack.c.bf16 %v2982_v49, %v2976_v43  ;;  %v2984_v51 = vpop.f32.mrb[41].mxu0  ;;  %v3505_v49 = vld [vmem:[#allocation36 + $0xc8] sm:$0xff] }
 0xdc3   :  { %v5410_v52 = vpack.c.bf16 %v2984_v51, %v2978_v44  ;;  %v3492_v44 = vld [vmem:[#allocation36 + $0x60] sm:$0xff] }
 0xdc4   :  { %v3504_v51 = vld [vmem:[#allocation36 + $0xc0] sm:$0xff] }
 0xdd0   :  { %v3053_v53 = vpop.f32.mrb[34].mxu1 }
 0xdd1   :  { %v3055_v54 = vpop.f32.mrb[35].mxu1 }
 0xdd4   :  { %v3059_v55 = vpop.f32.mrb[36].mxu1 }
 0xdd5   :  { %v5380_v56 = vpack.c.bf16 %v3059_v55, %v3053_v53  ;;  %v3061_v57 = vpop.f32.mrb[37].mxu1 }
 0xdd6   :  { %v5388_v58 = vpack.c.bf16 %v3061_v57, %v3055_v54  ;;  %v3142_v59 = vpop.f32.mrb[42].mxu0  ;;  %v3482_v57 = vld [vmem:[#allocation36 + $0x10] sm:$0xff] }
 0xdd7   :  { %5381 = vmatprep.subr.bf16.mxu0 %v5380_v56  ;;  %v3144_v60 = vpop.f32.mrb[43].mxu0 }
 0xdd8   :  { %5383 = vmatpush3.bf16.msra.mxu0 %v5382_v32  ;;  %v3065_v61 = vpop.f32.mrb[38].mxu1 }
 0xdd9   :  { %v3067_v62 = vpop.f32.mrb[39].mxu1 }
 0xdda   :  { %v3148_v1 = vpop.f32.mrb[44].mxu0 }
 0xddb   :  { %v5396_v2 = vpack.c.bf16 %v3148_v1, %v3142_v59  ;;  %v3150_v3 = vpop.f32.mrb[45].mxu0  ;;  %v3486_v59 = vld [vmem:[#allocation36 + $0x30] sm:$0xff] }
 0xddc   :  { %v3071_v4 = vpop.f32.mrb[40].mxu1  ;;  %v5404_v5 = vpack.c.bf16 %v3150_v3, %v3144_v60  ;;  %v3491_v60 = vld [vmem:[#allocation36 + $0x58] sm:$0xff]  ;;  %v3494_v1 = vld [vmem:[#allocation36 + $0x70] sm:$0xff] }
 0xddd   :  { %v5384_v63 = vpack.c.bf16 %v3071_v4, %v3065_v61  ;;  %v3073_v10 = vpop.f32.mrb[41].mxu1  ;;  %v3490_v61 = vld [vmem:[#allocation36 + $0x50] sm:$0xff]  ;;  %v3503_v3 = vld [vmem:[#allocation36 + $0xb8] sm:$0xff] }
 0xdde   :  { %v5392_v12 = vpack.c.bf16 %v3073_v10, %v3067_v62  ;;  %v3154_v13 = vpop.f32.mrb[46].mxu0  ;;  %v3495_v62 = vld [vmem:[#allocation36 + $0x78] sm:$0xff]  ;;  %v3502_v4 = vld [vmem:[#allocation36 + $0xb0] sm:$0xff] }
 0xddf   :  { %5385 = vmatprep.subr.bf16.mxu0 %v5384_v63  ;;  %v3156_v15 = vpop.f32.mrb[47].mxu0  ;;  %v3506_v63 = vld [vmem:[#allocation36 + $0xd0] sm:$0xff] }
 0xde0   :  { %5387 = vmatpush3.bf16.msra.mxu0 %v5386_v46  ;;  %v3496_v46 = vld [vmem:[#allocation36 + $0x80] sm:$0xff] }
 0xde1   :  { %5389 = vmatprep.subr.bf16.mxu0 %v5388_v58  ;;  %v3487_v58 = vld [vmem:[#allocation36 + $0x38] sm:$0xff] }
 0xde2   :  { %v3160_v14 = vpop.f32.mrb[48].mxu0 }
 0xde3   :  { %v5400_v36 = vpack.c.bf16 %v3160_v14, %v3154_v13  ;;  %v3162_v16 = vpop.f32.mrb[49].mxu0 }
 0xde4   :  { %5391 = vmatpush3.bf16.msra.mxu0 %v5390_v35  ;;  %v5408_v17 = vpack.c.bf16 %v3162_v16, %v3156_v15 }
 0xde5   :  { %5393 = vmatprep.subr.bf16.mxu0 %v5392_v12 }
 0xde8   :  { %5395 = vmatpush3.bf16.msra.mxu0 %v5394_v48  ;;  %v3500_v48 = vld [vmem:[#allocation36 + $0xa0] sm:$0xff] }
 0xde9   :  { %5397 = vmatprep.subr.bf16.mxu0 %v5396_v2  ;;  %v3499_v2 = vld [vmem:[#allocation36 + $0x98] sm:$0xff] }
 0xdec   :  { %5399 = vmatpush3.bf16.msra.mxu0 %v5398_v7  ;;  %v3488_v7 = vld [vmem:[#allocation36 + $0x40] sm:$0xff] }
 0xded   :  { %5401 = vmatprep.subr.bf16.mxu0 %v5400_v36 }
 0xdf0   :  { %v3231_v18 = vpop.f32.mrb[42].mxu1  ;;  %5403 = vmatpush3.bf16.msra.mxu0 %v5402_v50 }
 0xdf1   :  { %v3233_v19 = vpop.f32.mrb[43].mxu1  ;;  %5405 = vmatprep.subr.bf16.mxu0 %v5404_v5  ;;  %v3507_v5 = vld [vmem:[#allocation36 + $0xd8] sm:$0xff] }
 0xdf4   :  { %v3237_v20 = vpop.f32.mrb[44].mxu1  ;;  %5407 = vmatpush3.bf16.msra.mxu0 %v5406_v8 }
 0xdf5   :  { %v5413_v21 = vpack.c.bf16 %v3237_v20, %v3231_v18  ;;  %v3239_v22 = vpop.f32.mrb[45].mxu1  ;;  %5409 = vmatprep.subr.bf16.mxu0 %v5408_v17 }
 0xdf6   :  { %v5419_v23 = vpack.c.bf16 %v3239_v22, %v3233_v19  ;;  %v3320_v37 = vpop.f32.mrb[50].mxu0 }
 0xdf7   :  { %5414 = vmatpush1.bf16.msra.mxu1 %v5413_v21  ;;  %v3322_v24 = vpop.f32.mrb[51].mxu0 }
 0xdf8   :  { %v3243_v25 = vpop.f32.mrb[46].mxu1  ;;  %5411 = vmatpush3.bf16.msra.mxu0 %v5410_v52  ;;  %5415 = vmatprep.subr.bf16.mxu1 %v6005_v11 }
 0xdf9   :  { %v3245_v27 = vpop.f32.mrb[47].mxu1 }
 0xdfa   :  { %v3326_v29 = vpop.f32.mrb[52].mxu0 }
 0xdfb   :  { %v5425_v0 = vpack.c.bf16 %v3326_v29, %v3320_v37  ;;  %v3328_v6 = vpop.f32.mrb[53].mxu0  ;;  %3647 = vmatmul.mubr.f32.vlgmr.msra.gmra.mrb[58].mxu0 %v3480_v26 }
 0xdfc   :  { %v3249_v41 = vpop.f32.mrb[48].mxu1  ;;  %v5431_v30 = vpack.c.bf16 %v3328_v6, %v3322_v24  ;;  %3651 = vmatprep.mubr.f32.mxu0 %v3485_v28 }
 0xdfd   :  { %v5416_v32 = vpack.c.bf16 %v3249_v41, %v3243_v25  ;;  %v3251_v33 = vpop.f32.mrb[49].mxu1 }
 0xdfe   :  { %v5422_v35 = vpack.c.bf16 %v3251_v33, %v3245_v27  ;;  %v3332_v38 = vpop.f32.mrb[54].mxu0 }
 0xdff   :  { %5417 = vmatpush1.bf16.msra.mxu1 %v5416_v32  ;;  %v3334_v39 = vpop.f32.mrb[55].mxu0  ;;  %3652 = vmatmul.mubr.f32.gmra.mrb[60].mxu0 %v3484_v31 }
 0xe00   :  { %5418 = vmatprep.subr.bf16.mxu1 %v6005_v11  ;;  %3656 = vmatprep.mubr.f32.mxu0 %v3489_v34 }
 0xe02   :  { %v3338_v8 = vpop.f32.mrb[56].mxu0 }
 0xe03   :  { %5420 = vmatpush1.bf16.msra.mxu1 %v5419_v23  ;;  %v5428_v42 = vpack.c.bf16 %v3338_v8, %v3332_v38  ;;  %v3340_v9 = vpop.f32.mrb[57].mxu0  ;;  %3657 = vmatmul.mubr.f32.gmra.mrb[62].mxu0 %v3488_v7 }
 0xe04   :  { %5421 = vmatprep.subr.bf16.mxu1 %v6005_v11  ;;  %v5434_v43 = vpack.c.bf16 %v3340_v9, %v3334_v39  ;;  %3661 = vmatprep.mubr.f32.mxu0 %v3493_v40 }
 0xe07   :  { %5423 = vmatpush1.bf16.msra.mxu1 %v5422_v35  ;;  %3662 = vmatmul.mubr.f32.gmra.mrb[64].mxu0 %v3492_v44 }
 0xe08   :  { %5424 = vmatprep.subr.bf16.mxu1 %v6005_v11  ;;  %3666 = vmatprep.mubr.f32.mxu0 %v3497_v45 }
 0xe0b   :  { %5426 = vmatpush1.bf16.msra.mxu1 %v5425_v0  ;;  %3667 = vmatmul.mubr.f32.gmra.mrb[66].mxu0 %v3496_v46 }
 0xe0c   :  { %5427 = vmatprep.subr.bf16.mxu1 %v6005_v11  ;;  %3671 = vmatprep.mubr.f32.mxu0 %v3501_v47 }
 0xe0f   :  { %5429 = vmatpush1.bf16.msra.mxu1 %v5428_v42  ;;  %3672 = vmatmul.mubr.f32.gmra.mrb[68].mxu0 %v3500_v48 }
 0xe10   :  { %5430 = vmatprep.subr.bf16.mxu1 %v6005_v11  ;;  %v4613_v50 = vpop.f32.mrb[50].mxu1  ;;  %3676 = vmatprep.mubr.f32.mxu0 %v3505_v49 }
 0xe11   :  { %v3409_v52 = vpop.f32.mrb[51].mxu1 }
 0xe12   :  { %v5437_v53 = vpack.c.bf16 %v4613_v50, %v3409_v52 }
 0xe13   :  { %5432 = vmatpush1.bf16.msra.mxu1 %v5431_v30  ;;  %3677 = vmatmul.mubr.f32.gmra.mrb[70].mxu0 %v3504_v51 }
 0xe14   :  { %5433 = vmatprep.subr.bf16.mxu1 %v6005_v11  ;;  %v4616_v54 = vpop.f32.mrb[52].mxu1 }
 0xe15   :  { %v3419_v55 = vpop.f32.mrb[53].mxu1 }
 0xe16   :  { %v5440_v56 = vpack.c.bf16 %v4616_v54, %v3419_v55 }
 0xe17   :  { %5435 = vmatpush1.bf16.msra.mxu1 %v5434_v43 }
 0xe18   :  { %5436 = vmatprep.subr.bf16.mxu1 %v6005_v11 }
 0xe1b   :  { %5438 = vmatpush1.bf16.msra.mxu1 %v5437_v53 }
 0xe1c   :  { %5439 = vmatprep.subr.bf16.mxu1 %v6005_v11  ;;  %v3498_v11 = vld [vmem:[#allocation36 + $0x90] sm:$0xff] }
 0xe1f   :  { %5441 = vmatpush1.bf16.msra.mxu1 %v5440_v56 }
 0xe22   :  { %3747 = vmatmul.mubr.f32.vlgmr.msra.gmra.mrb[54].mxu1 %v3482_v57 }
 0xe23   :  { %3881 = vmatprep.mubr.msk.f32.mxu1 %vm3560_vm8, %v3487_v58 }
 0xe26   :  { %3752 = vmatmul.mubr.f32.gmra.mrb[56].mxu1 %v3486_v59 }
 0xe27   :  { %3882 = vmatprep.mubr.msk.f32.mxu1 %vm3560_vm8, %v3491_v60 }
 0xe2a   :  { %3757 = vmatmul.mubr.f32.gmra.mrb[58].mxu1 %v3490_v61 }
 0xe2b   :  { %3883 = vmatprep.mubr.msk.f32.mxu1 %vm3560_vm8, %v3495_v62 }
 0xe2e   :  { %3762 = vmatmul.mubr.f32.gmra.mrb[60].mxu1 %v3494_v1 }
 0xe2f   :  { %3884 = vmatprep.mubr.msk.f32.mxu1 %vm3560_vm8, %v3499_v2 }
 0xe32   :  { %3767 = vmatmul.mubr.f32.gmra.mrb[62].mxu1 %v3498_v11 }
 0xe33   :  { %3885 = vmatprep.mubr.msk.f32.mxu1 %vm3560_vm8, %v3503_v3 }
 0xe36   :  { %3772 = vmatmul.mubr.f32.gmra.mrb[64].mxu1 %v3502_v4 }
 0xe37   :  { %3886 = vmatprep.mubr.msk.f32.mxu1 %vm3560_vm8, %v3507_v5 }
 0xe3a   :  { %3777 = vmatmul.mubr.f32.gmra.mrb[66].mxu1 %v3506_v63 }
 0xece   :  { %v4148_v10 = vpop.f32.mrb[58].mxu0 }
 0xecf   :  { %v4149_v12 = vpop.f32.mrb[59].mxu0 }
 0xed0   :  { %v4150_v13 = vadd.f32 %v4149_v12, %v4148_v10 }
 0xed2   :  { %v4151_v15 = vpop.f32.mrb[60].mxu0 }
 0xed3   :  { %v4152_v14 = vpop.f32.mrb[61].mxu0 }
 0xed4   :  { %v4153_v36 = vadd.f32 %v4152_v14, %v4151_v15 }
 0xed6   :  { %v4154_v16 = vpop.f32.mrb[62].mxu0 }
 0xed7   :  { %v4155_v17 = vpop.f32.mrb[63].mxu0 }
 0xed8   :  { %v4156_v18 = vadd.f32 %v4155_v17, %v4154_v16 }
 0xeda   :  { %v4157_v19 = vpop.f32.mrb[64].mxu0 }
 0xedb   :  { %v4158_v20 = vpop.f32.mrb[65].mxu0 }
 0xedc   :  { %v4159_v21 = vadd.f32 %v4158_v20, %v4157_v19 }
 0xede   :  { %v4160_v22 = vpop.f32.mrb[66].mxu0 }
 0xedf   :  { %v4161_v23 = vpop.f32.mrb[67].mxu0 }
 0xee0   :  { %v4162_v37 = vadd.f32 %v4161_v23, %v4160_v22 }
 0xee2   :  { %v4163_v24 = vpop.f32.mrb[68].mxu0 }
 0xee3   :  { %v4164_v25 = vpop.f32.mrb[69].mxu0 }
 0xee4   :  { %v4165_v26 = vadd.f32 %v4164_v25, %v4163_v24 }
 0xee6   :  { %v4166_v27 = vpop.f32.mrb[70].mxu0 }
 0xee7   :  { %v4167_v28 = vpop.f32.mrb[71].mxu0 }
 0xee8   :  { %v4168_v29 = vadd.f32 %v4167_v28, %v4166_v27 }
 0xef5   :  { %v3748_v0 = vpop.f32.mrb[54].mxu1 }
 0xef6   :  { %v3749_v6 = vadd.f32 %v4150_v13, %v3748_v0  ;;  %v3750_v41 = vpop.f32.mrb[55].mxu1 }
 0xef8   :  { %v3887_v30 = vmul.f32 -1.442695, %v3749_v6 }
 0xef9   :  { %v3753_v31 = vpop.f32.mrb[56].mxu1 }
 0xefa   :  { %5484 = vpow2.f32 %v3887_v30  ;;  %v3754_v32 = vadd.f32 %v4153_v36, %v3753_v31  ;;  %v3755_v33 = vpop.f32.mrb[57].mxu1 }
 0xefc   :  { %v3888_v34 = vmul.f32 -1.442695, %v3754_v32 }
 0xefd   :  { %v3758_v35 = vpop.f32.mrb[58].mxu1 }
 0xefe   :  { %5486 = vpow2.f32 %v3888_v34  ;;  %v3759_v38 = vadd.f32 %v4156_v18, %v3758_v35  ;;  %v3760_v39 = vpop.f32.mrb[59].mxu1 }
 0xf00   :  { %v3889_v7 = vmul.f32 -1.442695, %v3759_v38 }
 0xf01   :  { %v3763_v40 = vpop.f32.mrb[60].mxu1 }
 0xf02   :  { %5488 = vpow2.f32 %v3889_v7  ;;  %v3764_v8 = vadd.f32 %v4159_v21, %v3763_v40  ;;  %v3765_v42 = vpop.f32.mrb[61].mxu1 }
 0xf04   :  { %v5485_v9 = vpop.eup %5484  ;;  %v3890_v43 = vmul.f32 -1.442695, %v3764_v8 }
 0xf05   :  { %v3803_v44 = vadd.f32 1.0, %v5485_v9  ;;  %v3768_v45 = vpop.f32.mrb[62].mxu1 }
 0xf06   :  { %5490 = vpow2.f32 %v3890_v43  ;;  %v3769_v46 = vadd.f32 %v4162_v37, %v3768_v45  ;;  %v3770_v47 = vpop.f32.mrb[63].mxu1 }
 0xf07   :  { %5492 = vrcp.f32 %v3803_v44 }
 0xf08   :  { %v5487_v48 = vpop.eup %5486  ;;  %v3891_v49 = vmul.f32 -1.442695, %v3769_v46 }
 0xf09   :  { %v3804_v50 = vadd.f32 1.0, %v5487_v48  ;;  %v3773_v51 = vpop.f32.mrb[64].mxu1 }
 0xf0a   :  { %5494 = vpow2.f32 %v3891_v49  ;;  %v3774_v52 = vadd.f32 %v4165_v26, %v3773_v51  ;;  %v3775_v53 = vpop.f32.mrb[65].mxu1 }
 0xf0b   :  { %5496 = vrcp.f32 %v3804_v50 }
 0xf0c   :  { %v5489_v54 = vpop.eup %5488  ;;  %v3892_v55 = vmul.f32 -1.442695, %v3774_v52 }
 0xf0d   :  { %v3805_v56 = vadd.f32 1.0, %v5489_v54  ;;  %v3778_v57 = vpop.f32.mrb[66].mxu1 }
 0xf0e   :  { %5498 = vpow2.f32 %v3892_v55  ;;  %v3779_v58 = vadd.f32 %v4168_v29, %v3778_v57  ;;  %v3780_v59 = vpop.f32.mrb[67].mxu1 }
 0xf0f   :  { %5500 = vrcp.f32 %v3805_v56 }
 0xf10   :  { %v5491_v60 = vpop.eup %5490  ;;  %v3893_v61 = vmul.f32 -1.442695, %v3779_v58 }
 0xf11   :  { %v5493_v62 = vpop.eup %5492  ;;  %v3806_v1 = vadd.f32 1.0, %v5491_v60 }
 0xf12   :  { %3824 = vst [vmem:[#allocation37] sm:$0xff] %v5493_v62  ;;  %5502 = vpow2.f32 %v3893_v61 }
 0xf13   :  { %5504 = vrcp.f32 %v3806_v1 }
 0xf14   :  { %v5495_v2 = vpop.eup %5494 }
 0xf15   :  { %v5497_v11 = vpop.eup %5496  ;;  %v3807_v3 = vadd.f32 1.0, %v5495_v2 }
 0xf16   :  { %3825 = vst [vmem:[#allocation37 + $0x8] sm:$0xff] %v5497_v11 }
 0xf17   :  { %5506 = vrcp.f32 %v3807_v3 }
 0xf18   :  { %v5499_v4 = vpop.eup %5498 }
 0xf19   :  { %v5501_v5 = vpop.eup %5500  ;;  %v3808_v63 = vadd.f32 1.0, %v5499_v4 }
 0xf1a   :  { %3826 = vst [vmem:[#allocation37 + $0x10] sm:$0xff] %v5501_v5 }
 0xf1b   :  { %5508 = vrcp.f32 %v3808_v63 }
 0xf1c   :  { %v5503_v10 = vpop.eup %5502 }
 0xf1d   :  { %v5505_v12 = vpop.eup %5504  ;;  %v3809_v13 = vadd.f32 1.0, %v5503_v10 }
 0xf1e   :  { %3827 = vst [vmem:[#allocation37 + $0x18] sm:$0xff] %v5505_v12 }
 0xf1f   :  { %5510 = vrcp.f32 %v3809_v13 }
 0xf21   :  { %v5507_v15 = vpop.eup %5506 }
 0xf22   :  { %3828 = vst [vmem:[#allocation37 + $0x20] sm:$0xff] %v5507_v15 }
 0xf25   :  { %v5509_v14 = vpop.eup %5508 }
 0xf26   :  { %3829 = vst [vmem:[#allocation37 + $0x28] sm:$0xff] %v5509_v14 }
 0xf29   :  { %v5511_v36 = vpop.eup %5510 }
 0xf2a   :  { %3830 = vst [vmem:[#allocation37 + $0x30] sm:$0xff] %v5511_v36 }
 0xf2b   :  { %5941 = shalt.err (!%p5938_p2)
}
 0xf2c   :  { %s6738_s16 = sld [smem:[#allocation66_spill]] }
 0xf32   :  { %s5942_s10 = scalar_lea.hbm %s6738_s16, 896 }
 0xf33   :  { %p5943_p3 = scmp.ne.s32.totalorder %s6738_s16, %s5942_s10  ;;  %p5946_p4 = scmp.lt.u32.totalorder %s5942_s10, %s6738_s16 }
 0xf35   :  { %p5948_p5 = pnand %p5946_p4, %p5943_p3 }
 0xf37   :  { %5951 = shalt.err (!%p5948_p5)
}
 0xf38   :  { %3842 = dma.vmem_to_hbm [thread:$0]  %s3837_s11, 896, %s6738_s16, [#allocation12], %s5985_s0, %s5985_s0, %s5986_s2  }
 0xf39   :  { %5974 = dma.done.wait [#allocation12], 896  }
 0xf3a   :  { %5975 = vsyncadd [#allocation12], 4294966400 }
 0xf3b   :  { %3846 = vsyncpa [#allocation11], 1 }
 0xf3c   :  { %3847 = vsyncpa [#allocation14], 1 }
 0xf3d   :  { %3848 = vsyncpa [#allocation17], 1 }
 0xf3e   :  { %3849 = vsyncpa [#allocation20], 1 }
 0xf3f   :  { %3850 = vsyncpa [#allocation23], 1 }
 0xf40   :  { %3851 = vsyncpa [#allocation26], 1 }
 0xf41   :  { %3852 = vsyncpa [#allocation29], 1 }
 0xf42   :  { %3853 = vsyncpa [#allocation32], 1 }
 0xf43   :  { %3854 = vsyncpa [#allocation35], 1 }
 0xf44   :  { %3855 = vsyncpa [#allocation12], 1 }
 0xf45   :  { %3856 = vsyncmov [#allocation9] }
 0xf48   :  { %s3857_s29 = vpop.sfrf %3856 }
 0xf49   :  { %p3894_p6 = scmp.ne.s32.totalorder %s3857_s29, 0 }
 0xf4b   :  { %3861 = shalt.err (%p3894_p6)  }
 0xf4c   :  { %3863 = vsyncmov [#allocation9 + $0x1] }
 0xf4f   :  { %s3864_s9 = vpop.sfrf %3863 }
 0xf50   :  { %p3895_p7 = scmp.ne.s32.totalorder %s3864_s9, 0 }
 0xf52   :  { %3868 = shalt.err (%p3895_p7)  }

</bundles_post_ra>
